<compile_context>
chip_gen: v6e
topology: v6e:2x2x1
jax: 0.10.0
libtpu: 0.0.40
codegen_flags: <defaults>
</compile_context>

<pallas_src>
import functools

import jax
import jax.numpy as jnp
import numpy as np
from jax.experimental import pallas as pl
from jax.experimental.pallas import tpu as pltpu

EPS = 1e-5
NBUF = 4          # depth-slab ring: slabs d, d+1, d+2 resident + 1 prefetch in flight


def _round_up(x, m):
    return (x + m - 1) // m * m


def _vmem_limit():
    """~3/4 of physical VMEM, capped at 96 MiB (conservative fallback: 48 MiB)."""
    try:
        cap = int(pltpu.get_tpu_info().vmem_capacity_bytes)
    except Exception:                      # noqa: BLE001 - older jax / no query
        cap = 64 * 1024 * 1024             # assume v7x-sized VMEM if unknown
    return max(32 * 1024 * 1024, min(96 * 1024 * 1024, (cap * 3) // 4))


def _row_tiling(m, target=2048):
    """Pick (padded_rows, tile): tile % 8 == 0, tile <= target, tile | padded_rows.

    Prefers an exact divisor of m (no padding copy); only pads when m has no
    reasonable multiple-of-8 divisor, so a single (m, Cp) mega-block can never
    be requested."""
    best = 0
    t = 8
    lim = min(m, target)
    while t <= lim:
        if m % t == 0:
            best = t
        t += 8
    if best >= min(m, 256):
        return m, best
    tm = max(8, min(1024, _round_up(m, 8)))
    return _round_up(m, tm), tm


# ---------------------------------------------------------------------------
# Pass A: 3x3x3 conv for one (n, d) spatial slab, depth slabs streamed through
# a manual DMA ring, accumulating per-n batch statistics (resident outputs).
# ---------------------------------------------------------------------------
def _conv3d_stats_kernel(xw_hbm, w_ref, y_ref, sum_ref, ssq_ref, slab, sem,
                         *, H, W, Cp):
    n = pl.program_id(0)
    d = pl.program_id(1)
    nd = pl.num_programs(1)
    L = H * W

    def dma(dd):
        slot = dd & (NBUF - 1)
        return pltpu.make_async_copy(xw_hbm.at[n, dd], slab.at[slot], sem.at[slot])

    @pl.when(d == 0)
    def _prime():                      # new batch element: ring holds nothing useful
        dma(0).start()
        dma(1).start()
        dma(2).start()

    @pl.when(d + 2 <= nd)              # prefetch slab d+3 (needed next step)
    def _prefetch():
        dma(d + 3).start()

    @pl.when(d == 0)
    def _wait_prime():
        dma(0).wait()
        dma(1).wait()

    dma(d + 2).wait()                  # newest slab needed this step

    acc = jnp.zeros((L, Cp), jnp.float32)
    for kd in range(3):                            # depth taps from the ring
        xk = slab.at[(d + kd) & (NBUF - 1)]        # bf16 ref view, no cast
        for kh in range(3):                        # height taps: aligned row slices
            acc += jnp.dot(xk[pl.ds(kh * W, L), :], w_ref[kd * 3 + kh],
                           preferred_element_type=jnp.float32)

    @pl.when(d == 0)
    def _init_stats():
        sum_ref[...] = jnp.zeros_like(sum_ref)
        ssq_ref[...] = jnp.zeros_like(ssq_ref)

    sum_ref[0:1, :] += jnp.sum(acc, axis=0, keepdims=True)
    ssq_ref[0:1, :] += jnp.sum(acc * acc, axis=0, keepdims=True)
    y_ref[...] = acc.astype(y_ref.dtype)


def _conv3d_with_stats(xw, w_flat, *, N, D, H, W, Cp):
    """xw: (N, D+2, (H+2)*W, 3*Cp) bf16 (stays in HBM) -> (y bf16, sum, sumsq)."""
    HpW = (H + 2) * W
    L = H * W
    kern = functools.partial(_conv3d_stats_kernel, H=H, W=W, Cp=Cp)
    return pl.pallas_call(
        kern,
        out_shape=(jax.ShapeDtypeStruct((N, D, L, Cp), jnp.bfloat16),
                   jax.ShapeDtypeStruct((N, 8, Cp), jnp.float32),
                   jax.ShapeDtypeStruct((N, 8, Cp), jnp.float32)),
        grid=(N, D),
        in_specs=[
            pl.BlockSpec(memory_space=pl.ANY),                 # xw: ring-DMA'd manually
            # TODO(synk): pipeline_mode=pl.Buffered(1) would single-buffer these
            # never-changing weights and save 9*3*Cp*Cp*2 bytes of VMEM.
            pl.BlockSpec((9, 3 * Cp, Cp), lambda n, d: (0, 0, 0)),
        ],
        out_specs=(
            pl.BlockSpec((None, None, L, Cp), lambda n, d: (n, d, 0, 0)),
            pl.BlockSpec((None, 8, Cp), lambda n, d: (n, 0, 0)),   # per-n partial stats
            pl.BlockSpec((None, 8, Cp), lambda n, d: (n, 0, 0)),
        ),
        scratch_shapes=[
            pltpu.VMEM((NBUF, HpW, 3 * Cp), jnp.bfloat16),     # depth-slab ring
            pltpu.SemaphoreType.DMA((NBUF,)),
        ],
        compiler_params=pltpu.CompilerParams(
            dimension_semantics=("parallel", "arbitrary"),
            vmem_limit_bytes=_vmem_limit()),
    )(xw, w_flat)


# ---------------------------------------------------------------------------
# Pass B: BN folded into per-channel scale/shift, optional residual, ReLU.
# ---------------------------------------------------------------------------
def _bn_act_kernel(y_ref, scale_ref, shift_ref, out_ref):
    z = y_ref[...].astype(jnp.float32) * scale_ref[...] + shift_ref[...]
    out_ref[...] = jnp.maximum(z, 0.0).astype(out_ref.dtype)


def _bn_res_act_kernel(y_ref, scale_ref, shift_ref, res_ref, out_ref):
    z = (y_ref[...].astype(jnp.float32) * scale_ref[...] + shift_ref[...]
         + res_ref[...].astype(jnp.float32))
    out_ref[...] = jnp.maximum(z, 0.0).astype(out_ref.dtype)


def _bn_apply(y_flat, scale, shift, res, *, out_dtype):
    m, cp = y_flat.shape
    mp, tm = _row_tiling(m)
    if mp != m:                              # rare: pad rows so the tile divides
        y_flat = jnp.pad(y_flat, ((0, mp - m), (0, 0)))
        if res is not None:
            res = jnp.pad(res, ((0, mp - m), (0, 0)))
    row_spec = pl.BlockSpec((tm, cp), lambda i: (i, 0))
    vec_spec = pl.BlockSpec((1, cp), lambda i: (0, 0))
    if res is None:
        kernel = _bn_act_kernel
        in_specs = [row_spec, vec_spec, vec_spec]
        args = (y_flat, scale, shift)
    else:
        kernel = _bn_res_act_kernel
        in_specs = [row_spec, vec_spec, vec_spec, row_spec]
        args = (y_flat, scale, shift, res)
    out = pl.pallas_call(
        kernel,
        out_shape=jax.ShapeDtypeStruct((mp, cp), out_dtype),
        grid=(mp // tm,),
        in_specs=in_specs,
        out_specs=row_spec,
        compiler_params=pltpu.CompilerParams(
            dimension_semantics=("parallel",),
            vmem_limit_bytes=_vmem_limit()),
    )(*args)
    return out[:m] if mp != m else out


# ---------------------------------------------------------------------------
# Wrapper / glue
# ---------------------------------------------------------------------------
def _width_tap_gather(x_ndhwc):
    """(N, D, H, W, Cp) -> (N, D+2, (H+2)*W, 3*Cp) bf16.

    Pads D/H/W by one and concatenates the three width taps along channels
    (a 3x partial im2col; depth taps come from the kernel's DMA ring, height
    taps from in-kernel row slices).  W % 8 == 0 keeps those slices aligned.
    # TODO(synk): fuse this pad+concat into the previous block's pass B (or do
    # width taps in-kernel via pltpu.roll) to kill this extra activation
    # round trip through HBM."""
    N, D, H, W, Cp = x_ndhwc.shape
    xp = jnp.pad(x_ndhwc, ((0, 0), (1, 1), (1, 1), (1, 1), (0, 0)))
    xw = jnp.concatenate([xp[:, :, :, kw:kw + W, :] for kw in range(3)], axis=-1)
    return xw.reshape(N, D + 2, (H + 2) * W, 3 * Cp).astype(jnp.bfloat16)


@functools.partial(jax.jit, static_argnames=("kernel",))
def resblock_forward(x_ncdhw, params, kernel=3):
    if kernel != 3:
        raise NotImplementedError("Pallas ResBlock implemented for kernel=3 only.")
    N, C, D, H, W = x_ncdhw.shape
    Cp = _round_up(C, 128)                 # lane-dense channel padding
    M = N * D * H * W

    # NDHWC, bf16 activation stream (conv operands are bf16 on the MXU anyway).
    x = jnp.transpose(x_ncdhw, (0, 2, 3, 4, 1)).astype(jnp.bfloat16)
    x = jnp.pad(x, ((0, 0), (0, 0), (0, 0), (0, 0), (0, Cp - C)))
    res_flat = x.reshape(M, Cp)            # bf16 residual stream

    def prep_w(w):    # (Co, Ci, 3, 3, 3) -> (9, 3*Cp, Cp), K rows = kw*Cp + ci
        wt = jnp.transpose(w, (2, 3, 4, 1, 0))                 # (kd, kh, kw, Ci, Co)
        wt = jnp.pad(wt, ((0, 0), (0, 0), (0, 0), (0, Cp - C), (0, Cp - C)))
        return wt.reshape(9, 3 * Cp, Cp).astype(jnp.bfloat16)

    def prep_vec(v):
        return jnp.pad(v, (0, Cp - C)).astype(jnp.float32)     # (Cp,)

    def conv_bn_block(h_ndhwc, w, g, be, residual, out_dtype):
        xw = _width_tap_gather(h_ndhwc)
        y, s1, s2 = _conv3d_with_stats(xw, prep_w(w), N=N, D=D, H=H, W=W, Cp=Cp)
        s1 = jnp.sum(s1, axis=(0, 1))                          # reduce per-n partials
        s2 = jnp.sum(s2, axis=(0, 1))
        mean = s1 / M                                          # training-mode stats
        var = jnp.maximum(s2 / M - mean * mean, 0.0)           # biased var, clamped
        scale = prep_vec(g) * jax.lax.rsqrt(var + EPS)
        shift = prep_vec(be) - mean * scale
        # The Conv3d bias shifts every channel by a constant, which training-mode
        # BatchNorm removes exactly, so it never needs to enter the kernels.
        return _bn_apply(y.reshape(M, Cp), scale[None, :], shift[None, :],
                         residual, out_dtype=out_dtype)

    # block0: ReLU(BN(Conv(x0)))   (bf16 output feeds the next conv)
    h1 = conv_bn_block(x, params["w1"], params["g1"], params["be1"],
                       None, jnp.bfloat16)
    # block1 + block2: ReLU(BN(Conv(h1)) + x0)
    out = conv_bn_block(h1.reshape(N, D, H, W, Cp),
                        params["w2"], params["g2"], params["be2"],
                        res_flat, jnp.float32)

    out = out.reshape(N, D, H, W, Cp)[..., :C]
    return jnp.transpose(out, (0, 4, 1, 2, 3))                 # back to NCDHW


def _reference(x, params):
    """Pure-JAX reference matching the PyTorch ResBlock forward (training BN)."""
    def conv3d(h, w, b):
        y = jax.lax.conv_general_dilated(
            h, w, window_strides=(1, 1, 1), padding="SAME",
            dimension_numbers=("NCDHW", "OIDHW", "NCDHW"))
        return y + b[None, :, None, None, None]

    def bn(h, g, be):
        mean = jnp.mean(h, axis=(0, 2, 3, 4), keepdims=True)
        var = jnp.mean((h - mean) ** 2, axis=(0, 2, 3, 4), keepdims=True)
        return ((h - mean) / jnp.sqrt(var + EPS)
                * g[None, :, None, None, None] + be[None, :, None, None, None])

    h = jax.nn.relu(bn(conv3d(x, params["w1"], params["b1"]),
                       params["g1"], params["be1"]))
    h = bn(conv3d(h, params["w2"], params["b2"]), params["g2"], params["be2"])
    return jax.nn.relu(h + x)


if __name__ == "__main__":
    # NOTE: at C=8 (Cp padded to 128) most MXU work is on zero padding; this
    # layout pays off at C >= 128.  Small shapes are used here only for the test.
    N, C, D, H, W = 2, 8, 8, 8, 8
    K = 3

    key = jax.random.PRNGKey(0)
    ks = jax.random.split(key, 9)
    x = jax.random.normal(ks[0], (N, C, D, H, W), jnp.float32)

    params = {
        "w1": jax.random.normal(ks[1], (C, C, K, K, K), jnp.float32) * 0.1,
        "b1": jax.random.normal(ks[2], (C,), jnp.float32) * 0.1,
        "g1": 1.0 + 0.1 * jax.random.normal(ks[3], (C,), jnp.float32),
        "be1": 0.1 * jax.random.normal(ks[4], (C,), jnp.float32),
        "w2": jax.random.normal(ks[5], (C, C, K, K, K), jnp.float32) * 0.1,
        "b2": jax.random.normal(ks[6], (C,), jnp.float32) * 0.1,
        "g2": 1.0 + 0.1 * jax.random.normal(ks[7], (C,), jnp.float32),
        "be2": 0.1 * jax.random.normal(ks[8], (C,), jnp.float32),
    }

    out = jax.block_until_ready(resblock_forward(x, params, kernel=K))
    ref = jax.block_until_ready(_reference(x, params))

    # bf16 activations / matmul operands -> looser tolerance than pure f32.
    np.testing.assert_allclose(np.asarray(out), np.asarray(ref),
                               rtol=5e-2, atol=5e-2)

    print("KERNEL_OK")
</pallas_src>

<mosaic_0001>
module attributes {stable_mosaic.version = 11 : i64} {
  func.func @_conv3d_stats_kernel(%arg0: i32, %arg1: i32, %arg2: memref<2x10x80x384xbf16, #tpu.memory_space<any>>, %arg3: memref<9x384x128xbf16, #tpu.memory_space<vmem>>, %arg4: memref<1x1x64x128xbf16, #tpu.memory_space<vmem>>, %arg5: memref<1x8x128xf32, #tpu.memory_space<vmem>>, %arg6: memref<1x8x128xf32, #tpu.memory_space<vmem>>, %arg7: memref<4x80x384xbf16, #tpu.memory_space<vmem>>, %arg8: memref<4x!tpu.dma_semaphore, #tpu.memory_space<semaphore_mem>>) attributes {dimension_semantics = [#tpu.dimension_semantics<parallel>, #tpu.dimension_semantics<arbitrary>], iteration_bounds = array<i64: 2, 8>, scalar_prefetch = 0 : i64, scratch_operands = 2 : i64, tpu.core_type = #tpu.core_type<tc>, window_params = [{}, {pipeline_mode = #tpu.pipeline_mode<synchronous>, transform_indices = @transform_1, window_bounds = array<i64: 9, 384, 128>}, {transform_indices = @transform_2, window_bounds = array<i64: 1, 1, 64, 128>}, {transform_indices = @transform_3, window_bounds = array<i64: 1, 8, 128>}, {transform_indices = @transform_4, window_bounds = array<i64: 1, 8, 128>}]} {
    %c0_i32 = arith.constant 0 : i32
    %0 = arith.cmpi eq, %arg1, %c0_i32 : i32
    %1 = arith.extui %0 : i1 to i32
    %c0_i32_0 = arith.constant 0 : i32
    %2 = arith.cmpi ne, %1, %c0_i32_0 : i32
    scf.if %2 {
      %c0_i32_96 = arith.constant 0 : i32
      %c0_i32_97 = arith.constant 0 : i32
      %c0_i32_98 = arith.constant 0 : i32
      %c0_i32_99 = arith.constant 0 : i32
      %c0_i32_100 = arith.constant 0 : i32
      %112 = tpu.memref_slice %arg2[%arg0, %c0_i32_96, %c0_i32_99, %c0_i32_100] : memref<2x10x80x384xbf16, #tpu.memory_space<any>> -> memref<1x1x80x384xbf16, #tpu.memory_space<any>>
      %113 = tpu.memref_squeeze %112 : memref<1x1x80x384xbf16, #tpu.memory_space<any>> -> memref<80x384xbf16, #tpu.memory_space<any>>
      %c0_i32_101 = arith.constant 0 : i32
      %c0_i32_102 = arith.constant 0 : i32
      %114 = tpu.memref_slice %arg7[%c0_i32_97, %c0_i32_101, %c0_i32_102] : memref<4x80x384xbf16, #tpu.memory_space<vmem>> -> memref<1x80x384xbf16, #tpu.memory_space<vmem>>
      %115 = tpu.memref_squeeze %114 : memref<1x80x384xbf16, #tpu.memory_space<vmem>> -> memref<80x384xbf16, #tpu.memory_space<vmem>>
      %116 = tpu.memref_slice %arg8[%c0_i32_98] : memref<4x!tpu.dma_semaphore, #tpu.memory_space<semaphore_mem>> -> memref<1x!tpu.dma_semaphore, #tpu.memory_space<semaphore_mem>>
      %117 = tpu.memref_squeeze %116 : memref<1x!tpu.dma_semaphore, #tpu.memory_space<semaphore_mem>> -> memref<!tpu.dma_semaphore, #tpu.memory_space<semaphore_mem>>
      tpu.enqueue_dma source(%113 : memref<80x384xbf16, #tpu.memory_space<any>>) target(%115 : memref<80x384xbf16, #tpu.memory_space<vmem>>) target_semaphore(%117 : memref<!tpu.dma_semaphore, #tpu.memory_space<semaphore_mem>>)
      %c1_i32_103 = arith.constant 1 : i32
      %c1_i32_104 = arith.constant 1 : i32
      %c1_i32_105 = arith.constant 1 : i32
      %c0_i32_106 = arith.constant 0 : i32
      %c0_i32_107 = arith.constant 0 : i32
      %118 = tpu.memref_slice %arg2[%arg0, %c1_i32_103, %c0_i32_106, %c0_i32_107] : memref<2x10x80x384xbf16, #tpu.memory_space<any>> -> memref<1x1x80x384xbf16, #tpu.memory_space<any>>
      %119 = tpu.memref_squeeze %118 : memref<1x1x80x384xbf16, #tpu.memory_space<any>> -> memref<80x384xbf16, #tpu.memory_space<any>>
      %c0_i32_108 = arith.constant 0 : i32
      %c0_i32_109 = arith.constant 0 : i32
      %120 = tpu.memref_slice %arg7[%c1_i32_104, %c0_i32_108, %c0_i32_109] : memref<4x80x384xbf16, #tpu.memory_space<vmem>> -> memref<1x80x384xbf16, #tpu.memory_space<vmem>>
      %121 = tpu.memref_squeeze %120 : memref<1x80x384xbf16, #tpu.memory_space<vmem>> -> memref<80x384xbf16, #tpu.memory_space<vmem>>
      %122 = tpu.memref_slice %arg8[%c1_i32_105] : memref<4x!tpu.dma_semaphore, #tpu.memory_space<semaphore_mem>> -> memref<1x!tpu.dma_semaphore, #tpu.memory_space<semaphore_mem>>
      %123 = tpu.memref_squeeze %122 : memref<1x!tpu.dma_semaphore, #tpu.memory_space<semaphore_mem>> -> memref<!tpu.dma_semaphore, #tpu.memory_space<semaphore_mem>>
      tpu.enqueue_dma source(%119 : memref<80x384xbf16, #tpu.memory_space<any>>) target(%121 : memref<80x384xbf16, #tpu.memory_space<vmem>>) target_semaphore(%123 : memref<!tpu.dma_semaphore, #tpu.memory_space<semaphore_mem>>)
      %c2_i32_110 = arith.constant 2 : i32
      %c2_i32_111 = arith.constant 2 : i32
      %c2_i32_112 = arith.constant 2 : i32
      %c0_i32_113 = arith.constant 0 : i32
      %c0_i32_114 = arith.constant 0 : i32
      %124 = tpu.memref_slice %arg2[%arg0, %c2_i32_110, %c0_i32_113, %c0_i32_114] : memref<2x10x80x384xbf16, #tpu.memory_space<any>> -> memref<1x1x80x384xbf16, #tpu.memory_space<any>>
      %125 = tpu.memref_squeeze %124 : memref<1x1x80x384xbf16, #tpu.memory_space<any>> -> memref<80x384xbf16, #tpu.memory_space<any>>
      %c0_i32_115 = arith.constant 0 : i32
      %c0_i32_116 = arith.constant 0 : i32
      %126 = tpu.memref_slice %arg7[%c2_i32_111, %c0_i32_115, %c0_i32_116] : memref<4x80x384xbf16, #tpu.memory_space<vmem>> -> memref<1x80x384xbf16, #tpu.memory_space<vmem>>
      %127 = tpu.memref_squeeze %126 : memref<1x80x384xbf16, #tpu.memory_space<vmem>> -> memref<80x384xbf16, #tpu.memory_space<vmem>>
      %128 = tpu.memref_slice %arg8[%c2_i32_112] : memref<4x!tpu.dma_semaphore, #tpu.memory_space<semaphore_mem>> -> memref<1x!tpu.dma_semaphore, #tpu.memory_space<semaphore_mem>>
      %129 = tpu.memref_squeeze %128 : memref<1x!tpu.dma_semaphore, #tpu.memory_space<semaphore_mem>> -> memref<!tpu.dma_semaphore, #tpu.memory_space<semaphore_mem>>
      tpu.enqueue_dma source(%125 : memref<80x384xbf16, #tpu.memory_space<any>>) target(%127 : memref<80x384xbf16, #tpu.memory_space<vmem>>) target_semaphore(%129 : memref<!tpu.dma_semaphore, #tpu.memory_space<semaphore_mem>>)
    } else {
    }
    %c2_i32 = arith.constant 2 : i32
    %3 = arith.addi %arg1, %c2_i32 : i32
    %c8_i32 = arith.constant 8 : i32
    %4 = arith.cmpi sle, %3, %c8_i32 : i32
    %5 = arith.extui %4 : i1 to i32
    %c0_i32_1 = arith.constant 0 : i32
    %6 = arith.cmpi ne, %5, %c0_i32_1 : i32
    scf.if %6 {
      %c3_i32_96 = arith.constant 3 : i32
      %112 = arith.addi %arg1, %c3_i32_96 : i32
      %c3_i32_97 = arith.constant 3 : i32
      %113 = arith.andi %112, %c3_i32_97 : i32
      %c0_i32_98 = arith.constant 0 : i32
      %c0_i32_99 = arith.constant 0 : i32
      %114 = tpu.memref_slice %arg2[%arg0, %112, %c0_i32_98, %c0_i32_99] : memref<2x10x80x384xbf16, #tpu.memory_space<any>> -> memref<1x1x80x384xbf16, #tpu.memory_space<any>>
      %115 = tpu.memref_squeeze %114 : memref<1x1x80x384xbf16, #tpu.memory_space<any>> -> memref<80x384xbf16, #tpu.memory_space<any>>
      %c0_i32_100 = arith.constant 0 : i32
      %c0_i32_101 = arith.constant 0 : i32
      %116 = tpu.memref_slice %arg7[%113, %c0_i32_100, %c0_i32_101] : memref<4x80x384xbf16, #tpu.memory_space<vmem>> -> memref<1x80x384xbf16, #tpu.memory_space<vmem>>
      %117 = tpu.memref_squeeze %116 : memref<1x80x384xbf16, #tpu.memory_space<vmem>> -> memref<80x384xbf16, #tpu.memory_space<vmem>>
      %118 = tpu.memref_slice %arg8[%113] : memref<4x!tpu.dma_semaphore, #tpu.memory_space<semaphore_mem>> -> memref<1x!tpu.dma_semaphore, #tpu.memory_space<semaphore_mem>>
      %119 = tpu.memref_squeeze %118 : memref<1x!tpu.dma_semaphore, #tpu.memory_space<semaphore_mem>> -> memref<!tpu.dma_semaphore, #tpu.memory_space<semaphore_mem>>
      tpu.enqueue_dma source(%115 : memref<80x384xbf16, #tpu.memory_space<any>>) target(%117 : memref<80x384xbf16, #tpu.memory_space<vmem>>) target_semaphore(%119 : memref<!tpu.dma_semaphore, #tpu.memory_space<semaphore_mem>>)
    } else {
    }
    %c0_i32_2 = arith.constant 0 : i32
    %7 = arith.cmpi eq, %arg1, %c0_i32_2 : i32
    %8 = arith.extui %7 : i1 to i32
    %c0_i32_3 = arith.constant 0 : i32
    %9 = arith.cmpi ne, %8, %c0_i32_3 : i32
    scf.if %9 {
      %c0_i32_96 = arith.constant 0 : i32
      %c0_i32_97 = arith.constant 0 : i32
      %c0_i32_98 = arith.constant 0 : i32
      %c0_i32_99 = arith.constant 0 : i32
      %c0_i32_100 = arith.constant 0 : i32
      %112 = tpu.memref_slice %arg2[%arg0, %c0_i32_96, %c0_i32_99, %c0_i32_100] : memref<2x10x80x384xbf16, #tpu.memory_space<any>> -> memref<1x1x80x384xbf16, #tpu.memory_space<any>>
      %113 = tpu.memref_squeeze %112 : memref<1x1x80x384xbf16, #tpu.memory_space<any>> -> memref<80x384xbf16, #tpu.memory_space<any>>
      %c0_i32_101 = arith.constant 0 : i32
      %c0_i32_102 = arith.constant 0 : i32
      %114 = tpu.memref_slice %arg7[%c0_i32_97, %c0_i32_101, %c0_i32_102] : memref<4x80x384xbf16, #tpu.memory_space<vmem>> -> memref<1x80x384xbf16, #tpu.memory_space<vmem>>
      %115 = tpu.memref_squeeze %114 : memref<1x80x384xbf16, #tpu.memory_space<vmem>> -> memref<80x384xbf16, #tpu.memory_space<vmem>>
      %116 = tpu.memref_slice %arg8[%c0_i32_98] : memref<4x!tpu.dma_semaphore, #tpu.memory_space<semaphore_mem>> -> memref<1x!tpu.dma_semaphore, #tpu.memory_space<semaphore_mem>>
      %117 = tpu.memref_squeeze %116 : memref<1x!tpu.dma_semaphore, #tpu.memory_space<semaphore_mem>> -> memref<!tpu.dma_semaphore, #tpu.memory_space<semaphore_mem>>
      tpu.wait_dma2 semaphore(%117 : memref<!tpu.dma_semaphore, #tpu.memory_space<semaphore_mem>>) src(%113 : memref<80x384xbf16, #tpu.memory_space<any>>) dst(%115 : memref<80x384xbf16, #tpu.memory_space<vmem>>)
      %c1_i32_103 = arith.constant 1 : i32
      %c1_i32_104 = arith.constant 1 : i32
      %c1_i32_105 = arith.constant 1 : i32
      %c0_i32_106 = arith.constant 0 : i32
      %c0_i32_107 = arith.constant 0 : i32
      %118 = tpu.memref_slice %arg2[%arg0, %c1_i32_103, %c0_i32_106, %c0_i32_107] : memref<2x10x80x384xbf16, #tpu.memory_space<any>> -> memref<1x1x80x384xbf16, #tpu.memory_space<any>>
      %119 = tpu.memref_squeeze %118 : memref<1x1x80x384xbf16, #tpu.memory_space<any>> -> memref<80x384xbf16, #tpu.memory_space<any>>
      %c0_i32_108 = arith.constant 0 : i32
      %c0_i32_109 = arith.constant 0 : i32
      %120 = tpu.memref_slice %arg7[%c1_i32_104, %c0_i32_108, %c0_i32_109] : memref<4x80x384xbf16, #tpu.memory_space<vmem>> -> memref<1x80x384xbf16, #tpu.memory_space<vmem>>
      %121 = tpu.memref_squeeze %120 : memref<1x80x384xbf16, #tpu.memory_space<vmem>> -> memref<80x384xbf16, #tpu.memory_space<vmem>>
      %122 = tpu.memref_slice %arg8[%c1_i32_105] : memref<4x!tpu.dma_semaphore, #tpu.memory_space<semaphore_mem>> -> memref<1x!tpu.dma_semaphore, #tpu.memory_space<semaphore_mem>>
      %123 = tpu.memref_squeeze %122 : memref<1x!tpu.dma_semaphore, #tpu.memory_space<semaphore_mem>> -> memref<!tpu.dma_semaphore, #tpu.memory_space<semaphore_mem>>
      tpu.wait_dma2 semaphore(%123 : memref<!tpu.dma_semaphore, #tpu.memory_space<semaphore_mem>>) src(%119 : memref<80x384xbf16, #tpu.memory_space<any>>) dst(%121 : memref<80x384xbf16, #tpu.memory_space<vmem>>)
    } else {
    }
    %c2_i32_4 = arith.constant 2 : i32
    %10 = arith.addi %arg1, %c2_i32_4 : i32
    %c3_i32 = arith.constant 3 : i32
    %11 = arith.andi %10, %c3_i32 : i32
    %c0_i32_5 = arith.constant 0 : i32
    %c0_i32_6 = arith.constant 0 : i32
    %12 = tpu.memref_slice %arg2[%arg0, %10, %c0_i32_5, %c0_i32_6] : memref<2x10x80x384xbf16, #tpu.memory_space<any>> -> memref<1x1x80x384xbf16, #tpu.memory_space<any>>
    %13 = tpu.memref_squeeze %12 : memref<1x1x80x384xbf16, #tpu.memory_space<any>> -> memref<80x384xbf16, #tpu.memory_space<any>>
    %c0_i32_7 = arith.constant 0 : i32
    %c0_i32_8 = arith.constant 0 : i32
    %14 = tpu.memref_slice %arg7[%11, %c0_i32_7, %c0_i32_8] : memref<4x80x384xbf16, #tpu.memory_space<vmem>> -> memref<1x80x384xbf16, #tpu.memory_space<vmem>>
    %15 = tpu.memref_squeeze %14 : memref<1x80x384xbf16, #tpu.memory_space<vmem>> -> memref<80x384xbf16, #tpu.memory_space<vmem>>
    %16 = tpu.memref_slice %arg8[%11] : memref<4x!tpu.dma_semaphore, #tpu.memory_space<semaphore_mem>> -> memref<1x!tpu.dma_semaphore, #tpu.memory_space<semaphore_mem>>
    %17 = tpu.memref_squeeze %16 : memref<1x!tpu.dma_semaphore, #tpu.memory_space<semaphore_mem>> -> memref<!tpu.dma_semaphore, #tpu.memory_space<semaphore_mem>>
    tpu.wait_dma2 semaphore(%17 : memref<!tpu.dma_semaphore, #tpu.memory_space<semaphore_mem>>) src(%13 : memref<80x384xbf16, #tpu.memory_space<any>>) dst(%15 : memref<80x384xbf16, #tpu.memory_space<vmem>>)
    %cst = arith.constant 0.000000e+00 : f32
    %18 = vector.broadcast %cst : f32 to vector<64x128xf32>
    %c0_i32_9 = arith.constant 0 : i32
    %19 = arith.addi %arg1, %c0_i32_9 : i32
    %c3_i32_10 = arith.constant 3 : i32
    %20 = arith.andi %19, %c3_i32_10 : i32
    %c0_i32_11 = arith.constant 0 : i32
    %c0_i32_12 = arith.constant 0 : i32
    %21 = tpu.memref_slice %arg7[%20, %c0_i32_11, %c0_i32_12] : memref<4x80x384xbf16, #tpu.memory_space<vmem>> -> memref<1x80x384xbf16, #tpu.memory_space<vmem>>
    %22 = tpu.memref_squeeze %21 : memref<1x80x384xbf16, #tpu.memory_space<vmem>> -> memref<80x384xbf16, #tpu.memory_space<vmem>>
    %c0 = arith.constant 0 : index
    %c0_13 = arith.constant 0 : index
    %23 = vector.load %22[%c0, %c0_13] : memref<80x384xbf16, #tpu.memory_space<vmem>>, vector<64x384xbf16>
    %c0_14 = arith.constant 0 : index
    %c0_15 = arith.constant 0 : index
    %c0_16 = arith.constant 0 : index
    %24 = vector.load %arg3[%c0_14, %c0_15, %c0_16] : memref<9x384x128xbf16, #tpu.memory_space<vmem>>, vector<1x384x128xbf16>
    %25 = vector.shape_cast %24 : vector<1x384x128xbf16> to vector<384x128xbf16>
    %cst_17 = arith.constant dense<0.000000e+00> : vector<64x128xf32>
    %26 = tpu.matmul %23, %25, %cst_17 {dimension_numbers = #tpu.dot_dimension_numbers<[1], [0], [0], [1], [0, 0, 1, 1], [], []>} : vector<64x384xbf16>, vector<384x128xbf16>, vector<64x128xf32> -> vector<64x128xf32>
    %27 = arith.addf %18, %26 : vector<64x128xf32>
    %c0_i32_18 = arith.constant 0 : i32
    %c0_i32_19 = arith.constant 0 : i32
    %28 = tpu.memref_slice %arg7[%20, %c0_i32_18, %c0_i32_19] : memref<4x80x384xbf16, #tpu.memory_space<vmem>> -> memref<1x80x384xbf16, #tpu.memory_space<vmem>>
    %29 = tpu.memref_squeeze %28 : memref<1x80x384xbf16, #tpu.memory_space<vmem>> -> memref<80x384xbf16, #tpu.memory_space<vmem>>
    %c8 = arith.constant 8 : index
    %c0_20 = arith.constant 0 : index
    %30 = vector.load %29[%c8, %c0_20] : memref<80x384xbf16, #tpu.memory_space<vmem>>, vector<64x384xbf16>
    %c1 = arith.constant 1 : index
    %c0_21 = arith.constant 0 : index
    %c0_22 = arith.constant 0 : index
    %31 = vector.load %arg3[%c1, %c0_21, %c0_22] : memref<9x384x128xbf16, #tpu.memory_space<vmem>>, vector<1x384x128xbf16>
    %32 = vector.shape_cast %31 : vector<1x384x128xbf16> to vector<384x128xbf16>
    %cst_23 = arith.constant dense<0.000000e+00> : vector<64x128xf32>
    %33 = tpu.matmul %30, %32, %cst_23 {dimension_numbers = #tpu.dot_dimension_numbers<[1], [0], [0], [1], [0, 0, 1, 1], [], []>} : vector<64x384xbf16>, vector<384x128xbf16>, vector<64x128xf32> -> vector<64x128xf32>
    %34 = arith.addf %27, %33 : vector<64x128xf32>
    %c0_i32_24 = arith.constant 0 : i32
    %c0_i32_25 = arith.constant 0 : i32
    %35 = tpu.memref_slice %arg7[%20, %c0_i32_24, %c0_i32_25] : memref<4x80x384xbf16, #tpu.memory_space<vmem>> -> memref<1x80x384xbf16, #tpu.memory_space<vmem>>
    %36 = tpu.memref_squeeze %35 : memref<1x80x384xbf16, #tpu.memory_space<vmem>> -> memref<80x384xbf16, #tpu.memory_space<vmem>>
    %c16 = arith.constant 16 : index
    %c0_26 = arith.constant 0 : index
    %37 = vector.load %36[%c16, %c0_26] : memref<80x384xbf16, #tpu.memory_space<vmem>>, vector<64x384xbf16>
    %c2 = arith.constant 2 : index
    %c0_27 = arith.constant 0 : index
    %c0_28 = arith.constant 0 : index
    %38 = vector.load %arg3[%c2, %c0_27, %c0_28] : memref<9x384x128xbf16, #tpu.memory_space<vmem>>, vector<1x384x128xbf16>
    %39 = vector.shape_cast %38 : vector<1x384x128xbf16> to vector<384x128xbf16>
    %cst_29 = arith.constant dense<0.000000e+00> : vector<64x128xf32>
    %40 = tpu.matmul %37, %39, %cst_29 {dimension_numbers = #tpu.dot_dimension_numbers<[1], [0], [0], [1], [0, 0, 1, 1], [], []>} : vector<64x384xbf16>, vector<384x128xbf16>, vector<64x128xf32> -> vector<64x128xf32>
    %41 = arith.addf %34, %40 : vector<64x128xf32>
    %c1_i32 = arith.constant 1 : i32
    %42 = arith.addi %arg1, %c1_i32 : i32
    %c3_i32_30 = arith.constant 3 : i32
    %43 = arith.andi %42, %c3_i32_30 : i32
    %c0_i32_31 = arith.constant 0 : i32
    %c0_i32_32 = arith.constant 0 : i32
    %44 = tpu.memref_slice %arg7[%43, %c0_i32_31, %c0_i32_32] : memref<4x80x384xbf16, #tpu.memory_space<vmem>> -> memref<1x80x384xbf16, #tpu.memory_space<vmem>>
    %45 = tpu.memref_squeeze %44 : memref<1x80x384xbf16, #tpu.memory_space<vmem>> -> memref<80x384xbf16, #tpu.memory_space<vmem>>
    %c0_33 = arith.constant 0 : index
    %c0_34 = arith.constant 0 : index
    %46 = vector.load %45[%c0_33, %c0_34] : memref<80x384xbf16, #tpu.memory_space<vmem>>, vector<64x384xbf16>
    %c3 = arith.constant 3 : index
    %c0_35 = arith.constant 0 : index
    %c0_36 = arith.constant 0 : index
    %47 = vector.load %arg3[%c3, %c0_35, %c0_36] : memref<9x384x128xbf16, #tpu.memory_space<vmem>>, vector<1x384x128xbf16>
    %48 = vector.shape_cast %47 : vector<1x384x128xbf16> to vector<384x128xbf16>
    %cst_37 = arith.constant dense<0.000000e+00> : vector<64x128xf32>
    %49 = tpu.matmul %46, %48, %cst_37 {dimension_numbers = #tpu.dot_dimension_numbers<[1], [0], [0], [1], [0, 0, 1, 1], [], []>} : vector<64x384xbf16>, vector<384x128xbf16>, vector<64x128xf32> -> vector<64x128xf32>
    %50 = arith.addf %41, %49 : vector<64x128xf32>
    %c0_i32_38 = arith.constant 0 : i32
    %c0_i32_39 = arith.constant 0 : i32
    %51 = tpu.memref_slice %arg7[%43, %c0_i32_38, %c0_i32_39] : memref<4x80x384xbf16, #tpu.memory_space<vmem>> -> memref<1x80x384xbf16, #tpu.memory_space<vmem>>
    %52 = tpu.memref_squeeze %51 : memref<1x80x384xbf16, #tpu.memory_space<vmem>> -> memref<80x384xbf16, #tpu.memory_space<vmem>>
    %c8_40 = arith.constant 8 : index
    %c0_41 = arith.constant 0 : index
    %53 = vector.load %52[%c8_40, %c0_41] : memref<80x384xbf16, #tpu.memory_space<vmem>>, vector<64x384xbf16>
    %c4 = arith.constant 4 : index
    %c0_42 = arith.constant 0 : index
    %c0_43 = arith.constant 0 : index
    %54 = vector.load %arg3[%c4, %c0_42, %c0_43] : memref<9x384x128xbf16, #tpu.memory_space<vmem>>, vector<1x384x128xbf16>
    %55 = vector.shape_cast %54 : vector<1x384x128xbf16> to vector<384x128xbf16>
    %cst_44 = arith.constant dense<0.000000e+00> : vector<64x128xf32>
    %56 = tpu.matmul %53, %55, %cst_44 {dimension_numbers = #tpu.dot_dimension_numbers<[1], [0], [0], [1], [0, 0, 1, 1], [], []>} : vector<64x384xbf16>, vector<384x128xbf16>, vector<64x128xf32> -> vector<64x128xf32>
    %57 = arith.addf %50, %56 : vector<64x128xf32>
    %c0_i32_45 = arith.constant 0 : i32
    %c0_i32_46 = arith.constant 0 : i32
    %58 = tpu.memref_slice %arg7[%43, %c0_i32_45, %c0_i32_46] : memref<4x80x384xbf16, #tpu.memory_space<vmem>> -> memref<1x80x384xbf16, #tpu.memory_space<vmem>>
    %59 = tpu.memref_squeeze %58 : memref<1x80x384xbf16, #tpu.memory_space<vmem>> -> memref<80x384xbf16, #tpu.memory_space<vmem>>
    %c16_47 = arith.constant 16 : index
    %c0_48 = arith.constant 0 : index
    %60 = vector.load %59[%c16_47, %c0_48] : memref<80x384xbf16, #tpu.memory_space<vmem>>, vector<64x384xbf16>
    %c5 = arith.constant 5 : index
    %c0_49 = arith.constant 0 : index
    %c0_50 = arith.constant 0 : index
    %61 = vector.load %arg3[%c5, %c0_49, %c0_50] : memref<9x384x128xbf16, #tpu.memory_space<vmem>>, vector<1x384x128xbf16>
    %62 = vector.shape_cast %61 : vector<1x384x128xbf16> to vector<384x128xbf16>
    %cst_51 = arith.constant dense<0.000000e+00> : vector<64x128xf32>
    %63 = tpu.matmul %60, %62, %cst_51 {dimension_numbers = #tpu.dot_dimension_numbers<[1], [0], [0], [1], [0, 0, 1, 1], [], []>} : vector<64x384xbf16>, vector<384x128xbf16>, vector<64x128xf32> -> vector<64x128xf32>
    %64 = arith.addf %57, %63 : vector<64x128xf32>
    %c2_i32_52 = arith.constant 2 : i32
    %65 = arith.addi %arg1, %c2_i32_52 : i32
    %c3_i32_53 = arith.constant 3 : i32
    %66 = arith.andi %65, %c3_i32_53 : i32
    %c0_i32_54 = arith.constant 0 : i32
    %c0_i32_55 = arith.constant 0 : i32
    %67 = tpu.memref_slice %arg7[%66, %c0_i32_54, %c0_i32_55] : memref<4x80x384xbf16, #tpu.memory_space<vmem>> -> memref<1x80x384xbf16, #tpu.memory_space<vmem>>
    %68 = tpu.memref_squeeze %67 : memref<1x80x384xbf16, #tpu.memory_space<vmem>> -> memref<80x384xbf16, #tpu.memory_space<vmem>>
    %c0_56 = arith.constant 0 : index
    %c0_57 = arith.constant 0 : index
    %69 = vector.load %68[%c0_56, %c0_57] : memref<80x384xbf16, #tpu.memory_space<vmem>>, vector<64x384xbf16>
    %c6 = arith.constant 6 : index
    %c0_58 = arith.constant 0 : index
    %c0_59 = arith.constant 0 : index
    %70 = vector.load %arg3[%c6, %c0_58, %c0_59] : memref<9x384x128xbf16, #tpu.memory_space<vmem>>, vector<1x384x128xbf16>
    %71 = vector.shape_cast %70 : vector<1x384x128xbf16> to vector<384x128xbf16>
    %cst_60 = arith.constant dense<0.000000e+00> : vector<64x128xf32>
    %72 = tpu.matmul %69, %71, %cst_60 {dimension_numbers = #tpu.dot_dimension_numbers<[1], [0], [0], [1], [0, 0, 1, 1], [], []>} : vector<64x384xbf16>, vector<384x128xbf16>, vector<64x128xf32> -> vector<64x128xf32>
    %73 = arith.addf %64, %72 : vector<64x128xf32>
    %c0_i32_61 = arith.constant 0 : i32
    %c0_i32_62 = arith.constant 0 : i32
    %74 = tpu.memref_slice %arg7[%66, %c0_i32_61, %c0_i32_62] : memref<4x80x384xbf16, #tpu.memory_space<vmem>> -> memref<1x80x384xbf16, #tpu.memory_space<vmem>>
    %75 = tpu.memref_squeeze %74 : memref<1x80x384xbf16, #tpu.memory_space<vmem>> -> memref<80x384xbf16, #tpu.memory_space<vmem>>
    %c8_63 = arith.constant 8 : index
    %c0_64 = arith.constant 0 : index
    %76 = vector.load %75[%c8_63, %c0_64] : memref<80x384xbf16, #tpu.memory_space<vmem>>, vector<64x384xbf16>
    %c7 = arith.constant 7 : index
    %c0_65 = arith.constant 0 : index
    %c0_66 = arith.constant 0 : index
    %77 = vector.load %arg3[%c7, %c0_65, %c0_66] : memref<9x384x128xbf16, #tpu.memory_space<vmem>>, vector<1x384x128xbf16>
    %78 = vector.shape_cast %77 : vector<1x384x128xbf16> to vector<384x128xbf16>
    %cst_67 = arith.constant dense<0.000000e+00> : vector<64x128xf32>
    %79 = tpu.matmul %76, %78, %cst_67 {dimension_numbers = #tpu.dot_dimension_numbers<[1], [0], [0], [1], [0, 0, 1, 1], [], []>} : vector<64x384xbf16>, vector<384x128xbf16>, vector<64x128xf32> -> vector<64x128xf32>
    %80 = arith.addf %73, %79 : vector<64x128xf32>
    %c0_i32_68 = arith.constant 0 : i32
    %c0_i32_69 = arith.constant 0 : i32
    %81 = tpu.memref_slice %arg7[%66, %c0_i32_68, %c0_i32_69] : memref<4x80x384xbf16, #tpu.memory_space<vmem>> -> memref<1x80x384xbf16, #tpu.memory_space<vmem>>
    %82 = tpu.memref_squeeze %81 : memref<1x80x384xbf16, #tpu.memory_space<vmem>> -> memref<80x384xbf16, #tpu.memory_space<vmem>>
    %c16_70 = arith.constant 16 : index
    %c0_71 = arith.constant 0 : index
    %83 = vector.load %82[%c16_70, %c0_71] : memref<80x384xbf16, #tpu.memory_space<vmem>>, vector<64x384xbf16>
    %c8_72 = arith.constant 8 : index
    %c0_73 = arith.constant 0 : index
    %c0_74 = arith.constant 0 : index
    %84 = vector.load %arg3[%c8_72, %c0_73, %c0_74] : memref<9x384x128xbf16, #tpu.memory_space<vmem>>, vector<1x384x128xbf16>
    %85 = vector.shape_cast %84 : vector<1x384x128xbf16> to vector<384x128xbf16>
    %cst_75 = arith.constant dense<0.000000e+00> : vector<64x128xf32>
    %86 = tpu.matmul %83, %85, %cst_75 {dimension_numbers = #tpu.dot_dimension_numbers<[1], [0], [0], [1], [0, 0, 1, 1], [], []>} : vector<64x384xbf16>, vector<384x128xbf16>, vector<64x128xf32> -> vector<64x128xf32>
    %87 = arith.addf %80, %86 : vector<64x128xf32>
    %c0_i32_76 = arith.constant 0 : i32
    %88 = arith.cmpi eq, %arg1, %c0_i32_76 : i32
    %89 = arith.extui %88 : i1 to i32
    %c0_i32_77 = arith.constant 0 : i32
    %90 = arith.cmpi ne, %89, %c0_i32_77 : i32
    scf.if %90 {
      %cst_96 = arith.constant 0.000000e+00 : f32
      %112 = vector.broadcast %cst_96 : f32 to vector<8x128xf32>
      %c0_97 = arith.constant 0 : index
      %c0_98 = arith.constant 0 : index
      %c0_99 = arith.constant 0 : index
      %113 = vector.load %arg5[%c0_97, %c0_98, %c0_99] : memref<1x8x128xf32, #tpu.memory_space<vmem>>, vector<1x8x128xf32>
      %114 = vector.shape_cast %113 : vector<1x8x128xf32> to vector<8x128xf32>
      %115 = vector.shape_cast %112 : vector<8x128xf32> to vector<1x8x128xf32>
      tpu.vector_store %arg5[%c0_97, %c0_98, %c0_99], %115 {strides = array<i32>} : memref<1x8x128xf32, #tpu.memory_space<vmem>>, vector<1x8x128xf32>,
      %cst_100 = arith.constant 0.000000e+00 : f32
      %116 = vector.broadcast %cst_100 : f32 to vector<8x128xf32>
      %c0_101 = arith.constant 0 : index
      %c0_102 = arith.constant 0 : index
      %c0_103 = arith.constant 0 : index
      %117 = vector.load %arg6[%c0_101, %c0_102, %c0_103] : memref<1x8x128xf32, #tpu.memory_space<vmem>>, vector<1x8x128xf32>
      %118 = vector.shape_cast %117 : vector<1x8x128xf32> to vector<8x128xf32>
      %119 = vector.shape_cast %116 : vector<8x128xf32> to vector<1x8x128xf32>
      tpu.vector_store %arg6[%c0_101, %c0_102, %c0_103], %119 {strides = array<i32>} : memref<1x8x128xf32, #tpu.memory_space<vmem>>, vector<1x8x128xf32>,
    } else {
    }
    %c0_78 = arith.constant 0 : index
    %c0_79 = arith.constant 0 : index
    %c0_80 = arith.constant 0 : index
    %91 = vector.load %arg5[%c0_78, %c0_79, %c0_80] : memref<1x8x128xf32, #tpu.memory_space<vmem>>, vector<1x1x128xf32>
    %92 = vector.shape_cast %91 : vector<1x1x128xf32> to vector<1x128xf32>
    %cst_81 = arith.constant dense<0.000000e+00> : vector<128xf32>
    %93 = vector.multi_reduction <add>, %87, %cst_81 [0] : vector<64x128xf32> to vector<128xf32>
    %94 = vector.shape_cast %93 : vector<128xf32> to vector<1x128xf32>
    %95 = arith.addf %92, %94 : vector<1x128xf32>
    %c0_82 = arith.constant 0 : index
    %c0_83 = arith.constant 0 : index
    %c0_84 = arith.constant 0 : index
    %96 = vector.load %arg5[%c0_82, %c0_83, %c0_84] : memref<1x8x128xf32, #tpu.memory_space<vmem>>, vector<1x1x128xf32>
    %97 = vector.shape_cast %96 : vector<1x1x128xf32> to vector<1x128xf32>
    %98 = vector.shape_cast %95 : vector<1x128xf32> to vector<1x1x128xf32>
    tpu.vector_store %arg5[%c0_82, %c0_83, %c0_84], %98 {strides = array<i32>} : memref<1x8x128xf32, #tpu.memory_space<vmem>>, vector<1x1x128xf32>,
    %c0_85 = arith.constant 0 : index
    %c0_86 = arith.constant 0 : index
    %c0_87 = arith.constant 0 : index
    %99 = vector.load %arg6[%c0_85, %c0_86, %c0_87] : memref<1x8x128xf32, #tpu.memory_space<vmem>>, vector<1x1x128xf32>
    %100 = vector.shape_cast %99 : vector<1x1x128xf32> to vector<1x128xf32>
    %101 = arith.mulf %87, %87 : vector<64x128xf32>
    %cst_88 = arith.constant dense<0.000000e+00> : vector<128xf32>
    %102 = vector.multi_reduction <add>, %101, %cst_88 [0] : vector<64x128xf32> to vector<128xf32>
    %103 = vector.shape_cast %102 : vector<128xf32> to vector<1x128xf32>
    %104 = arith.addf %100, %103 : vector<1x128xf32>
    %c0_89 = arith.constant 0 : index
    %c0_90 = arith.constant 0 : index
    %c0_91 = arith.constant 0 : index
    %105 = vector.load %arg6[%c0_89, %c0_90, %c0_91] : memref<1x8x128xf32, #tpu.memory_space<vmem>>, vector<1x1x128xf32>
    %106 = vector.shape_cast %105 : vector<1x1x128xf32> to vector<1x128xf32>
    %107 = vector.shape_cast %104 : vector<1x128xf32> to vector<1x1x128xf32>
    tpu.vector_store %arg6[%c0_89, %c0_90, %c0_91], %107 {strides = array<i32>} : memref<1x8x128xf32, #tpu.memory_space<vmem>>, vector<1x1x128xf32>,
    %108 = arith.truncf %87 : vector<64x128xf32> to vector<64x128xbf16>
    %c0_92 = arith.constant 0 : index
    %c0_93 = arith.constant 0 : index
    %c0_94 = arith.constant 0 : index
    %c0_95 = arith.constant 0 : index
    %109 = vector.load %arg4[%c0_92, %c0_93, %c0_94, %c0_95] : memref<1x1x64x128xbf16, #tpu.memory_space<vmem>>, vector<1x1x64x128xbf16>
    %110 = vector.shape_cast %109 : vector<1x1x64x128xbf16> to vector<64x128xbf16>
    %111 = vector.shape_cast %108 : vector<64x128xbf16> to vector<1x1x64x128xbf16>
    tpu.vector_store %arg4[%c0_92, %c0_93, %c0_94, %c0_95], %111 {strides = array<i32>} : memref<1x1x64x128xbf16, #tpu.memory_space<vmem>>, vector<1x1x64x128xbf16>,
    return
  }
  func.func @transform_1(%arg0: i32, %arg1: i32) -> (i32, i32, i32) {
    %c0_i32 = arith.constant 0 : i32
    %c0_i32_0 = arith.constant 0 : i32
    %c0_i32_1 = arith.constant 0 : i32
    %c0_i32_2 = arith.constant 0 : i32
    return %c0_i32, %c0_i32_0, %c0_i32_1 : i32, i32, i32
  }
  func.func @transform_2(%arg0: i32, %arg1: i32) -> (i32, i32, i32, i32) {
    %c0_i32 = arith.constant 0 : i32
    %c0_i32_0 = arith.constant 0 : i32
    %c0_i32_1 = arith.constant 0 : i32
    return %arg0, %arg1, %c0_i32, %c0_i32_0 : i32, i32, i32, i32
  }
  func.func @transform_3(%arg0: i32, %arg1: i32) -> (i32, i32, i32) {
    %c0_i32 = arith.constant 0 : i32
    %c0_i32_0 = arith.constant 0 : i32
    %c0_i32_1 = arith.constant 0 : i32
    return %arg0, %c0_i32, %c0_i32_0 : i32, i32, i32
  }
  func.func @transform_4(%arg0: i32, %arg1: i32) -> (i32, i32, i32) {
    %c0_i32 = arith.constant 0 : i32
    %c0_i32_0 = arith.constant 0 : i32
    %c0_i32_1 = arith.constant 0 : i32
    return %arg0, %c0_i32, %c0_i32_0 : i32, i32, i32
  }
}

module attributes {stable_mosaic.version = 11 : i64} {
  func.func @_bn_act_kernel(%arg0: i32, %arg1: memref<1024x128xbf16, #tpu.memory_space<vmem>>, %arg2: memref<1x128xf32, #tpu.memory_space<vmem>>, %arg3: memref<1x128xf32, #tpu.memory_space<vmem>>, %arg4: memref<1024x128xbf16, #tpu.memory_space<vmem>>) attributes {dimension_semantics = [#tpu.dimension_semantics<parallel>], iteration_bounds = array<i64: 1>, scalar_prefetch = 0 : i64, scratch_operands = 0 : i64, tpu.core_type = #tpu.core_type<tc>, window_params = [{transform_indices = @transform_0, window_bounds = array<i64: 1024, 128>}, {pipeline_mode = #tpu.pipeline_mode<synchronous>, transform_indices = @transform_1, window_bounds = array<i64: 1, 128>}, {pipeline_mode = #tpu.pipeline_mode<synchronous>, transform_indices = @transform_2, window_bounds = array<i64: 1, 128>}, {transform_indices = @transform_3, window_bounds = array<i64: 1024, 128>}]} {
    %c0 = arith.constant 0 : index
    %c0_0 = arith.constant 0 : index
    %0 = vector.load %arg1[%c0, %c0_0] : memref<1024x128xbf16, #tpu.memory_space<vmem>>, vector<1024x128xbf16>
    %1 = arith.extf %0 : vector<1024x128xbf16> to vector<1024x128xf32>
    %c0_1 = arith.constant 0 : index
    %c0_2 = arith.constant 0 : index
    %2 = vector.load %arg2[%c0_1, %c0_2] : memref<1x128xf32, #tpu.memory_space<vmem>>, vector<1x128xf32>
    %3 = vector.broadcast %2 : vector<1x128xf32> to vector<1024x128xf32>
    %4 = arith.mulf %1, %3 : vector<1024x128xf32>
    %c0_3 = arith.constant 0 : index
    %c0_4 = arith.constant 0 : index
    %5 = vector.load %arg3[%c0_3, %c0_4] : memref<1x128xf32, #tpu.memory_space<vmem>>, vector<1x128xf32>
    %6 = vector.broadcast %5 : vector<1x128xf32> to vector<1024x128xf32>
    %7 = arith.addf %4, %6 : vector<1024x128xf32>
    %cst = arith.constant 0.000000e+00 : f32
    %8 = vector.broadcast %cst : f32 to vector<1024x128xf32>
    %9 = arith.maximumf %7, %8 : vector<1024x128xf32>
    %10 = arith.truncf %9 : vector<1024x128xf32> to vector<1024x128xbf16>
    %c0_5 = arith.constant 0 : index
    %c0_6 = arith.constant 0 : index
    %11 = vector.load %arg4[%c0_5, %c0_6] : memref<1024x128xbf16, #tpu.memory_space<vmem>>, vector<1024x128xbf16>
    tpu.vector_store %arg4[%c0_5, %c0_6], %10 {strides = array<i32>} : memref<1024x128xbf16, #tpu.memory_space<vmem>>, vector<1024x128xbf16>,
    return
  }
  func.func @transform_0(%arg0: i32) -> (i32, i32) {
    %c0_i32 = arith.constant 0 : i32
    %c0_i32_0 = arith.constant 0 : i32
    return %arg0, %c0_i32 : i32, i32
  }
  func.func @transform_1(%arg0: i32) -> (i32, i32) {
    %c0_i32 = arith.constant 0 : i32
    %c0_i32_0 = arith.constant 0 : i32
    %c0_i32_1 = arith.constant 0 : i32
    return %c0_i32, %c0_i32_0 : i32, i32
  }
  func.func @transform_2(%arg0: i32) -> (i32, i32) {
    %c0_i32 = arith.constant 0 : i32
    %c0_i32_0 = arith.constant 0 : i32
    %c0_i32_1 = arith.constant 0 : i32
    return %c0_i32, %c0_i32_0 : i32, i32
  }
  func.func @transform_3(%arg0: i32) -> (i32, i32) {
    %c0_i32 = arith.constant 0 : i32
    %c0_i32_0 = arith.constant 0 : i32
    return %arg0, %c0_i32 : i32, i32
  }
}

module attributes {stable_mosaic.version = 11 : i64} {
  func.func @_bn_res_act_kernel(%arg0: i32, %arg1: memref<1024x128xbf16, #tpu.memory_space<vmem>>, %arg2: memref<1x128xf32, #tpu.memory_space<vmem>>, %arg3: memref<1x128xf32, #tpu.memory_space<vmem>>, %arg4: memref<1024x128xbf16, #tpu.memory_space<vmem>>, %arg5: memref<1024x128xf32, #tpu.memory_space<vmem>>) attributes {dimension_semantics = [#tpu.dimension_semantics<parallel>], iteration_bounds = array<i64: 1>, scalar_prefetch = 0 : i64, scratch_operands = 0 : i64, tpu.core_type = #tpu.core_type<tc>, window_params = [{transform_indices = @transform_0, window_bounds = array<i64: 1024, 128>}, {pipeline_mode = #tpu.pipeline_mode<synchronous>, transform_indices = @transform_1, window_bounds = array<i64: 1, 128>}, {pipeline_mode = #tpu.pipeline_mode<synchronous>, transform_indices = @transform_2, window_bounds = array<i64: 1, 128>}, {transform_indices = @transform_3, window_bounds = array<i64: 1024, 128>}, {transform_indices = @transform_4, window_bounds = array<i64: 1024, 128>}]} {
    %c0 = arith.constant 0 : index
    %c0_0 = arith.constant 0 : index
    %0 = vector.load %arg1[%c0, %c0_0] : memref<1024x128xbf16, #tpu.memory_space<vmem>>, vector<1024x128xbf16>
    %1 = arith.extf %0 : vector<1024x128xbf16> to vector<1024x128xf32>
    %c0_1 = arith.constant 0 : index
    %c0_2 = arith.constant 0 : index
    %2 = vector.load %arg2[%c0_1, %c0_2] : memref<1x128xf32, #tpu.memory_space<vmem>>, vector<1x128xf32>
    %3 = vector.broadcast %2 : vector<1x128xf32> to vector<1024x128xf32>
    %4 = arith.mulf %1, %3 : vector<1024x128xf32>
    %c0_3 = arith.constant 0 : index
    %c0_4 = arith.constant 0 : index
    %5 = vector.load %arg3[%c0_3, %c0_4] : memref<1x128xf32, #tpu.memory_space<vmem>>, vector<1x128xf32>
    %6 = vector.broadcast %5 : vector<1x128xf32> to vector<1024x128xf32>
    %7 = arith.addf %4, %6 : vector<1024x128xf32>
    %c0_5 = arith.constant 0 : index
    %c0_6 = arith.constant 0 : index
    %8 = vector.load %arg4[%c0_5, %c0_6] : memref<1024x128xbf16, #tpu.memory_space<vmem>>, vector<1024x128xbf16>
    %9 = arith.extf %8 : vector<1024x128xbf16> to vector<1024x128xf32>
    %10 = arith.addf %7, %9 : vector<1024x128xf32>
    %cst = arith.constant 0.000000e+00 : f32
    %11 = vector.broadcast %cst : f32 to vector<1024x128xf32>
    %12 = arith.maximumf %10, %11 : vector<1024x128xf32>
    %c0_7 = arith.constant 0 : index
    %c0_8 = arith.constant 0 : index
    %13 = vector.load %arg5[%c0_7, %c0_8] : memref<1024x128xf32, #tpu.memory_space<vmem>>, vector<1024x128xf32>
    tpu.vector_store %arg5[%c0_7, %c0_8], %12 {strides = array<i32>} : memref<1024x128xf32, #tpu.memory_space<vmem>>, vector<1024x128xf32>,
    return
  }
  func.func @transform_0(%arg0: i32) -> (i32, i32) {
    %c0_i32 = arith.constant 0 : i32
    %c0_i32_0 = arith.constant 0 : i32
    return %arg0, %c0_i32 : i32, i32
  }
  func.func @transform_1(%arg0: i32) -> (i32, i32) {
    %c0_i32 = arith.constant 0 : i32
    %c0_i32_0 = arith.constant 0 : i32
    %c0_i32_1 = arith.constant 0 : i32
    return %c0_i32, %c0_i32_0 : i32, i32
  }
  func.func @transform_2(%arg0: i32) -> (i32, i32) {
    %c0_i32 = arith.constant 0 : i32
    %c0_i32_0 = arith.constant 0 : i32
    %c0_i32_1 = arith.constant 0 : i32
    return %c0_i32, %c0_i32_0 : i32, i32
  }
  func.func @transform_3(%arg0: i32) -> (i32, i32) {
    %c0_i32 = arith.constant 0 : i32
    %c0_i32_0 = arith.constant 0 : i32
    return %arg0, %c0_i32 : i32, i32
  }
  func.func @transform_4(%arg0: i32) -> (i32, i32) {
    %c0_i32 = arith.constant 0 : i32
    %c0_i32_0 = arith.constant 0 : i32
    return %arg0, %c0_i32 : i32, i32
  }
}

</mosaic_0001>

<bundles_post_ra>
// kernel: resblock_forward.5
= control target key start
LH: loop header
LB: loop body
LE: loop exit
PB: predicated region body
PF: predicated region fallthrough
CT: control target
= control target key end

     0   :  { %s2954_s0 = inlined_call_operand.vmem [shape: bf16[1024,128], index: 0, kind: input, shape index: {}]   ;;  %s2955_s1 = inlined_call_operand.vmem [shape: f32[1,128], index: 1, kind: input, shape index: {}]   ;;  %s2956_s2 = inlined_call_operand.vmem [shape: f32[1,128], index: 2, kind: input, shape index: {}]   ;;  %s2957_s3 = inlined_call_operand.vmem [shape: bf16[1024,128], index: 3, kind: output, shape index: {}]  }
   0x1   :  { %v1571_v0 = vld [vmem:[%s2954_s0] sm:$0xff]   ;;  %v2146_v4 = vld [vmem:[%s2954_s0 + $0x8] sm:$0xff]   ;;  %v2147_v5 = vld [vmem:[%s2954_s0 + $0x10] sm:$0xff]  }
   0x2   :  { %v2300_v1 = vld [vmem:[%s2955_s1] ss:$0 sm:$0xff]  ;;  %v1572_v2 = vunpack.c.l.bf16 %v1571_v0  ;;  %v1573_v3 = vunpack.c.h.bf16 %v1571_v0  ;;  %v2148_v6 = vld [vmem:[%s2954_s0 + $0x18] sm:$0xff]   ;;  %v1576_v8 = vunpack.c.l.bf16 %v2146_v4  ;;  %v1577_v9 = vunpack.c.h.bf16 %v2146_v4  ;;  %v2150_v33 = vld [vmem:[%s2954_s0 + $0x28] sm:$0xff]  }
   0x3   :  { %v2314_v7 = vld [vmem:[%s2956_s2] ss:$0 sm:$0xff]  ;;  %v1580_v10 = vunpack.c.l.bf16 %v2147_v5  ;;  %v1581_v11 = vunpack.c.h.bf16 %v2147_v5  ;;  %v1584_v14 = vunpack.c.l.bf16 %v2148_v6  ;;  %v1585_v15 = vunpack.c.h.bf16 %v2148_v6  ;;  %v2151_v38 = vld [vmem:[%s2954_s0 + $0x30] sm:$0xff]   ;;  %v2152_v43 = vld [vmem:[%s2954_s0 + $0x38] sm:$0xff]  }
   0x4   :  { %v277_v12 = vmul.f32 %v1572_v2, %v2300_v1  ;;  %v278_v13 = vmul.f32 %v1573_v3, %v2300_v1  ;;  %v279_v16 = vmul.f32 %v1576_v8, %v2300_v1  ;;  %v280_v17 = vmul.f32 %v1577_v9, %v2300_v1  ;;  %v2149_v28 = vld [vmem:[%s2954_s0 + $0x20] sm:$0xff]  }
   0x5   :  { %v281_v18 = vmul.f32 %v1580_v10, %v2300_v1  ;;  %v282_v19 = vmul.f32 %v1581_v11, %v2300_v1  ;;  %v283_v22 = vmul.f32 %v1584_v14, %v2300_v1  ;;  %v284_v23 = vmul.f32 %v1585_v15, %v2300_v1  ;;  %v2153_v0 = vld [vmem:[%s2954_s0 + $0x40] sm:$0xff]   ;;  %v2154_v11 = vld [vmem:[%s2954_s0 + $0x48] sm:$0xff]  }
   0x6   :  { %v412_v20 = vadd.f32 %v2314_v7, %v277_v12  ;;  %v413_v21 = vadd.f32 %v2314_v7, %v278_v13  ;;  %v414_v24 = vadd.f32 %v2314_v7, %v279_v16  ;;  %v415_v25 = vadd.f32 %v2314_v7, %v280_v17  ;;  %v2155_v16 = vld [vmem:[%s2954_s0 + $0x50] sm:$0xff]  }
   0x7   :  { %v416_v26 = vadd.f32 %v2314_v7, %v281_v18  ;;  %v417_v27 = vadd.f32 %v2314_v7, %v282_v19  ;;  %v418_v31 = vadd.f32 %v2314_v7, %v283_v22  ;;  %v419_v32 = vadd.f32 %v2314_v7, %v284_v23 }
   0x8   :  { %v540_v29 = vmax.f32 %v412_v20, 0.0  ;;  %v541_v30 = vmax.f32 %v413_v21, 0.0  ;;  %v542_v34 = vmax.f32 %v414_v24, 0.0  ;;  %v543_v35 = vmax.f32 %v415_v25, 0.0  ;;  %v2156_v25 = vld [vmem:[%s2954_s0 + $0x58] sm:$0xff]  }
   0x9   :  { %v544_v36 = vmax.f32 %v416_v26, 0.0  ;;  %v545_v37 = vmax.f32 %v417_v27, 0.0  ;;  %v546_v40 = vmax.f32 %v418_v31, 0.0  ;;  %v547_v41 = vmax.f32 %v419_v32, 0.0 }
   0xa   :  { %v1829_v39 = vpack.c.bf16 %v541_v30, %v540_v29  ;;  %v1588_v42 = vunpack.c.l.bf16 %v2149_v28  ;;  %v1834_v44 = vpack.c.bf16 %v543_v35, %v542_v34  ;;  %v1589_v46 = vunpack.c.h.bf16 %v2149_v28 }
   0xb   :  { %v1839_v45 = vpack.c.bf16 %v545_v37, %v544_v36  ;;  %v1592_v47 = vunpack.c.l.bf16 %v2150_v33  ;;  %v1844_v48 = vpack.c.bf16 %v547_v41, %v546_v40  ;;  %v1593_v50 = vunpack.c.h.bf16 %v2150_v33 }
   0xc   :  { %1830 = vst [vmem:[%s2957_s3] sm:$0xff] %v1829_v39   ;;  %v285_v49 = vmul.f32 %v1588_v42, %v2300_v1  ;;  %v1596_v51 = vunpack.c.l.bf16 %v2151_v38  ;;  %2209 = vst [vmem:[%s2957_s3 + $0x8] sm:$0xff] %v1834_v44   ;;  %v286_v52 = vmul.f32 %v1589_v46, %v2300_v1  ;;  %v1597_v54 = vunpack.c.h.bf16 %v2151_v38  ;;  %v2157_v38 = vld [vmem:[%s2954_s0 + $0x60] sm:$0xff]  }
   0xd   :  { %2210 = vst [vmem:[%s2957_s3 + $0x10] sm:$0xff] %v1839_v45   ;;  %v287_v53 = vmul.f32 %v1592_v47, %v2300_v1  ;;  %v1600_v55 = vunpack.c.l.bf16 %v2152_v43  ;;  %2211 = vst [vmem:[%s2957_s3 + $0x18] sm:$0xff] %v1844_v48   ;;  %v288_v57 = vmul.f32 %v1593_v50, %v2300_v1  ;;  %v1601_v59 = vunpack.c.h.bf16 %v2152_v43 }
   0xe   :  { %v420_v56 = vadd.f32 %v2314_v7, %v285_v49  ;;  %v289_v58 = vmul.f32 %v1596_v51, %v2300_v1  ;;  %v421_v60 = vadd.f32 %v2314_v7, %v286_v52  ;;  %v290_v62 = vmul.f32 %v1597_v54, %v2300_v1  ;;  %v2158_v51 = vld [vmem:[%s2954_s0 + $0x68] sm:$0xff]  }
   0xf   :  { %v422_v61 = vadd.f32 %v2314_v7, %v287_v53  ;;  %v291_v63 = vmul.f32 %v1600_v55, %v2300_v1  ;;  %v423_v3 = vadd.f32 %v2314_v7, %v288_v57  ;;  %v292_v5 = vmul.f32 %v1601_v59, %v2300_v1 }
  0x10   :  { %v548_v2 = vmax.f32 %v420_v56, 0.0  ;;  %v424_v4 = vadd.f32 %v2314_v7, %v289_v58  ;;  %v549_v6 = vmax.f32 %v421_v60, 0.0  ;;  %v425_v9 = vadd.f32 %v2314_v7, %v290_v62  ;;  %v2159_v60 = vld [vmem:[%s2954_s0 + $0x70] sm:$0xff]  }
  0x11   :  { %v550_v8 = vmax.f32 %v422_v61, 0.0  ;;  %v426_v10 = vadd.f32 %v2314_v7, %v291_v63  ;;  %v551_v12 = vmax.f32 %v423_v3, 0.0  ;;  %v427_v14 = vadd.f32 %v2314_v7, %v292_v5 }
  0x12   :  { %v552_v13 = vmax.f32 %v424_v4, 0.0  ;;  %v1604_v15 = vunpack.c.l.bf16 %v2153_v0  ;;  %v1849_v17 = vpack.c.bf16 %v549_v6, %v548_v2  ;;  %v553_v18 = vmax.f32 %v425_v9, 0.0  ;;  %v2160_v2 = vld [vmem:[%s2954_s0 + $0x78] sm:$0xff]  }
  0x13   :  { %v554_v19 = vmax.f32 %v426_v10, 0.0  ;;  %v1605_v20 = vunpack.c.h.bf16 %v2153_v0  ;;  %v1854_v21 = vpack.c.bf16 %v551_v12, %v550_v8  ;;  %v555_v22 = vmax.f32 %v427_v14, 0.0  ;;  %v2161_v12 = vld [vmem:[%s2954_s0 + $0x80] sm:$0xff]  }
  0x14   :  { %v293_v23 = vmul.f32 %v1604_v15, %v2300_v1  ;;  %v1608_v24 = vunpack.c.l.bf16 %v2154_v11  ;;  %2212 = vst [vmem:[%s2957_s3 + $0x20] sm:$0xff] %v1849_v17   ;;  %v1859_v26 = vpack.c.bf16 %v553_v18, %v552_v13  ;;  %v1609_v28 = vunpack.c.h.bf16 %v2154_v11 }
  0x15   :  { %v294_v27 = vmul.f32 %v1605_v20, %v2300_v1  ;;  %v1612_v29 = vunpack.c.l.bf16 %v2155_v16  ;;  %2213 = vst [vmem:[%s2957_s3 + $0x28] sm:$0xff] %v1854_v21   ;;  %v1864_v30 = vpack.c.bf16 %v555_v22, %v554_v19  ;;  %v1613_v33 = vunpack.c.h.bf16 %v2155_v16 }
  0x16   :  { %v428_v31 = vadd.f32 %v2314_v7, %v293_v23  ;;  %v295_v32 = vmul.f32 %v1608_v24, %v2300_v1  ;;  %2214 = vst [vmem:[%s2957_s3 + $0x30] sm:$0xff] %v1859_v26   ;;  %v296_v35 = vmul.f32 %v1609_v28, %v2300_v1  ;;  %v1616_v37 = vunpack.c.l.bf16 %v2156_v25 }
  0x17   :  { %v429_v34 = vadd.f32 %v2314_v7, %v294_v27  ;;  %v297_v36 = vmul.f32 %v1612_v29, %v2300_v1  ;;  %2215 = vst [vmem:[%s2957_s3 + $0x38] sm:$0xff] %v1864_v30   ;;  %v298_v41 = vmul.f32 %v1613_v33, %v2300_v1  ;;  %v1617_v42 = vunpack.c.h.bf16 %v2156_v25  ;;  %v2162_v29 = vld [vmem:[%s2954_s0 + $0x88] sm:$0xff]  }
  0x18   :  { %v556_v39 = vmax.f32 %v428_v31, 0.0  ;;  %v430_v40 = vadd.f32 %v2314_v7, %v295_v32  ;;  %v431_v44 = vadd.f32 %v2314_v7, %v296_v35  ;;  %v299_v46 = vmul.f32 %v1616_v37, %v2300_v1 }
  0x19   :  { %v557_v43 = vmax.f32 %v429_v34, 0.0  ;;  %v432_v45 = vadd.f32 %v2314_v7, %v297_v36  ;;  %v433_v48 = vadd.f32 %v2314_v7, %v298_v41  ;;  %v300_v49 = vmul.f32 %v1617_v42, %v2300_v1  ;;  %v2163_v34 = vld [vmem:[%s2954_s0 + $0x90] sm:$0xff]  }
  0x1a   :  { %v558_v47 = vmax.f32 %v430_v40, 0.0  ;;  %v1620_v50 = vunpack.c.l.bf16 %v2157_v38  ;;  %v559_v53 = vmax.f32 %v431_v44, 0.0  ;;  %v434_v55 = vadd.f32 %v2314_v7, %v299_v46 }
  0x1b   :  { %v1869_v52 = vpack.c.bf16 %v557_v43, %v556_v39  ;;  %v560_v54 = vmax.f32 %v432_v45, 0.0  ;;  %v561_v56 = vmax.f32 %v433_v48, 0.0  ;;  %v435_v57 = vadd.f32 %v2314_v7, %v300_v49  ;;  %v2164_v43 = vld [vmem:[%s2954_s0 + $0x98] sm:$0xff]  }
  0x1c   :  { %v1621_v58 = vunpack.c.h.bf16 %v2157_v38  ;;  %v301_v59 = vmul.f32 %v1620_v50, %v2300_v1  ;;  %v1874_v61 = vpack.c.bf16 %v559_v53, %v558_v47  ;;  %v562_v62 = vmax.f32 %v434_v55, 0.0 }
  0x1d   :  { %2216 = vst [vmem:[%s2957_s3 + $0x40] sm:$0xff] %v1869_v52   ;;  %v1624_v63 = vunpack.c.l.bf16 %v2158_v51  ;;  %v1625_v0 = vunpack.c.h.bf16 %v2158_v51  ;;  %v1879_v3 = vpack.c.bf16 %v561_v56, %v560_v54  ;;  %v563_v4 = vmax.f32 %v435_v57, 0.0  ;;  %v2165_v56 = vld [vmem:[%s2954_s0 + $0xa0] sm:$0xff]  }
  0x1e   :  { %v302_v5 = vmul.f32 %v1621_v58, %v2300_v1  ;;  %v436_v6 = vadd.f32 %v2314_v7, %v301_v59  ;;  %2217 = vst [vmem:[%s2957_s3 + $0x48] sm:$0xff] %v1874_v61   ;;  %v1628_v10 = vunpack.c.l.bf16 %v2159_v60  ;;  %v1629_v11 = vunpack.c.h.bf16 %v2159_v60 }
  0x1f   :  { %v303_v8 = vmul.f32 %v1624_v63, %v2300_v1  ;;  %v304_v9 = vmul.f32 %v1625_v0, %v2300_v1  ;;  %2218 = vst [vmem:[%s2957_s3 + $0x50] sm:$0xff] %v1879_v3   ;;  %v1884_v13 = vpack.c.bf16 %v563_v4, %v562_v62  ;;  %v1632_v16 = vunpack.c.l.bf16 %v2160_v2 }
  0x20   :  { %v437_v14 = vadd.f32 %v2314_v7, %v302_v5  ;;  %v564_v15 = vmax.f32 %v436_v6, 0.0  ;;  %v305_v19 = vmul.f32 %v1628_v10, %v2300_v1  ;;  %v306_v20 = vmul.f32 %v1629_v11, %v2300_v1 }
  0x21   :  { %v438_v17 = vadd.f32 %v2314_v7, %v303_v8  ;;  %v439_v18 = vadd.f32 %v2314_v7, %v304_v9  ;;  %2219 = vst [vmem:[%s2957_s3 + $0x58] sm:$0xff] %v1884_v13   ;;  %v1633_v22 = vunpack.c.h.bf16 %v2160_v2  ;;  %v307_v23 = vmul.f32 %v1632_v16, %v2300_v1  ;;  %v2166_v2 = vld [vmem:[%s2954_s0 + $0xa8] sm:$0xff]   ;;  %v2167_v16 = vld [vmem:[%s2954_s0 + $0xb0] sm:$0xff]  }
  0x22   :  { %v565_v21 = vmax.f32 %v437_v14, 0.0  ;;  %v1636_v24 = vunpack.c.l.bf16 %v2161_v12  ;;  %v440_v27 = vadd.f32 %v2314_v7, %v305_v19  ;;  %v441_v28 = vadd.f32 %v2314_v7, %v306_v20 }
  0x23   :  { %v566_v25 = vmax.f32 %v438_v17, 0.0  ;;  %v567_v26 = vmax.f32 %v439_v18, 0.0  ;;  %v308_v31 = vmul.f32 %v1633_v22, %v2300_v1  ;;  %v442_v32 = vadd.f32 %v2314_v7, %v307_v23 }
  0x24   :  { %v1889_v30 = vpack.c.bf16 %v565_v21, %v564_v15  ;;  %v1637_v33 = vunpack.c.h.bf16 %v2161_v12  ;;  %v568_v36 = vmax.f32 %v440_v27, 0.0  ;;  %v569_v37 = vmax.f32 %v441_v28, 0.0  ;;  %v2168_v21 = vld [vmem:[%s2954_s0 + $0xb8] sm:$0xff]  }
  0x25   :  { %v1894_v35 = vpack.c.bf16 %v567_v26, %v566_v25  ;;  %v309_v38 = vmul.f32 %v1636_v24, %v2300_v1  ;;  %v443_v39 = vadd.f32 %v2314_v7, %v308_v31  ;;  %v570_v40 = vmax.f32 %v442_v32, 0.0 }
  0x26   :  { %2220 = vst [vmem:[%s2957_s3 + $0x60] sm:$0xff] %v1889_v30   ;;  %v310_v41 = vmul.f32 %v1637_v33, %v2300_v1  ;;  %v1640_v42 = vunpack.c.l.bf16 %v2162_v29  ;;  %v1899_v44 = vpack.c.bf16 %v569_v37, %v568_v36  ;;  %v1641_v46 = vunpack.c.h.bf16 %v2162_v29 }
  0x27   :  { %2221 = vst [vmem:[%s2957_s3 + $0x68] sm:$0xff] %v1894_v35   ;;  %v444_v45 = vadd.f32 %v2314_v7, %v309_v38  ;;  %v1644_v47 = vunpack.c.l.bf16 %v2163_v34  ;;  %v571_v48 = vmax.f32 %v443_v39, 0.0  ;;  %v1645_v51 = vunpack.c.h.bf16 %v2163_v34  ;;  %v2169_v34 = vld [vmem:[%s2954_s0 + $0xc0] sm:$0xff]  }
  0x28   :  { %v445_v49 = vadd.f32 %v2314_v7, %v310_v41  ;;  %v311_v50 = vmul.f32 %v1640_v42, %v2300_v1  ;;  %2222 = vst [vmem:[%s2957_s3 + $0x70] sm:$0xff] %v1899_v44   ;;  %v312_v53 = vmul.f32 %v1641_v46, %v2300_v1  ;;  %v1648_v55 = vunpack.c.l.bf16 %v2164_v43 }
  0x29   :  { %v572_v52 = vmax.f32 %v444_v45, 0.0  ;;  %v313_v54 = vmul.f32 %v1644_v47, %v2300_v1  ;;  %v1904_v57 = vpack.c.bf16 %v571_v48, %v570_v40  ;;  %v314_v60 = vmul.f32 %v1645_v51, %v2300_v1  ;;  %v2170_v47 = vld [vmem:[%s2954_s0 + $0xc8] sm:$0xff]  }
  0x2a   :  { %v573_v58 = vmax.f32 %v445_v49, 0.0  ;;  %v446_v59 = vadd.f32 %v2314_v7, %v311_v50  ;;  %v447_v61 = vadd.f32 %v2314_v7, %v312_v53  ;;  %v1649_v63 = vunpack.c.h.bf16 %v2164_v43 }
  0x2b   :  { %v448_v62 = vadd.f32 %v2314_v7, %v313_v54  ;;  %v315_v0 = vmul.f32 %v1648_v55, %v2300_v1  ;;  %2223 = vst [vmem:[%s2957_s3 + $0x78] sm:$0xff] %v1904_v57   ;;  %v449_v5 = vadd.f32 %v2314_v7, %v314_v60  ;;  %v1652_v6 = vunpack.c.l.bf16 %v2165_v56 }
  0x2c   :  { %v1909_v3 = vpack.c.bf16 %v573_v58, %v572_v52  ;;  %v574_v4 = vmax.f32 %v446_v59, 0.0  ;;  %v575_v8 = vmax.f32 %v447_v61, 0.0  ;;  %v316_v10 = vmul.f32 %v1649_v63, %v2300_v1  ;;  %v2171_v52 = vld [vmem:[%s2954_s0 + $0xd0] sm:$0xff]   ;;  %v2172_v61 = vld [vmem:[%s2954_s0 + $0xd8] sm:$0xff]  }
  0x2d   :  { %v576_v9 = vmax.f32 %v448_v62, 0.0  ;;  %v450_v11 = vadd.f32 %v2314_v7, %v315_v0  ;;  %v577_v12 = vmax.f32 %v449_v5, 0.0  ;;  %v1653_v13 = vunpack.c.h.bf16 %v2165_v56 }
  0x2e   :  { %2224 = vst [vmem:[%s2957_s3 + $0x80] sm:$0xff] %v1909_v3   ;;  %v317_v14 = vmul.f32 %v1652_v6, %v2300_v1  ;;  %v1656_v15 = vunpack.c.l.bf16 %v2166_v2  ;;  %v1914_v17 = vpack.c.bf16 %v575_v8, %v574_v4  ;;  %v451_v18 = vadd.f32 %v2314_v7, %v316_v10 }
  0x2f   :  { %v578_v19 = vmax.f32 %v450_v11, 0.0  ;;  %v1657_v20 = vunpack.c.h.bf16 %v2166_v2  ;;  %v1919_v22 = vpack.c.bf16 %v577_v12, %v576_v9  ;;  %v318_v23 = vmul.f32 %v1653_v13, %v2300_v1  ;;  %v2173_v12 = vld [vmem:[%s2954_s0 + $0xe0] sm:$0xff]  }
  0x30   :  { %v452_v24 = vadd.f32 %v2314_v7, %v317_v14  ;;  %v319_v25 = vmul.f32 %v1656_v15, %v2300_v1  ;;  %2225 = vst [vmem:[%s2957_s3 + $0x88] sm:$0xff] %v1914_v17   ;;  %v579_v26 = vmax.f32 %v451_v18, 0.0  ;;  %v1660_v28 = vunpack.c.l.bf16 %v2167_v16 }
  0x31   :  { %v320_v27 = vmul.f32 %v1657_v20, %v2300_v1  ;;  %v1661_v29 = vunpack.c.h.bf16 %v2167_v16  ;;  %2226 = vst [vmem:[%s2957_s3 + $0x90] sm:$0xff] %v1919_v22   ;;  %v453_v30 = vadd.f32 %v2314_v7, %v318_v23  ;;  %v1664_v33 = vunpack.c.l.bf16 %v2168_v21 }
  0x32   :  { %v580_v31 = vmax.f32 %v452_v24, 0.0  ;;  %v454_v32 = vadd.f32 %v2314_v7, %v319_v25  ;;  %v1924_v35 = vpack.c.bf16 %v579_v26, %v578_v19  ;;  %v321_v37 = vmul.f32 %v1660_v28, %v2300_v1 }
  0x33   :  { %v455_v36 = vadd.f32 %v2314_v7, %v320_v27  ;;  %v322_v38 = vmul.f32 %v1661_v29, %v2300_v1  ;;  %v581_v39 = vmax.f32 %v453_v30, 0.0  ;;  %v1665_v41 = vunpack.c.h.bf16 %v2168_v21  ;;  %v2174_v21 = vld [vmem:[%s2954_s0 + $0xe8] sm:$0xff]  }
  0x34   :  { %v582_v40 = vmax.f32 %v454_v32, 0.0  ;;  %v323_v42 = vmul.f32 %v1664_v33, %v2300_v1  ;;  %2227 = vst [vmem:[%s2957_s3 + $0x98] sm:$0xff] %v1924_v35   ;;  %v456_v44 = vadd.f32 %v2314_v7, %v321_v37  ;;  %v1668_v46 = vunpack.c.l.bf16 %v2169_v34 }
  0x35   :  { %v583_v43 = vmax.f32 %v455_v36, 0.0  ;;  %v457_v45 = vadd.f32 %v2314_v7, %v322_v38  ;;  %v1929_v48 = vpack.c.bf16 %v581_v39, %v580_v31  ;;  %v324_v49 = vmul.f32 %v1665_v41, %v2300_v1  ;;  %v2176_v39 = vld [vmem:[%s2954_s0 + $0xf8] sm:$0xff]  }
  0x36   :  { %v458_v50 = vadd.f32 %v2314_v7, %v323_v42  ;;  %v1669_v51 = vunpack.c.h.bf16 %v2169_v34  ;;  %v584_v54 = vmax.f32 %v456_v44, 0.0  ;;  %v325_v56 = vmul.f32 %v1668_v46, %v2300_v1  ;;  %v2175_v34 = vld [vmem:[%s2954_s0 + $0xf0] sm:$0xff]  }
  0x37   :  { %v1934_v53 = vpack.c.bf16 %v583_v43, %v582_v40  ;;  %v585_v55 = vmax.f32 %v457_v45, 0.0  ;;  %2228 = vst [vmem:[%s2957_s3 + $0xa0] sm:$0xff] %v1929_v48   ;;  %v459_v57 = vadd.f32 %v2314_v7, %v324_v49  ;;  %v1672_v60 = vunpack.c.l.bf16 %v2170_v47 }
  0x38   :  { %v586_v58 = vmax.f32 %v458_v50, 0.0  ;;  %v326_v59 = vmul.f32 %v1669_v51, %v2300_v1  ;;  %v460_v63 = vadd.f32 %v2314_v7, %v325_v56  ;;  %v1673_v0 = vunpack.c.h.bf16 %v2170_v47 }
  0x39   :  { %2229 = vst [vmem:[%s2957_s3 + $0xa8] sm:$0xff] %v1934_v53   ;;  %v1939_v62 = vpack.c.bf16 %v585_v55, %v584_v54  ;;  %v1676_v2 = vunpack.c.l.bf16 %v2171_v52  ;;  %v587_v3 = vmax.f32 %v459_v57, 0.0  ;;  %v327_v5 = vmul.f32 %v1672_v60, %v2300_v1 }
  0x3a   :  { %v461_v4 = vadd.f32 %v2314_v7, %v326_v59  ;;  %v1677_v6 = vunpack.c.h.bf16 %v2171_v52  ;;  %v588_v8 = vmax.f32 %v460_v63, 0.0  ;;  %v328_v9 = vmul.f32 %v1673_v0, %v2300_v1  ;;  %v2177_v52 = vld [vmem:[%s2954_s0 + $0x100] sm:$0xff]  }
  0x3b   :  { %2230 = vst [vmem:[%s2957_s3 + $0xb0] sm:$0xff] %v1939_v62   ;;  %v329_v10 = vmul.f32 %v1676_v2, %v2300_v1  ;;  %v1680_v11 = vunpack.c.l.bf16 %v2172_v61  ;;  %v1944_v13 = vpack.c.bf16 %v587_v3, %v586_v58  ;;  %v462_v15 = vadd.f32 %v2314_v7, %v327_v5  ;;  %v2178_v2 = vld [vmem:[%s2954_s0 + $0x108] sm:$0xff]  }
  0x3c   :  { %v589_v14 = vmax.f32 %v461_v4, 0.0  ;;  %v330_v16 = vmul.f32 %v1677_v6, %v2300_v1  ;;  %v463_v17 = vadd.f32 %v2314_v7, %v328_v9  ;;  %v1681_v19 = vunpack.c.h.bf16 %v2172_v61 }
  0x3d   :  { %v464_v18 = vadd.f32 %v2314_v7, %v329_v10  ;;  %v331_v20 = vmul.f32 %v1680_v11, %v2300_v1  ;;  %2231 = vst [vmem:[%s2957_s3 + $0xb8] sm:$0xff] %v1944_v13   ;;  %v590_v23 = vmax.f32 %v462_v15, 0.0  ;;  %v1684_v25 = vunpack.c.l.bf16 %v2173_v12 }
  0x3e   :  { %v1949_v22 = vpack.c.bf16 %v589_v14, %v588_v8  ;;  %v465_v24 = vadd.f32 %v2314_v7, %v330_v16  ;;  %v591_v26 = vmax.f32 %v463_v17, 0.0  ;;  %v332_v28 = vmul.f32 %v1681_v19, %v2300_v1  ;;  %v2179_v8 = vld [vmem:[%s2954_s0 + $0x110] sm:$0xff]   ;;  %v2180_v17 = vld [vmem:[%s2954_s0 + $0x118] sm:$0xff]  }
  0x3f   :  { %v592_v27 = vmax.f32 %v464_v18, 0.0  ;;  %v466_v29 = vadd.f32 %v2314_v7, %v331_v20  ;;  %v1685_v31 = vunpack.c.h.bf16 %v2173_v12  ;;  %v333_v32 = vmul.f32 %v1684_v25, %v2300_v1 }
  0x40   :  { %2232 = vst [vmem:[%s2957_s3 + $0xc0] sm:$0xff] %v1949_v22   ;;  %v593_v30 = vmax.f32 %v465_v24, 0.0  ;;  %v1688_v33 = vunpack.c.l.bf16 %v2174_v21  ;;  %v1954_v35 = vpack.c.bf16 %v591_v26, %v590_v23  ;;  %v467_v36 = vadd.f32 %v2314_v7, %v332_v28 }
  0x41   :  { %v594_v37 = vmax.f32 %v466_v29, 0.0  ;;  %v1689_v38 = vunpack.c.h.bf16 %v2174_v21  ;;  %v334_v41 = vmul.f32 %v1685_v31, %v2300_v1  ;;  %v468_v42 = vadd.f32 %v2314_v7, %v333_v32 }
  0x42   :  { %v1959_v40 = vpack.c.bf16 %v593_v30, %v592_v27  ;;  %v335_v43 = vmul.f32 %v1688_v33, %v2300_v1  ;;  %2233 = vst [vmem:[%s2957_s3 + $0xc8] sm:$0xff] %v1954_v35   ;;  %v595_v44 = vmax.f32 %v467_v36, 0.0  ;;  %v1692_v46 = vunpack.c.l.bf16 %v2175_v34  ;;  %v2181_v30 = vld [vmem:[%s2954_s0 + $0x120] sm:$0xff]  }
  0x43   :  { %v336_v45 = vmul.f32 %v1689_v38, %v2300_v1  ;;  %v1693_v47 = vunpack.c.h.bf16 %v2175_v34  ;;  %v469_v48 = vadd.f32 %v2314_v7, %v334_v41  ;;  %v596_v49 = vmax.f32 %v468_v42, 0.0 }
  0x44   :  { %2234 = vst [vmem:[%s2957_s3 + $0xd0] sm:$0xff] %v1959_v40   ;;  %v470_v50 = vadd.f32 %v2314_v7, %v335_v43  ;;  %v1696_v51 = vunpack.c.l.bf16 %v2176_v39  ;;  %v1964_v53 = vpack.c.bf16 %v595_v44, %v594_v37  ;;  %v337_v55 = vmul.f32 %v1692_v46, %v2300_v1 }
  0x45   :  { %v471_v54 = vadd.f32 %v2314_v7, %v336_v45  ;;  %v338_v56 = vmul.f32 %v1693_v47, %v2300_v1  ;;  %v597_v57 = vmax.f32 %v469_v48, 0.0  ;;  %v1697_v59 = vunpack.c.h.bf16 %v2176_v39  ;;  %v2182_v39 = vld [vmem:[%s2954_s0 + $0x128] sm:$0xff]  }
  0x46   :  { %v598_v58 = vmax.f32 %v470_v50, 0.0  ;;  %v339_v60 = vmul.f32 %v1696_v51, %v2300_v1  ;;  %2235 = vst [vmem:[%s2957_s3 + $0xd8] sm:$0xff] %v1964_v53   ;;  %v472_v62 = vadd.f32 %v2314_v7, %v337_v55  ;;  %v1700_v0 = vunpack.c.l.bf16 %v2177_v52 }
  0x47   :  { %v599_v61 = vmax.f32 %v471_v54, 0.0  ;;  %v473_v63 = vadd.f32 %v2314_v7, %v338_v56  ;;  %v1969_v3 = vpack.c.bf16 %v597_v57, %v596_v49  ;;  %v340_v4 = vmul.f32 %v1697_v59, %v2300_v1  ;;  %v2184_v57 = vld [vmem:[%s2954_s0 + $0x138] sm:$0xff]  }
  0x48   :  { %v474_v5 = vadd.f32 %v2314_v7, %v339_v60  ;;  %v1701_v6 = vunpack.c.h.bf16 %v2177_v52  ;;  %v600_v10 = vmax.f32 %v472_v62, 0.0  ;;  %v341_v12 = vmul.f32 %v1700_v0, %v2300_v1  ;;  %v2183_v52 = vld [vmem:[%s2954_s0 + $0x130] sm:$0xff]  }
  0x49   :  { %v1974_v9 = vpack.c.bf16 %v599_v61, %v598_v58  ;;  %v601_v11 = vmax.f32 %v473_v63, 0.0  ;;  %2236 = vst [vmem:[%s2957_s3 + $0xe0] sm:$0xff] %v1969_v3   ;;  %v475_v13 = vadd.f32 %v2314_v7, %v340_v4  ;;  %v1704_v16 = vunpack.c.l.bf16 %v2178_v2 }
  0x4a   :  { %v602_v14 = vmax.f32 %v474_v5, 0.0  ;;  %v342_v15 = vmul.f32 %v1701_v6, %v2300_v1  ;;  %v476_v19 = vadd.f32 %v2314_v7, %v341_v12  ;;  %v1705_v20 = vunpack.c.h.bf16 %v2178_v2 }
  0x4b   :  { %2237 = vst [vmem:[%s2957_s3 + $0xe8] sm:$0xff] %v1974_v9   ;;  %v1979_v18 = vpack.c.bf16 %v601_v11, %v600_v10  ;;  %v1708_v21 = vunpack.c.l.bf16 %v2179_v8  ;;  %v603_v22 = vmax.f32 %v475_v13, 0.0  ;;  %v343_v24 = vmul.f32 %v1704_v16, %v2300_v1 }
  0x4c   :  { %v477_v23 = vadd.f32 %v2314_v7, %v342_v15  ;;  %v1709_v25 = vunpack.c.h.bf16 %v2179_v8  ;;  %v604_v26 = vmax.f32 %v476_v19, 0.0  ;;  %v344_v27 = vmul.f32 %v1705_v20, %v2300_v1  ;;  %v2185_v8 = vld [vmem:[%s2954_s0 + $0x140] sm:$0xff]  }
  0x4d   :  { %2238 = vst [vmem:[%s2957_s3 + $0xf0] sm:$0xff] %v1979_v18   ;;  %v345_v28 = vmul.f32 %v1708_v21, %v2300_v1  ;;  %v1712_v29 = vunpack.c.l.bf16 %v2180_v17  ;;  %v1984_v31 = vpack.c.bf16 %v603_v22, %v602_v14  ;;  %v478_v33 = vadd.f32 %v2314_v7, %v343_v24  ;;  %v2186_v21 = vld [vmem:[%s2954_s0 + $0x148] sm:$0xff]  }
  0x4e   :  { %v605_v32 = vmax.f32 %v477_v23, 0.0  ;;  %v346_v34 = vmul.f32 %v1709_v25, %v2300_v1  ;;  %v479_v35 = vadd.f32 %v2314_v7, %v344_v27  ;;  %v1713_v37 = vunpack.c.h.bf16 %v2180_v17 }
  0x4f   :  { %v480_v36 = vadd.f32 %v2314_v7, %v345_v28  ;;  %v347_v38 = vmul.f32 %v1712_v29, %v2300_v1  ;;  %2239 = vst [vmem:[%s2957_s3 + $0xf8] sm:$0xff] %v1984_v31   ;;  %v606_v41 = vmax.f32 %v478_v33, 0.0  ;;  %v1716_v43 = vunpack.c.l.bf16 %v2181_v30 }
  0x50   :  { %v1989_v40 = vpack.c.bf16 %v605_v32, %v604_v26  ;;  %v481_v42 = vadd.f32 %v2314_v7, %v346_v34  ;;  %v607_v44 = vmax.f32 %v479_v35, 0.0  ;;  %v348_v46 = vmul.f32 %v1713_v37, %v2300_v1  ;;  %v2187_v26 = vld [vmem:[%s2954_s0 + $0x150] sm:$0xff]   ;;  %v2188_v35 = vld [vmem:[%s2954_s0 + $0x158] sm:$0xff]  }
  0x51   :  { %v608_v45 = vmax.f32 %v480_v36, 0.0  ;;  %v482_v47 = vadd.f32 %v2314_v7, %v347_v38  ;;  %v1717_v49 = vunpack.c.h.bf16 %v2181_v30  ;;  %v349_v50 = vmul.f32 %v1716_v43, %v2300_v1 }
  0x52   :  { %2240 = vst [vmem:[%s2957_s3 + $0x100] sm:$0xff] %v1989_v40   ;;  %v609_v48 = vmax.f32 %v481_v42, 0.0  ;;  %v1720_v51 = vunpack.c.l.bf16 %v2182_v39  ;;  %v1994_v53 = vpack.c.bf16 %v607_v44, %v606_v41  ;;  %v483_v54 = vadd.f32 %v2314_v7, %v348_v46 }
  0x53   :  { %v610_v55 = vmax.f32 %v482_v47, 0.0  ;;  %v1721_v56 = vunpack.c.h.bf16 %v2182_v39  ;;  %v350_v59 = vmul.f32 %v1717_v49, %v2300_v1  ;;  %v484_v60 = vadd.f32 %v2314_v7, %v349_v50 }
  0x54   :  { %v1999_v58 = vpack.c.bf16 %v609_v48, %v608_v45  ;;  %v351_v61 = vmul.f32 %v1720_v51, %v2300_v1  ;;  %2241 = vst [vmem:[%s2957_s3 + $0x108] sm:$0xff] %v1994_v53   ;;  %v611_v62 = vmax.f32 %v483_v54, 0.0  ;;  %v1724_v0 = vunpack.c.l.bf16 %v2183_v52  ;;  %v2189_v48 = vld [vmem:[%s2954_s0 + $0x160] sm:$0xff]  }
  0x55   :  { %v352_v63 = vmul.f32 %v1721_v56, %v2300_v1  ;;  %v1725_v2 = vunpack.c.h.bf16 %v2183_v52  ;;  %v485_v3 = vadd.f32 %v2314_v7, %v350_v59  ;;  %v612_v4 = vmax.f32 %v484_v60, 0.0 }
  0x56   :  { %2242 = vst [vmem:[%s2957_s3 + $0x110] sm:$0xff] %v1999_v58   ;;  %v486_v5 = vadd.f32 %v2314_v7, %v351_v61  ;;  %v1728_v6 = vunpack.c.l.bf16 %v2184_v57  ;;  %v2004_v9 = vpack.c.bf16 %v611_v62, %v610_v55  ;;  %v353_v11 = vmul.f32 %v1724_v0, %v2300_v1 }
  0x57   :  { %v487_v10 = vadd.f32 %v2314_v7, %v352_v63  ;;  %v354_v12 = vmul.f32 %v1725_v2, %v2300_v1  ;;  %v613_v13 = vmax.f32 %v485_v3, 0.0  ;;  %v1729_v15 = vunpack.c.h.bf16 %v2184_v57  ;;  %v2190_v57 = vld [vmem:[%s2954_s0 + $0x168] sm:$0xff]  }
  0x58   :  { %v614_v14 = vmax.f32 %v486_v5, 0.0  ;;  %v355_v16 = vmul.f32 %v1728_v6, %v2300_v1  ;;  %2243 = vst [vmem:[%s2957_s3 + $0x118] sm:$0xff] %v2004_v9   ;;  %v488_v18 = vadd.f32 %v2314_v7, %v353_v11  ;;  %v1732_v20 = vunpack.c.l.bf16 %v2185_v8 }
  0x59   :  { %v615_v17 = vmax.f32 %v487_v10, 0.0  ;;  %v489_v19 = vadd.f32 %v2314_v7, %v354_v12  ;;  %v2009_v22 = vpack.c.bf16 %v613_v13, %v612_v4  ;;  %v356_v23 = vmul.f32 %v1729_v15, %v2300_v1  ;;  %v2192_v13 = vld [vmem:[%s2954_s0 + $0x178] sm:$0xff]  }
  0x5a   :  { %v490_v24 = vadd.f32 %v2314_v7, %v355_v16  ;;  %v1733_v25 = vunpack.c.h.bf16 %v2185_v8  ;;  %v616_v28 = vmax.f32 %v488_v18, 0.0  ;;  %v357_v30 = vmul.f32 %v1732_v20, %v2300_v1  ;;  %v2191_v8 = vld [vmem:[%s2954_s0 + $0x170] sm:$0xff]  }
  0x5b   :  { %v2014_v27 = vpack.c.bf16 %v615_v17, %v614_v14  ;;  %v617_v29 = vmax.f32 %v489_v19, 0.0  ;;  %2244 = vst [vmem:[%s2957_s3 + $0x120] sm:$0xff] %v2009_v22   ;;  %v491_v31 = vadd.f32 %v2314_v7, %v356_v23  ;;  %v1736_v34 = vunpack.c.l.bf16 %v2186_v21 }
  0x5c   :  { %v618_v32 = vmax.f32 %v490_v24, 0.0  ;;  %v358_v33 = vmul.f32 %v1733_v25, %v2300_v1  ;;  %v492_v37 = vadd.f32 %v2314_v7, %v357_v30  ;;  %v1737_v38 = vunpack.c.h.bf16 %v2186_v21 }
  0x5d   :  { %2245 = vst [vmem:[%s2957_s3 + $0x128] sm:$0xff] %v2014_v27   ;;  %v2019_v36 = vpack.c.bf16 %v617_v29, %v616_v28  ;;  %v1740_v39 = vunpack.c.l.bf16 %v2187_v26  ;;  %v619_v40 = vmax.f32 %v491_v31, 0.0  ;;  %v359_v42 = vmul.f32 %v1736_v34, %v2300_v1 }
  0x5e   :  { %v493_v41 = vadd.f32 %v2314_v7, %v358_v33  ;;  %v1741_v43 = vunpack.c.h.bf16 %v2187_v26  ;;  %v620_v44 = vmax.f32 %v492_v37, 0.0  ;;  %v360_v45 = vmul.f32 %v1737_v38, %v2300_v1  ;;  %v2193_v26 = vld [vmem:[%s2954_s0 + $0x180] sm:$0xff]  }
  0x5f   :  { %2246 = vst [vmem:[%s2957_s3 + $0x130] sm:$0xff] %v2019_v36   ;;  %v361_v46 = vmul.f32 %v1740_v39, %v2300_v1  ;;  %v1744_v47 = vunpack.c.l.bf16 %v2188_v35  ;;  %v2024_v49 = vpack.c.bf16 %v619_v40, %v618_v32  ;;  %v494_v51 = vadd.f32 %v2314_v7, %v359_v42  ;;  %v2194_v39 = vld [vmem:[%s2954_s0 + $0x188] sm:$0xff]   ;;  %v2784_v42 = vld [vmem:[%s2956_s2] ss:$0 sm:$0xff] }
  0x60   :  { %v621_v50 = vmax.f32 %v493_v41, 0.0  ;;  %v362_v52 = vmul.f32 %v1741_v43, %v2300_v1  ;;  %v495_v53 = vadd.f32 %v2314_v7, %v360_v45  ;;  %v1745_v55 = vunpack.c.h.bf16 %v2188_v35  ;;  %v2778_v41 = vld [vmem:[%s2955_s1] ss:$0 sm:$0xff] }
  0x61   :  { %v496_v54 = vadd.f32 %v2314_v7, %v361_v46  ;;  %v363_v56 = vmul.f32 %v1744_v47, %v2300_v1  ;;  %2247 = vst [vmem:[%s2957_s3 + $0x138] sm:$0xff] %v2024_v49   ;;  %v622_v59 = vmax.f32 %v494_v51, 0.0  ;;  %v1748_v61 = vunpack.c.l.bf16 %v2189_v48 }
  0x62   :  { %v2029_v58 = vpack.c.bf16 %v621_v50, %v620_v44  ;;  %v497_v60 = vadd.f32 %v2314_v7, %v362_v52  ;;  %v623_v62 = vmax.f32 %v495_v53, 0.0  ;;  %v364_v0 = vmul.f32 %v1745_v55, %v2300_v1  ;;  %v2195_v44 = vld [vmem:[%s2954_s0 + $0x190] sm:$0xff]   ;;  %v2196_v53 = vld [vmem:[%s2954_s0 + $0x198] sm:$0xff]  }
  0x63   :  { %v624_v63 = vmax.f32 %v496_v54, 0.0  ;;  %v498_v2 = vadd.f32 %v2314_v7, %v363_v56  ;;  %v1749_v4 = vunpack.c.h.bf16 %v2189_v48  ;;  %v365_v5 = vmul.f32 %v1748_v61, %v2300_v1 }
  0x64   :  { %2248 = vst [vmem:[%s2957_s3 + $0x140] sm:$0xff] %v2029_v58   ;;  %v625_v3 = vmax.f32 %v497_v60, 0.0  ;;  %v1752_v6 = vunpack.c.l.bf16 %v2190_v57  ;;  %v2034_v9 = vpack.c.bf16 %v623_v62, %v622_v59  ;;  %v499_v10 = vadd.f32 %v2314_v7, %v364_v0 }
  0x65   :  { %v626_v11 = vmax.f32 %v498_v2, 0.0  ;;  %v1753_v12 = vunpack.c.h.bf16 %v2190_v57  ;;  %v366_v15 = vmul.f32 %v1749_v4, %v2300_v1  ;;  %v500_v16 = vadd.f32 %v2314_v7, %v365_v5 }
  0x66   :  { %v2039_v14 = vpack.c.bf16 %v625_v3, %v624_v63  ;;  %v367_v17 = vmul.f32 %v1752_v6, %v2300_v1  ;;  %2249 = vst [vmem:[%s2957_s3 + $0x148] sm:$0xff] %v2034_v9   ;;  %v627_v18 = vmax.f32 %v499_v10, 0.0  ;;  %v1756_v20 = vunpack.c.l.bf16 %v2191_v8  ;;  %v2197_v3 = vld [vmem:[%s2954_s0 + $0x1a0] sm:$0xff]  }
  0x67   :  { %v368_v19 = vmul.f32 %v1753_v12, %v2300_v1  ;;  %v1757_v21 = vunpack.c.h.bf16 %v2191_v8  ;;  %v501_v22 = vadd.f32 %v2314_v7, %v366_v15  ;;  %v628_v23 = vmax.f32 %v500_v16, 0.0 }
  0x68   :  { %2250 = vst [vmem:[%s2957_s3 + $0x150] sm:$0xff] %v2039_v14   ;;  %v502_v24 = vadd.f32 %v2314_v7, %v367_v17  ;;  %v1760_v25 = vunpack.c.l.bf16 %v2192_v13  ;;  %v2044_v27 = vpack.c.bf16 %v627_v18, %v626_v11  ;;  %v369_v29 = vmul.f32 %v1756_v20, %v2300_v1 }
  0x69   :  { %v503_v28 = vadd.f32 %v2314_v7, %v368_v19  ;;  %v370_v30 = vmul.f32 %v1757_v21, %v2300_v1  ;;  %v629_v31 = vmax.f32 %v501_v22, 0.0  ;;  %v1761_v33 = vunpack.c.h.bf16 %v2192_v13  ;;  %v2198_v13 = vld [vmem:[%s2954_s0 + $0x1a8] sm:$0xff]  }
  0x6a   :  { %v630_v32 = vmax.f32 %v502_v24, 0.0  ;;  %v371_v34 = vmul.f32 %v1760_v25, %v2300_v1  ;;  %2251 = vst [vmem:[%s2957_s3 + $0x158] sm:$0xff] %v2044_v27   ;;  %v504_v36 = vadd.f32 %v2314_v7, %v369_v29  ;;  %v1764_v38 = vunpack.c.l.bf16 %v2193_v26 }
  0x6b   :  { %v631_v35 = vmax.f32 %v503_v28, 0.0  ;;  %v505_v37 = vadd.f32 %v2314_v7, %v370_v30  ;;  %v2049_v40 = vpack.c.bf16 %v629_v31, %v628_v23  ;;  %v372_v1 = vmul.f32 %v2778_v41, %v1761_v33  ;;  %v2200_v31 = vld [vmem:[%s2954_s0 + $0x1b8] sm:$0xff]  }
  0x6c   :  { %v506_v7 = vadd.f32 %v2784_v42, %v371_v34  ;;  %v1765_v43 = vunpack.c.h.bf16 %v2193_v26  ;;  %v632_v46 = vmax.f32 %v504_v36, 0.0  ;;  %v373_v48 = vmul.f32 %v2778_v41, %v1764_v38  ;;  %v2199_v26 = vld [vmem:[%s2954_s0 + $0x1b0] sm:$0xff]  }
  0x6d   :  { %v2054_v45 = vpack.c.bf16 %v631_v35, %v630_v32  ;;  %v633_v47 = vmax.f32 %v505_v37, 0.0  ;;  %2252 = vst [vmem:[%s2957_s3 + $0x160] sm:$0xff] %v2049_v40   ;;  %v507_v49 = vadd.f32 %v2784_v42, %v372_v1  ;;  %v1768_v52 = vunpack.c.l.bf16 %v2194_v39 }
  0x6e   :  { %v634_v50 = vmax.f32 %v506_v7, 0.0  ;;  %v374_v51 = vmul.f32 %v2778_v41, %v1765_v43  ;;  %v508_v55 = vadd.f32 %v2784_v42, %v373_v48  ;;  %v1769_v56 = vunpack.c.h.bf16 %v2194_v39 }
  0x6f   :  { %2253 = vst [vmem:[%s2957_s3 + $0x168] sm:$0xff] %v2054_v45   ;;  %v2059_v54 = vpack.c.bf16 %v633_v47, %v632_v46  ;;  %v1772_v57 = vunpack.c.l.bf16 %v2195_v44  ;;  %v635_v58 = vmax.f32 %v507_v49, 0.0  ;;  %v375_v60 = vmul.f32 %v2778_v41, %v1768_v52 }
  0x70   :  { %v509_v59 = vadd.f32 %v2784_v42, %v374_v51  ;;  %v1773_v61 = vunpack.c.h.bf16 %v2195_v44  ;;  %v636_v62 = vmax.f32 %v508_v55, 0.0  ;;  %v376_v63 = vmul.f32 %v2778_v41, %v1769_v56  ;;  %v2201_v44 = vld [vmem:[%s2954_s0 + $0x1c0] sm:$0xff]  }
  0x71   :  { %2254 = vst [vmem:[%s2957_s3 + $0x170] sm:$0xff] %v2059_v54   ;;  %v377_v0 = vmul.f32 %v2778_v41, %v1772_v57  ;;  %v1776_v2 = vunpack.c.l.bf16 %v2196_v53  ;;  %v2064_v4 = vpack.c.bf16 %v635_v58, %v634_v50  ;;  %v510_v6 = vadd.f32 %v2784_v42, %v375_v60  ;;  %v2202_v57 = vld [vmem:[%s2954_s0 + $0x1c8] sm:$0xff]  }
  0x72   :  { %v637_v5 = vmax.f32 %v509_v59, 0.0  ;;  %v378_v8 = vmul.f32 %v2778_v41, %v1773_v61  ;;  %v511_v9 = vadd.f32 %v2784_v42, %v376_v63  ;;  %v1777_v11 = vunpack.c.h.bf16 %v2196_v53 }
  0x73   :  { %v512_v10 = vadd.f32 %v2784_v42, %v377_v0  ;;  %v379_v12 = vmul.f32 %v2778_v41, %v1776_v2  ;;  %2255 = vst [vmem:[%s2957_s3 + $0x178] sm:$0xff] %v2064_v4   ;;  %v638_v15 = vmax.f32 %v510_v6, 0.0  ;;  %v1780_v17 = vunpack.c.l.bf16 %v2197_v3 }
  0x74   :  { %v2069_v14 = vpack.c.bf16 %v637_v5, %v636_v62  ;;  %v513_v16 = vadd.f32 %v2784_v42, %v378_v8  ;;  %v639_v18 = vmax.f32 %v511_v9, 0.0  ;;  %v380_v20 = vmul.f32 %v2778_v41, %v1777_v11  ;;  %v2203_v62 = vld [vmem:[%s2954_s0 + $0x1d0] sm:$0xff]   ;;  %v2204_v9 = vld [vmem:[%s2954_s0 + $0x1d8] sm:$0xff]  }
  0x75   :  { %v640_v19 = vmax.f32 %v512_v10, 0.0  ;;  %v514_v21 = vadd.f32 %v2784_v42, %v379_v12  ;;  %v1781_v23 = vunpack.c.h.bf16 %v2197_v3  ;;  %v381_v24 = vmul.f32 %v2778_v41, %v1780_v17 }
  0x76   :  { %2256 = vst [vmem:[%s2957_s3 + $0x180] sm:$0xff] %v2069_v14   ;;  %v641_v22 = vmax.f32 %v513_v16, 0.0  ;;  %v1784_v25 = vunpack.c.l.bf16 %v2198_v13  ;;  %v2074_v27 = vpack.c.bf16 %v639_v18, %v638_v15  ;;  %v515_v28 = vadd.f32 %v2784_v42, %v380_v20 }
  0x77   :  { %v642_v29 = vmax.f32 %v514_v21, 0.0  ;;  %v1785_v30 = vunpack.c.h.bf16 %v2198_v13  ;;  %v382_v33 = vmul.f32 %v2778_v41, %v1781_v23  ;;  %v516_v34 = vadd.f32 %v2784_v42, %v381_v24 }
  0x78   :  { %v2079_v32 = vpack.c.bf16 %v641_v22, %v640_v19  ;;  %v383_v35 = vmul.f32 %v2778_v41, %v1784_v25  ;;  %2257 = vst [vmem:[%s2957_s3 + $0x188] sm:$0xff] %v2074_v27   ;;  %v643_v36 = vmax.f32 %v515_v28, 0.0  ;;  %v1788_v38 = vunpack.c.l.bf16 %v2199_v26  ;;  %v2205_v22 = vld [vmem:[%s2954_s0 + $0x1e0] sm:$0xff]  }
  0x79   :  { %v384_v37 = vmul.f32 %v2778_v41, %v1785_v30  ;;  %v1789_v39 = vunpack.c.h.bf16 %v2199_v26  ;;  %v517_v40 = vadd.f32 %v2784_v42, %v382_v33  ;;  %v644_v1 = vmax.f32 %v516_v34, 0.0 }
  0x7a   :  { %2258 = vst [vmem:[%s2957_s3 + $0x190] sm:$0xff] %v2079_v32   ;;  %v518_v7 = vadd.f32 %v2784_v42, %v383_v35  ;;  %v1792_v43 = vunpack.c.l.bf16 %v2200_v31  ;;  %v2084_v45 = vpack.c.bf16 %v643_v36, %v642_v29  ;;  %v385_v47 = vmul.f32 %v2778_v41, %v1788_v38 }
  0x7b   :  { %v519_v46 = vadd.f32 %v2784_v42, %v384_v37  ;;  %v386_v48 = vmul.f32 %v2778_v41, %v1789_v39  ;;  %v645_v49 = vmax.f32 %v517_v40, 0.0  ;;  %v1793_v51 = vunpack.c.h.bf16 %v2200_v31  ;;  %v2206_v31 = vld [vmem:[%s2954_s0 + $0x1e8] sm:$0xff]  }
  0x7c   :  { %v646_v50 = vmax.f32 %v518_v7, 0.0  ;;  %v387_v52 = vmul.f32 %v2778_v41, %v1792_v43  ;;  %2259 = vst [vmem:[%s2957_s3 + $0x198] sm:$0xff] %v2084_v45   ;;  %v520_v54 = vadd.f32 %v2784_v42, %v385_v47  ;;  %v1796_v56 = vunpack.c.l.bf16 %v2201_v44 }
  0x7d   :  { %v647_v53 = vmax.f32 %v519_v46, 0.0  ;;  %v521_v55 = vadd.f32 %v2784_v42, %v386_v48  ;;  %v2089_v58 = vpack.c.bf16 %v645_v49, %v644_v1  ;;  %v388_v59 = vmul.f32 %v2778_v41, %v1793_v51  ;;  %v2208_v49 = vld [vmem:[%s2954_s0 + $0x1f8] sm:$0xff]  }
  0x7e   :  { %v522_v60 = vadd.f32 %v2784_v42, %v387_v52  ;;  %v1797_v61 = vunpack.c.h.bf16 %v2201_v44  ;;  %v648_v0 = vmax.f32 %v520_v54, 0.0  ;;  %v389_v3 = vmul.f32 %v2778_v41, %v1796_v56  ;;  %v2207_v44 = vld [vmem:[%s2954_s0 + $0x1f0] sm:$0xff]  }
  0x7f   :  { %v2094_v63 = vpack.c.bf16 %v647_v53, %v646_v50  ;;  %v649_v2 = vmax.f32 %v521_v55, 0.0  ;;  %2260 = vst [vmem:[%s2957_s3 + $0x1a0] sm:$0xff] %v2089_v58   ;;  %v523_v4 = vadd.f32 %v2784_v42, %v388_v59  ;;  %v1800_v8 = vunpack.c.l.bf16 %v2202_v57 }
  0x80   :  { %v650_v5 = vmax.f32 %v522_v60, 0.0  ;;  %v390_v6 = vmul.f32 %v2778_v41, %v1797_v61  ;;  %v524_v11 = vadd.f32 %v2784_v42, %v389_v3  ;;  %v1801_v12 = vunpack.c.h.bf16 %v2202_v57 }
  0x81   :  { %2261 = vst [vmem:[%s2957_s3 + $0x1a8] sm:$0xff] %v2094_v63   ;;  %v2099_v10 = vpack.c.bf16 %v649_v2, %v648_v0  ;;  %v1804_v13 = vunpack.c.l.bf16 %v2203_v62  ;;  %v651_v14 = vmax.f32 %v523_v4, 0.0  ;;  %v391_v16 = vmul.f32 %v2778_v41, %v1800_v8 }
  0x82   :  { %v525_v15 = vadd.f32 %v2784_v42, %v390_v6  ;;  %v1805_v17 = vunpack.c.h.bf16 %v2203_v62  ;;  %v652_v18 = vmax.f32 %v524_v11, 0.0  ;;  %v392_v19 = vmul.f32 %v2778_v41, %v1801_v12 }
  0x83   :  { %2262 = vst [vmem:[%s2957_s3 + $0x1b0] sm:$0xff] %v2099_v10   ;;  %v393_v20 = vmul.f32 %v2778_v41, %v1804_v13  ;;  %v1808_v21 = vunpack.c.l.bf16 %v2204_v9  ;;  %v2104_v23 = vpack.c.bf16 %v651_v14, %v650_v5  ;;  %v526_v25 = vadd.f32 %v2784_v42, %v391_v16 }
  0x84   :  { %v653_v24 = vmax.f32 %v525_v15, 0.0  ;;  %v394_v26 = vmul.f32 %v2778_v41, %v1805_v17  ;;  %v527_v27 = vadd.f32 %v2784_v42, %v392_v19  ;;  %v1809_v29 = vunpack.c.h.bf16 %v2204_v9 }
  0x85   :  { %v528_v28 = vadd.f32 %v2784_v42, %v393_v20  ;;  %v395_v30 = vmul.f32 %v2778_v41, %v1808_v21  ;;  %2263 = vst [vmem:[%s2957_s3 + $0x1b8] sm:$0xff] %v2104_v23   ;;  %v654_v33 = vmax.f32 %v526_v25, 0.0  ;;  %v1812_v35 = vunpack.c.l.bf16 %v2205_v22 }
  0x86   :  { %v2109_v32 = vpack.c.bf16 %v653_v24, %v652_v18  ;;  %v529_v34 = vadd.f32 %v2784_v42, %v394_v26  ;;  %v655_v36 = vmax.f32 %v527_v27, 0.0  ;;  %v396_v38 = vmul.f32 %v2778_v41, %v1809_v29 }
  0x87   :  { %v656_v37 = vmax.f32 %v528_v28, 0.0  ;;  %v530_v39 = vadd.f32 %v2784_v42, %v395_v30  ;;  %v1813_v1 = vunpack.c.h.bf16 %v2205_v22  ;;  %v397_v7 = vmul.f32 %v2778_v41, %v1812_v35 }
  0x88   :  { %2264 = vst [vmem:[%s2957_s3 + $0x1c0] sm:$0xff] %v2109_v32   ;;  %v657_v40 = vmax.f32 %v529_v34, 0.0  ;;  %v1816_v43 = vunpack.c.l.bf16 %v2206_v31  ;;  %v2114_v45 = vpack.c.bf16 %v655_v36, %v654_v33  ;;  %v531_v46 = vadd.f32 %v2784_v42, %v396_v38 }
  0x89   :  { %v658_v47 = vmax.f32 %v530_v39, 0.0  ;;  %v1817_v48 = vunpack.c.h.bf16 %v2206_v31  ;;  %v398_v51 = vmul.f32 %v2778_v41, %v1813_v1  ;;  %v532_v52 = vadd.f32 %v2784_v42, %v397_v7 }
  0x8a   :  { %v2119_v50 = vpack.c.bf16 %v657_v40, %v656_v37  ;;  %v399_v53 = vmul.f32 %v2778_v41, %v1816_v43  ;;  %2265 = vst [vmem:[%s2957_s3 + $0x1c8] sm:$0xff] %v2114_v45   ;;  %v659_v54 = vmax.f32 %v531_v46, 0.0  ;;  %v1820_v56 = vunpack.c.l.bf16 %v2207_v44 }
  0x8b   :  { %v400_v55 = vmul.f32 %v2778_v41, %v1817_v48  ;;  %v1821_v57 = vunpack.c.h.bf16 %v2207_v44  ;;  %v533_v58 = vadd.f32 %v2784_v42, %v398_v51  ;;  %v660_v59 = vmax.f32 %v532_v52, 0.0 }
  0x8c   :  { %2266 = vst [vmem:[%s2957_s3 + $0x1d0] sm:$0xff] %v2119_v50   ;;  %v534_v60 = vadd.f32 %v2784_v42, %v399_v53  ;;  %v1824_v61 = vunpack.c.l.bf16 %v2208_v49  ;;  %v2124_v62 = vpack.c.bf16 %v659_v54, %v658_v47  ;;  %v401_v0 = vmul.f32 %v2778_v41, %v1820_v56 }
  0x8d   :  { %v535_v63 = vadd.f32 %v2784_v42, %v400_v55  ;;  %v402_v2 = vmul.f32 %v2778_v41, %v1821_v57  ;;  %v661_v3 = vmax.f32 %v533_v58, 0.0  ;;  %v1825_v5 = vunpack.c.h.bf16 %v2208_v49 }
  0x8e   :  { %v662_v4 = vmax.f32 %v534_v60, 0.0  ;;  %v403_v6 = vmul.f32 %v2778_v41, %v1824_v61  ;;  %2267 = vst [vmem:[%s2957_s3 + $0x1d8] sm:$0xff] %v2124_v62   ;;  %v536_v9 = vadd.f32 %v2784_v42, %v401_v0 }
  0x8f   :  { %v663_v8 = vmax.f32 %v535_v63, 0.0  ;;  %v537_v10 = vadd.f32 %v2784_v42, %v402_v2  ;;  %v2129_v11 = vpack.c.bf16 %v661_v3, %v660_v59  ;;  %v404_v12 = vmul.f32 %v2778_v41, %v1825_v5 }
  0x90   :  { %v538_v13 = vadd.f32 %v2784_v42, %v403_v6  ;;  %v664_v15 = vmax.f32 %v536_v9, 0.0 }
  0x91   :  { %v2134_v14 = vpack.c.bf16 %v663_v8, %v662_v4  ;;  %v665_v16 = vmax.f32 %v537_v10, 0.0  ;;  %2268 = vst [vmem:[%s2957_s3 + $0x1e0] sm:$0xff] %v2129_v11   ;;  %v539_v17 = vadd.f32 %v2784_v42, %v404_v12 }
  0x92   :  { %v666_v18 = vmax.f32 %v538_v13, 0.0 }
  0x93   :  { %2269 = vst [vmem:[%s2957_s3 + $0x1e8] sm:$0xff] %v2134_v14   ;;  %v2139_v19 = vpack.c.bf16 %v665_v16, %v664_v15  ;;  %v667_v20 = vmax.f32 %v539_v17, 0.0 }
  0x95   :  { %2270 = vst [vmem:[%s2957_s3 + $0x1f0] sm:$0xff] %v2139_v19   ;;  %v2144_v41 = vpack.c.bf16 %v667_v20, %v666_v18 }
  0x97   :  { %2271 = vst [vmem:[%s2957_s3 + $0x1f8] sm:$0xff] %v2144_v41  }

// kernel: resblock_forward.7
= control target key start
LH: loop header
LB: loop body
LE: loop exit
PB: predicated region body
PF: predicated region fallthrough
CT: control target
= control target key end

     0   :  { %s2898_s0 = inlined_call_operand.vmem [shape: bf16[1024,128], index: 0, kind: input, shape index: {}]   ;;  %s2899_s1 = inlined_call_operand.vmem [shape: f32[1,128], index: 1, kind: input, shape index: {}]   ;;  %s2900_s2 = inlined_call_operand.vmem [shape: f32[1,128], index: 2, kind: input, shape index: {}]   ;;  %s2901_s3 = inlined_call_operand.vmem [shape: bf16[1024,128], index: 3, kind: input, shape index: {}]   ;;  %s2902_s4 = inlined_call_operand.vmem [shape: f32[1024,128], index: 4, kind: output, shape index: {}]  }
   0x1   :  { %v1190_v0 = vld [vmem:[%s2898_s0] sm:$0xff]   ;;  %v1701_v5 = vld [vmem:[%s2898_s0 + $0x8] sm:$0xff]   ;;  %v1702_v12 = vld [vmem:[%s2898_s0 + $0x10] sm:$0xff]  }
   0x2   :  { %v1860_v1 = vld [vmem:[%s2899_s1] ss:$0 sm:$0xff]  ;;  %v1191_v2 = vunpack.c.l.bf16 %v1190_v0  ;;  %v1192_v4 = vunpack.c.h.bf16 %v1190_v0  ;;  %v1764_v6 = vld [vmem:[%s2901_s3 + $0x8] sm:$0xff]   ;;  %v1195_v10 = vunpack.c.l.bf16 %v1701_v5  ;;  %v1765_v13 = vld [vmem:[%s2901_s3 + $0x10] sm:$0xff]   ;;  %v1196_v16 = vunpack.c.h.bf16 %v1701_v5 }
   0x3   :  { %v1446_v3 = vld [vmem:[%s2901_s3] sm:$0xff]   ;;  %v1451_v11 = vunpack.c.l.bf16 %v1764_v6  ;;  %v1452_v17 = vunpack.c.h.bf16 %v1764_v6  ;;  %v1703_v18 = vld [vmem:[%s2898_s0 + $0x18] sm:$0xff]   ;;  %v1199_v20 = vunpack.c.l.bf16 %v1702_v12  ;;  %v1455_v21 = vunpack.c.l.bf16 %v1765_v13  ;;  %v1705_v54 = vld [vmem:[%s2898_s0 + $0x28] sm:$0xff]  }
   0x4   :  { %v1874_v7 = vld [vmem:[%s2900_s2] ss:$0 sm:$0xff]  ;;  %v1447_v8 = vunpack.c.l.bf16 %v1446_v3  ;;  %v1448_v9 = vunpack.c.h.bf16 %v1446_v3  ;;  %v280_v14 = vmul.f32 %v1191_v2, %v1860_v1  ;;  %v281_v15 = vmul.f32 %v1192_v4, %v1860_v1  ;;  %v1766_v23 = vld [vmem:[%s2901_s3 + $0x18] sm:$0xff]   ;;  %v1768_v55 = vld [vmem:[%s2901_s3 + $0x28] sm:$0xff]  }
   0x5   :  { %v282_v19 = vmul.f32 %v1195_v10, %v1860_v1  ;;  %v1200_v22 = vunpack.c.h.bf16 %v1702_v12  ;;  %v283_v26 = vmul.f32 %v1196_v16, %v1860_v1  ;;  %v1456_v27 = vunpack.c.h.bf16 %v1765_v13  ;;  %v1704_v40 = vld [vmem:[%s2898_s0 + $0x20] sm:$0xff]   ;;  %v1706_v0 = vld [vmem:[%s2898_s0 + $0x30] sm:$0xff]   ;;  %v1707_v16 = vld [vmem:[%s2898_s0 + $0x38] sm:$0xff]  }
   0x6   :  { %v415_v24 = vadd.f32 %v1874_v7, %v280_v14  ;;  %v416_v25 = vadd.f32 %v1874_v7, %v281_v15  ;;  %v284_v29 = vmul.f32 %v1199_v20, %v1860_v1  ;;  %v1203_v31 = vunpack.c.l.bf16 %v1703_v18  ;;  %v1767_v45 = vld [vmem:[%s2901_s3 + $0x20] sm:$0xff]   ;;  %v1769_v2 = vld [vmem:[%s2901_s3 + $0x30] sm:$0xff]  }
   0x7   :  { %v417_v28 = vadd.f32 %v1874_v7, %v282_v19  ;;  %v285_v30 = vmul.f32 %v1200_v22, %v1860_v1  ;;  %v418_v34 = vadd.f32 %v1874_v7, %v283_v26  ;;  %v1459_v35 = vunpack.c.l.bf16 %v1766_v23 }
   0x8   :  { %v799_v32 = vadd.f32 %v1447_v8, %v415_v24  ;;  %v800_v33 = vadd.f32 %v1448_v9, %v416_v25  ;;  %v419_v37 = vadd.f32 %v1874_v7, %v284_v29  ;;  %v286_v39 = vmul.f32 %v1203_v31, %v1860_v1 }
   0x9   :  { %v801_v36 = vadd.f32 %v1451_v11, %v417_v28  ;;  %v420_v38 = vadd.f32 %v1874_v7, %v285_v30  ;;  %v802_v43 = vadd.f32 %v1452_v17, %v418_v34  ;;  %v1204_v44 = vunpack.c.h.bf16 %v1703_v18  ;;  %v1708_v34 = vld [vmem:[%s2898_s0 + $0x40] sm:$0xff]  }
   0xa   :  { %v927_v41 = vmax.f32 %v799_v32, 0.0  ;;  %v928_v42 = vmax.f32 %v800_v33, 0.0  ;;  %v803_v47 = vadd.f32 %v1455_v21, %v419_v37  ;;  %v421_v49 = vadd.f32 %v1874_v7, %v286_v39  ;;  %v1770_v21 = vld [vmem:[%s2901_s3 + $0x38] sm:$0xff]   ;;  %v1771_v39 = vld [vmem:[%s2901_s3 + $0x40] sm:$0xff]  }
   0xb   :  { %v929_v46 = vmax.f32 %v801_v36, 0.0  ;;  %v804_v48 = vadd.f32 %v1456_v27, %v420_v38  ;;  %v930_v50 = vmax.f32 %v802_v43, 0.0  ;;  %v287_v51 = vmul.f32 %v1204_v44, %v1860_v1 }
   0xc   :  { %1055 = vst [vmem:[%s2902_s4] sm:$0xff] %v927_v41  ;;  %1056 = vst [vmem:[%s2902_s4 + $0x8] sm:$0xff] %v928_v42  ;;  %v1460_v52 = vunpack.c.h.bf16 %v1766_v23  ;;  %v1207_v53 = vunpack.c.l.bf16 %v1704_v40  ;;  %v931_v56 = vmax.f32 %v803_v47, 0.0  ;;  %v805_v58 = vadd.f32 %v1459_v35, %v421_v49  ;;  %v1772_v49 = vld [vmem:[%s2901_s3 + $0x48] sm:$0xff]  }
   0xd   :  { %1057 = vst [vmem:[%s2902_s4 + $0x10] sm:$0xff] %v929_v46  ;;  %v932_v57 = vmax.f32 %v804_v48, 0.0  ;;  %v1463_v59 = vunpack.c.l.bf16 %v1767_v45  ;;  %1058 = vst [vmem:[%s2902_s4 + $0x18] sm:$0xff] %v930_v50  ;;  %v422_v60 = vadd.f32 %v1874_v7, %v287_v51  ;;  %v1208_v62 = vunpack.c.h.bf16 %v1704_v40  ;;  %v1709_v48 = vld [vmem:[%s2898_s0 + $0x48] sm:$0xff]  }
   0xe   :  { %v288_v61 = vmul.f32 %v1207_v53, %v1860_v1  ;;  %v1464_v63 = vunpack.c.h.bf16 %v1767_v45  ;;  %1059 = vst [vmem:[%s2902_s4 + $0x20] sm:$0xff] %v931_v56  ;;  %v933_v3 = vmax.f32 %v805_v58, 0.0  ;;  %v1211_v4 = vunpack.c.l.bf16 %v1705_v54  ;;  %v1710_v58 = vld [vmem:[%s2898_s0 + $0x50] sm:$0xff]  }
   0xf   :  { %1060 = vst [vmem:[%s2902_s4 + $0x28] sm:$0xff] %v932_v57  ;;  %v1467_v5 = vunpack.c.l.bf16 %v1768_v55  ;;  %v1212_v6 = vunpack.c.h.bf16 %v1705_v54  ;;  %v806_v8 = vadd.f32 %v1460_v52, %v422_v60  ;;  %v289_v10 = vmul.f32 %v1208_v62, %v1860_v1 }
  0x10   :  { %v423_v9 = vadd.f32 %v1874_v7, %v288_v61  ;;  %v1468_v11 = vunpack.c.h.bf16 %v1768_v55  ;;  %1061 = vst [vmem:[%s2902_s4 + $0x30] sm:$0xff] %v933_v3  ;;  %v290_v12 = vmul.f32 %v1211_v4, %v1860_v1  ;;  %v1215_v14 = vunpack.c.l.bf16 %v1706_v0 }
  0x11   :  { %v291_v13 = vmul.f32 %v1212_v6, %v1860_v1  ;;  %v1471_v15 = vunpack.c.l.bf16 %v1769_v2  ;;  %v934_v17 = vmax.f32 %v806_v8, 0.0  ;;  %v424_v19 = vadd.f32 %v1874_v7, %v289_v10  ;;  %v1711_v10 = vld [vmem:[%s2898_s0 + $0x58] sm:$0xff]  }
  0x12   :  { %v807_v18 = vadd.f32 %v1463_v59, %v423_v9  ;;  %v1216_v20 = vunpack.c.h.bf16 %v1706_v0  ;;  %v425_v22 = vadd.f32 %v1874_v7, %v290_v12  ;;  %v292_v24 = vmul.f32 %v1215_v14, %v1860_v1 }
  0x13   :  { %v426_v23 = vadd.f32 %v1874_v7, %v291_v13  ;;  %v1472_v25 = vunpack.c.h.bf16 %v1769_v2  ;;  %1062 = vst [vmem:[%s2902_s4 + $0x38] sm:$0xff] %v934_v17  ;;  %v808_v27 = vadd.f32 %v1464_v63, %v424_v19  ;;  %v1219_v29 = vunpack.c.l.bf16 %v1707_v16  ;;  %v1773_v63 = vld [vmem:[%s2901_s3 + $0x50] sm:$0xff]   ;;  %v1774_v19 = vld [vmem:[%s2901_s3 + $0x58] sm:$0xff]  }
  0x14   :  { %v935_v26 = vmax.f32 %v807_v18, 0.0  ;;  %v293_v28 = vmul.f32 %v1216_v20, %v1860_v1  ;;  %v809_v30 = vadd.f32 %v1467_v5, %v425_v22  ;;  %v427_v32 = vadd.f32 %v1874_v7, %v292_v24 }
  0x15   :  { %v810_v31 = vadd.f32 %v1468_v11, %v426_v23  ;;  %v1475_v33 = vunpack.c.l.bf16 %v1770_v21  ;;  %v936_v35 = vmax.f32 %v808_v27, 0.0  ;;  %v294_v37 = vmul.f32 %v1219_v29, %v1860_v1 }
  0x16   :  { %1063 = vst [vmem:[%s2902_s4 + $0x40] sm:$0xff] %v935_v26  ;;  %v428_v36 = vadd.f32 %v1874_v7, %v293_v28  ;;  %v1220_v38 = vunpack.c.h.bf16 %v1707_v16  ;;  %v937_v40 = vmax.f32 %v809_v30, 0.0  ;;  %v811_v42 = vadd.f32 %v1471_v15, %v427_v32  ;;  %v1712_v28 = vld [vmem:[%s2898_s0 + $0x60] sm:$0xff]  }
  0x17   :  { %v938_v41 = vmax.f32 %v810_v31, 0.0  ;;  %v1476_v43 = vunpack.c.h.bf16 %v1770_v21  ;;  %1064 = vst [vmem:[%s2902_s4 + $0x48] sm:$0xff] %v936_v35  ;;  %v429_v45 = vadd.f32 %v1874_v7, %v294_v37  ;;  %v1223_v47 = vunpack.c.l.bf16 %v1708_v34 }
  0x18   :  { %v812_v44 = vadd.f32 %v1472_v25, %v428_v36  ;;  %v295_v46 = vmul.f32 %v1220_v38, %v1860_v1  ;;  %1065 = vst [vmem:[%s2902_s4 + $0x50] sm:$0xff] %v937_v40  ;;  %v939_v50 = vmax.f32 %v811_v42, 0.0  ;;  %v1479_v51 = vunpack.c.l.bf16 %v1771_v39  ;;  %v1713_v42 = vld [vmem:[%s2898_s0 + $0x68] sm:$0xff]  }
  0x19   :  { %1066 = vst [vmem:[%s2902_s4 + $0x58] sm:$0xff] %v938_v41  ;;  %v1224_v52 = vunpack.c.h.bf16 %v1708_v34  ;;  %v1480_v53 = vunpack.c.h.bf16 %v1771_v39  ;;  %v813_v55 = vadd.f32 %v1475_v33, %v429_v45  ;;  %v296_v57 = vmul.f32 %v1223_v47, %v1860_v1  ;;  %v1775_v33 = vld [vmem:[%s2901_s3 + $0x60] sm:$0xff]  }
  0x1a   :  { %v940_v54 = vmax.f32 %v812_v44, 0.0  ;;  %v430_v56 = vadd.f32 %v1874_v7, %v295_v46  ;;  %1067 = vst [vmem:[%s2902_s4 + $0x60] sm:$0xff] %v939_v50  ;;  %v1227_v60 = vunpack.c.l.bf16 %v1709_v48  ;;  %v1483_v61 = vunpack.c.l.bf16 %v1772_v49 }
  0x1b   :  { %v297_v59 = vmul.f32 %v1224_v52, %v1860_v1  ;;  %v1228_v62 = vunpack.c.h.bf16 %v1709_v48  ;;  %v941_v0 = vmax.f32 %v813_v55, 0.0  ;;  %v431_v3 = vadd.f32 %v1874_v7, %v296_v57  ;;  %v1714_v52 = vld [vmem:[%s2898_s0 + $0x70] sm:$0xff]  }
  0x1c   :  { %1068 = vst [vmem:[%s2902_s4 + $0x68] sm:$0xff] %v940_v54  ;;  %v814_v2 = vadd.f32 %v1476_v43, %v430_v56  ;;  %v1484_v4 = vunpack.c.h.bf16 %v1772_v49  ;;  %v298_v6 = vmul.f32 %v1227_v60, %v1860_v1  ;;  %v1231_v9 = vunpack.c.l.bf16 %v1710_v58  ;;  %v1776_v43 = vld [vmem:[%s2901_s3 + $0x68] sm:$0xff]   ;;  %v1777_v57 = vld [vmem:[%s2901_s3 + $0x70] sm:$0xff]  }
  0x1d   :  { %v432_v5 = vadd.f32 %v1874_v7, %v297_v59  ;;  %v299_v8 = vmul.f32 %v1228_v62, %v1860_v1  ;;  %1069 = vst [vmem:[%s2902_s4 + $0x70] sm:$0xff] %v941_v0  ;;  %v815_v12 = vadd.f32 %v1479_v51, %v431_v3  ;;  %v1487_v13 = vunpack.c.l.bf16 %v1773_v63  ;;  %v1715_v3 = vld [vmem:[%s2898_s0 + $0x78] sm:$0xff]  }
  0x1e   :  { %v942_v11 = vmax.f32 %v814_v2, 0.0  ;;  %v1232_v14 = vunpack.c.h.bf16 %v1710_v58  ;;  %v433_v16 = vadd.f32 %v1874_v7, %v298_v6  ;;  %v300_v18 = vmul.f32 %v1231_v9, %v1860_v1 }
  0x1f   :  { %v816_v15 = vadd.f32 %v1480_v53, %v432_v5  ;;  %v434_v17 = vadd.f32 %v1874_v7, %v299_v8  ;;  %v943_v20 = vmax.f32 %v815_v12, 0.0  ;;  %v1488_v22 = vunpack.c.h.bf16 %v1773_v63 }
  0x20   :  { %1070 = vst [vmem:[%s2902_s4 + $0x78] sm:$0xff] %v942_v11  ;;  %v301_v21 = vmul.f32 %v1232_v14, %v1860_v1  ;;  %v1235_v23 = vunpack.c.l.bf16 %v1711_v10  ;;  %v817_v25 = vadd.f32 %v1483_v61, %v433_v16  ;;  %v435_v27 = vadd.f32 %v1874_v7, %v300_v18 }
  0x21   :  { %v944_v24 = vmax.f32 %v816_v15, 0.0  ;;  %v818_v26 = vadd.f32 %v1484_v4, %v434_v17  ;;  %1071 = vst [vmem:[%s2902_s4 + $0x80] sm:$0xff] %v943_v20  ;;  %v1491_v31 = vunpack.c.l.bf16 %v1774_v19  ;;  %v1236_v32 = vunpack.c.h.bf16 %v1711_v10 }
  0x22   :  { %v436_v29 = vadd.f32 %v1874_v7, %v301_v21  ;;  %v302_v30 = vmul.f32 %v1235_v23, %v1860_v1  ;;  %v945_v34 = vmax.f32 %v817_v25, 0.0  ;;  %v819_v36 = vadd.f32 %v1487_v13, %v435_v27  ;;  %v1778_v13 = vld [vmem:[%s2901_s3 + $0x78] sm:$0xff]   ;;  %v1779_v27 = vld [vmem:[%s2901_s3 + $0x80] sm:$0xff]  }
  0x23   :  { %1072 = vst [vmem:[%s2902_s4 + $0x88] sm:$0xff] %v944_v24  ;;  %v946_v35 = vmax.f32 %v818_v26, 0.0  ;;  %v1492_v37 = vunpack.c.h.bf16 %v1774_v19  ;;  %v303_v40 = vmul.f32 %v1236_v32, %v1860_v1  ;;  %v1239_v41 = vunpack.c.l.bf16 %v1712_v28 }
  0x24   :  { %v820_v38 = vadd.f32 %v1488_v22, %v436_v29  ;;  %v437_v39 = vadd.f32 %v1874_v7, %v302_v30  ;;  %1073 = vst [vmem:[%s2902_s4 + $0x90] sm:$0xff] %v945_v34  ;;  %v947_v44 = vmax.f32 %v819_v36, 0.0  ;;  %v1495_v45 = vunpack.c.l.bf16 %v1775_v33  ;;  %v1716_v22 = vld [vmem:[%s2898_s0 + $0x80] sm:$0xff]   ;;  %v1717_v36 = vld [vmem:[%s2898_s0 + $0x88] sm:$0xff]  }
  0x25   :  { %1074 = vst [vmem:[%s2902_s4 + $0x98] sm:$0xff] %v946_v35  ;;  %v1240_v46 = vunpack.c.h.bf16 %v1712_v28  ;;  %v1496_v47 = vunpack.c.h.bf16 %v1775_v33  ;;  %v438_v50 = vadd.f32 %v1874_v7, %v303_v40  ;;  %v304_v51 = vmul.f32 %v1239_v41, %v1860_v1 }
  0x26   :  { %v948_v48 = vmax.f32 %v820_v38, 0.0  ;;  %v821_v49 = vadd.f32 %v1491_v31, %v437_v39  ;;  %1075 = vst [vmem:[%s2902_s4 + $0xa0] sm:$0xff] %v947_v44  ;;  %v1243_v54 = vunpack.c.l.bf16 %v1713_v42  ;;  %v1499_v55 = vunpack.c.l.bf16 %v1776_v43 }
  0x27   :  { %v305_v53 = vmul.f32 %v1240_v46, %v1860_v1  ;;  %v1244_v56 = vunpack.c.h.bf16 %v1713_v42  ;;  %v822_v59 = vadd.f32 %v1492_v37, %v438_v50  ;;  %v439_v60 = vadd.f32 %v1874_v7, %v304_v51  ;;  %v1780_v37 = vld [vmem:[%s2901_s3 + $0x88] sm:$0xff]   ;;  %v1718_v46 = vld [vmem:[%s2898_s0 + $0x90] sm:$0xff]  }
  0x28   :  { %1076 = vst [vmem:[%s2902_s4 + $0xa8] sm:$0xff] %v948_v48  ;;  %v949_v58 = vmax.f32 %v821_v49, 0.0  ;;  %v1500_v61 = vunpack.c.h.bf16 %v1776_v43  ;;  %v306_v63 = vmul.f32 %v1243_v54, %v1860_v1  ;;  %v1247_v2 = vunpack.c.l.bf16 %v1714_v52  ;;  %v1781_v51 = vld [vmem:[%s2901_s3 + $0x90] sm:$0xff]  }
  0x29   :  { %v440_v62 = vadd.f32 %v1874_v7, %v305_v53  ;;  %v307_v0 = vmul.f32 %v1244_v56, %v1860_v1  ;;  %v950_v4 = vmax.f32 %v822_v59, 0.0  ;;  %v823_v5 = vadd.f32 %v1495_v45, %v439_v60  ;;  %v1719_v60 = vld [vmem:[%s2898_s0 + $0x98] sm:$0xff]  }
  0x2a   :  { %1077 = vst [vmem:[%s2902_s4 + $0xb0] sm:$0xff] %v949_v58  ;;  %v1503_v6 = vunpack.c.l.bf16 %v1777_v57  ;;  %v1248_v8 = vunpack.c.h.bf16 %v1714_v52  ;;  %v441_v10 = vadd.f32 %v1874_v7, %v306_v63  ;;  %v308_v12 = vmul.f32 %v1247_v2, %v1860_v1 }
  0x2b   :  { %v824_v9 = vadd.f32 %v1496_v47, %v440_v62  ;;  %v442_v11 = vadd.f32 %v1874_v7, %v307_v0  ;;  %1078 = vst [vmem:[%s2902_s4 + $0xb8] sm:$0xff] %v950_v4  ;;  %v951_v14 = vmax.f32 %v823_v5, 0.0  ;;  %v1504_v16 = vunpack.c.h.bf16 %v1777_v57 }
  0x2c   :  { %v309_v15 = vmul.f32 %v1248_v8, %v1860_v1  ;;  %v1251_v17 = vunpack.c.l.bf16 %v1715_v3  ;;  %v825_v19 = vadd.f32 %v1499_v55, %v441_v10  ;;  %v443_v21 = vadd.f32 %v1874_v7, %v308_v12 }
  0x2d   :  { %v952_v18 = vmax.f32 %v824_v9, 0.0  ;;  %v826_v20 = vadd.f32 %v1500_v61, %v442_v11  ;;  %1079 = vst [vmem:[%s2902_s4 + $0xc0] sm:$0xff] %v951_v14  ;;  %v1507_v25 = vunpack.c.l.bf16 %v1778_v13  ;;  %v1252_v26 = vunpack.c.h.bf16 %v1715_v3 }
  0x2e   :  { %v444_v23 = vadd.f32 %v1874_v7, %v309_v15  ;;  %v310_v24 = vmul.f32 %v1251_v17, %v1860_v1  ;;  %v953_v28 = vmax.f32 %v825_v19, 0.0  ;;  %v827_v30 = vadd.f32 %v1503_v6, %v443_v21  ;;  %v1782_v6 = vld [vmem:[%s2901_s3 + $0x98] sm:$0xff]   ;;  %v1783_v21 = vld [vmem:[%s2901_s3 + $0xa0] sm:$0xff]  }
  0x2f   :  { %1080 = vst [vmem:[%s2902_s4 + $0xc8] sm:$0xff] %v952_v18  ;;  %v954_v29 = vmax.f32 %v826_v20, 0.0  ;;  %v1508_v31 = vunpack.c.h.bf16 %v1778_v13  ;;  %v311_v34 = vmul.f32 %v1252_v26, %v1860_v1  ;;  %v1255_v35 = vunpack.c.l.bf16 %v1716_v22 }
  0x30   :  { %v828_v32 = vadd.f32 %v1504_v16, %v444_v23  ;;  %v445_v33 = vadd.f32 %v1874_v7, %v310_v24  ;;  %1081 = vst [vmem:[%s2902_s4 + $0xd0] sm:$0xff] %v953_v28  ;;  %v955_v38 = vmax.f32 %v827_v30, 0.0  ;;  %v1511_v39 = vunpack.c.l.bf16 %v1779_v27  ;;  %v1720_v16 = vld [vmem:[%s2898_s0 + $0xa0] sm:$0xff]   ;;  %v1721_v30 = vld [vmem:[%s2898_s0 + $0xa8] sm:$0xff]  }
  0x31   :  { %1082 = vst [vmem:[%s2902_s4 + $0xd8] sm:$0xff] %v954_v29  ;;  %v1256_v40 = vunpack.c.h.bf16 %v1716_v22  ;;  %v1512_v41 = vunpack.c.h.bf16 %v1779_v27  ;;  %v446_v44 = vadd.f32 %v1874_v7, %v311_v34  ;;  %v312_v45 = vmul.f32 %v1255_v35, %v1860_v1 }
  0x32   :  { %v956_v42 = vmax.f32 %v828_v32, 0.0  ;;  %v829_v43 = vadd.f32 %v1507_v25, %v445_v33  ;;  %1083 = vst [vmem:[%s2902_s4 + $0xe0] sm:$0xff] %v955_v38  ;;  %v1259_v48 = vunpack.c.l.bf16 %v1717_v36  ;;  %v1515_v49 = vunpack.c.l.bf16 %v1780_v37 }
  0x33   :  { %v313_v47 = vmul.f32 %v1256_v40, %v1860_v1  ;;  %v1260_v50 = vunpack.c.h.bf16 %v1717_v36  ;;  %v830_v53 = vadd.f32 %v1508_v31, %v446_v44  ;;  %v447_v54 = vadd.f32 %v1874_v7, %v312_v45  ;;  %v1784_v31 = vld [vmem:[%s2901_s3 + $0xa8] sm:$0xff]   ;;  %v1722_v40 = vld [vmem:[%s2898_s0 + $0xb0] sm:$0xff]  }
  0x34   :  { %1084 = vst [vmem:[%s2902_s4 + $0xe8] sm:$0xff] %v956_v42  ;;  %v957_v52 = vmax.f32 %v829_v43, 0.0  ;;  %v1516_v55 = vunpack.c.h.bf16 %v1780_v37  ;;  %v314_v57 = vmul.f32 %v1259_v48, %v1860_v1  ;;  %v1263_v59 = vunpack.c.l.bf16 %v1718_v46  ;;  %v1785_v45 = vld [vmem:[%s2901_s3 + $0xb0] sm:$0xff]  }
  0x35   :  { %v448_v56 = vadd.f32 %v1874_v7, %v313_v47  ;;  %v315_v58 = vmul.f32 %v1260_v50, %v1860_v1  ;;  %v958_v61 = vmax.f32 %v830_v53, 0.0  ;;  %v831_v62 = vadd.f32 %v1511_v39, %v447_v54  ;;  %v1723_v54 = vld [vmem:[%s2898_s0 + $0xb8] sm:$0xff]  }
  0x36   :  { %1085 = vst [vmem:[%s2902_s4 + $0xf0] sm:$0xff] %v957_v52  ;;  %v1519_v63 = vunpack.c.l.bf16 %v1781_v51  ;;  %v1264_v0 = vunpack.c.h.bf16 %v1718_v46  ;;  %v449_v3 = vadd.f32 %v1874_v7, %v314_v57  ;;  %v316_v5 = vmul.f32 %v1263_v59, %v1860_v1 }
  0x37   :  { %v832_v2 = vadd.f32 %v1512_v41, %v448_v56  ;;  %v450_v4 = vadd.f32 %v1874_v7, %v315_v58  ;;  %1086 = vst [vmem:[%s2902_s4 + $0xf8] sm:$0xff] %v958_v61  ;;  %v959_v8 = vmax.f32 %v831_v62, 0.0  ;;  %v1520_v10 = vunpack.c.h.bf16 %v1781_v51 }
  0x38   :  { %v317_v9 = vmul.f32 %v1264_v0, %v1860_v1  ;;  %v1267_v11 = vunpack.c.l.bf16 %v1719_v60  ;;  %v833_v13 = vadd.f32 %v1515_v49, %v449_v3  ;;  %v451_v15 = vadd.f32 %v1874_v7, %v316_v5 }
  0x39   :  { %v960_v12 = vmax.f32 %v832_v2, 0.0  ;;  %v834_v14 = vadd.f32 %v1516_v55, %v450_v4  ;;  %1087 = vst [vmem:[%s2902_s4 + $0x100] sm:$0xff] %v959_v8  ;;  %v1523_v19 = vunpack.c.l.bf16 %v1782_v6  ;;  %v1268_v20 = vunpack.c.h.bf16 %v1719_v60 }
  0x3a   :  { %v452_v17 = vadd.f32 %v1874_v7, %v317_v9  ;;  %v318_v18 = vmul.f32 %v1267_v11, %v1860_v1  ;;  %v961_v22 = vmax.f32 %v833_v13, 0.0  ;;  %v835_v24 = vadd.f32 %v1519_v63, %v451_v15  ;;  %v1786_v63 = vld [vmem:[%s2901_s3 + $0xb8] sm:$0xff]   ;;  %v1787_v15 = vld [vmem:[%s2901_s3 + $0xc0] sm:$0xff]  }
  0x3b   :  { %1088 = vst [vmem:[%s2902_s4 + $0x108] sm:$0xff] %v960_v12  ;;  %v962_v23 = vmax.f32 %v834_v14, 0.0  ;;  %v1524_v25 = vunpack.c.h.bf16 %v1782_v6  ;;  %v319_v28 = vmul.f32 %v1268_v20, %v1860_v1  ;;  %v1271_v29 = vunpack.c.l.bf16 %v1720_v16 }
  0x3c   :  { %v836_v26 = vadd.f32 %v1520_v10, %v452_v17  ;;  %v453_v27 = vadd.f32 %v1874_v7, %v318_v18  ;;  %1089 = vst [vmem:[%s2902_s4 + $0x110] sm:$0xff] %v961_v22  ;;  %v963_v32 = vmax.f32 %v835_v24, 0.0  ;;  %v1527_v33 = vunpack.c.l.bf16 %v1783_v21  ;;  %v1724_v10 = vld [vmem:[%s2898_s0 + $0xc0] sm:$0xff]   ;;  %v1725_v24 = vld [vmem:[%s2898_s0 + $0xc8] sm:$0xff]  }
  0x3d   :  { %1090 = vst [vmem:[%s2902_s4 + $0x118] sm:$0xff] %v962_v23  ;;  %v1272_v34 = vunpack.c.h.bf16 %v1720_v16  ;;  %v1528_v35 = vunpack.c.h.bf16 %v1783_v21  ;;  %v454_v38 = vadd.f32 %v1874_v7, %v319_v28  ;;  %v320_v39 = vmul.f32 %v1271_v29, %v1860_v1 }
  0x3e   :  { %v964_v36 = vmax.f32 %v836_v26, 0.0  ;;  %v837_v37 = vadd.f32 %v1523_v19, %v453_v27  ;;  %1091 = vst [vmem:[%s2902_s4 + $0x120] sm:$0xff] %v963_v32  ;;  %v1275_v42 = vunpack.c.l.bf16 %v1721_v30  ;;  %v1531_v43 = vunpack.c.l.bf16 %v1784_v31 }
  0x3f   :  { %v321_v41 = vmul.f32 %v1272_v34, %v1860_v1  ;;  %v1276_v44 = vunpack.c.h.bf16 %v1721_v30  ;;  %v838_v47 = vadd.f32 %v1524_v25, %v454_v38  ;;  %v455_v48 = vadd.f32 %v1874_v7, %v320_v39  ;;  %v1788_v25 = vld [vmem:[%s2901_s3 + $0xc8] sm:$0xff]   ;;  %v1726_v34 = vld [vmem:[%s2898_s0 + $0xd0] sm:$0xff]  }
  0x40   :  { %1092 = vst [vmem:[%s2902_s4 + $0x128] sm:$0xff] %v964_v36  ;;  %v965_v46 = vmax.f32 %v837_v37, 0.0  ;;  %v1532_v49 = vunpack.c.h.bf16 %v1784_v31  ;;  %v322_v51 = vmul.f32 %v1275_v42, %v1860_v1  ;;  %v1279_v53 = vunpack.c.l.bf16 %v1722_v40  ;;  %v1789_v39 = vld [vmem:[%s2901_s3 + $0xd0] sm:$0xff]  }
  0x41   :  { %v456_v50 = vadd.f32 %v1874_v7, %v321_v41  ;;  %v323_v52 = vmul.f32 %v1276_v44, %v1860_v1  ;;  %v966_v55 = vmax.f32 %v838_v47, 0.0  ;;  %v839_v56 = vadd.f32 %v1527_v33, %v455_v48  ;;  %v1727_v48 = vld [vmem:[%s2898_s0 + $0xd8] sm:$0xff]  }
  0x42   :  { %1093 = vst [vmem:[%s2902_s4 + $0x130] sm:$0xff] %v965_v46  ;;  %v1535_v57 = vunpack.c.l.bf16 %v1785_v45  ;;  %v1280_v58 = vunpack.c.h.bf16 %v1722_v40  ;;  %v457_v60 = vadd.f32 %v1874_v7, %v322_v51  ;;  %v324_v62 = vmul.f32 %v1279_v53, %v1860_v1 }
  0x43   :  { %v840_v59 = vadd.f32 %v1528_v35, %v456_v50  ;;  %v458_v61 = vadd.f32 %v1874_v7, %v323_v52  ;;  %1094 = vst [vmem:[%s2902_s4 + $0x138] sm:$0xff] %v966_v55  ;;  %v967_v0 = vmax.f32 %v839_v56, 0.0  ;;  %v1536_v3 = vunpack.c.h.bf16 %v1785_v45 }
  0x44   :  { %v325_v2 = vmul.f32 %v1280_v58, %v1860_v1  ;;  %v1283_v4 = vunpack.c.l.bf16 %v1723_v54  ;;  %v841_v6 = vadd.f32 %v1531_v43, %v457_v60  ;;  %v459_v9 = vadd.f32 %v1874_v7, %v324_v62 }
  0x45   :  { %v968_v5 = vmax.f32 %v840_v59, 0.0  ;;  %v842_v8 = vadd.f32 %v1532_v49, %v458_v61  ;;  %1095 = vst [vmem:[%s2902_s4 + $0x140] sm:$0xff] %v967_v0  ;;  %v1539_v13 = vunpack.c.l.bf16 %v1786_v63  ;;  %v1284_v14 = vunpack.c.h.bf16 %v1723_v54 }
  0x46   :  { %v460_v11 = vadd.f32 %v1874_v7, %v325_v2  ;;  %v326_v12 = vmul.f32 %v1283_v4, %v1860_v1  ;;  %v969_v16 = vmax.f32 %v841_v6, 0.0  ;;  %v843_v18 = vadd.f32 %v1535_v57, %v459_v9  ;;  %v1790_v57 = vld [vmem:[%s2901_s3 + $0xd8] sm:$0xff]   ;;  %v1791_v9 = vld [vmem:[%s2901_s3 + $0xe0] sm:$0xff]  }
  0x47   :  { %1096 = vst [vmem:[%s2902_s4 + $0x148] sm:$0xff] %v968_v5  ;;  %v970_v17 = vmax.f32 %v842_v8, 0.0  ;;  %v1540_v19 = vunpack.c.h.bf16 %v1786_v63  ;;  %v327_v22 = vmul.f32 %v1284_v14, %v1860_v1  ;;  %v1287_v23 = vunpack.c.l.bf16 %v1724_v10 }
  0x48   :  { %v844_v20 = vadd.f32 %v1536_v3, %v460_v11  ;;  %v461_v21 = vadd.f32 %v1874_v7, %v326_v12  ;;  %1097 = vst [vmem:[%s2902_s4 + $0x150] sm:$0xff] %v969_v16  ;;  %v971_v26 = vmax.f32 %v843_v18, 0.0  ;;  %v1543_v27 = vunpack.c.l.bf16 %v1787_v15  ;;  %v1728_v3 = vld [vmem:[%s2898_s0 + $0xe0] sm:$0xff]   ;;  %v1729_v18 = vld [vmem:[%s2898_s0 + $0xe8] sm:$0xff]  }
  0x49   :  { %1098 = vst [vmem:[%s2902_s4 + $0x158] sm:$0xff] %v970_v17  ;;  %v1288_v28 = vunpack.c.h.bf16 %v1724_v10  ;;  %v1544_v29 = vunpack.c.h.bf16 %v1787_v15  ;;  %v462_v32 = vadd.f32 %v1874_v7, %v327_v22  ;;  %v328_v33 = vmul.f32 %v1287_v23, %v1860_v1 }
  0x4a   :  { %v972_v30 = vmax.f32 %v844_v20, 0.0  ;;  %v845_v31 = vadd.f32 %v1539_v13, %v461_v21  ;;  %1099 = vst [vmem:[%s2902_s4 + $0x160] sm:$0xff] %v971_v26  ;;  %v1291_v36 = vunpack.c.l.bf16 %v1725_v24  ;;  %v1547_v37 = vunpack.c.l.bf16 %v1788_v25 }
  0x4b   :  { %v329_v35 = vmul.f32 %v1288_v28, %v1860_v1  ;;  %v1292_v38 = vunpack.c.h.bf16 %v1725_v24  ;;  %v846_v41 = vadd.f32 %v1540_v19, %v462_v32  ;;  %v463_v42 = vadd.f32 %v1874_v7, %v328_v33  ;;  %v1792_v19 = vld [vmem:[%s2901_s3 + $0xe8] sm:$0xff]   ;;  %v1730_v28 = vld [vmem:[%s2898_s0 + $0xf0] sm:$0xff]  }
  0x4c   :  { %1100 = vst [vmem:[%s2902_s4 + $0x168] sm:$0xff] %v972_v30  ;;  %v973_v40 = vmax.f32 %v845_v31, 0.0  ;;  %v1548_v43 = vunpack.c.h.bf16 %v1788_v25  ;;  %v330_v45 = vmul.f32 %v1291_v36, %v1860_v1  ;;  %v1295_v47 = vunpack.c.l.bf16 %v1726_v34  ;;  %v1793_v33 = vld [vmem:[%s2901_s3 + $0xf0] sm:$0xff]  }
  0x4d   :  { %v464_v44 = vadd.f32 %v1874_v7, %v329_v35  ;;  %v331_v46 = vmul.f32 %v1292_v38, %v1860_v1  ;;  %v974_v49 = vmax.f32 %v846_v41, 0.0  ;;  %v847_v50 = vadd.f32 %v1543_v27, %v463_v42  ;;  %v1731_v42 = vld [vmem:[%s2898_s0 + $0xf8] sm:$0xff]  }
  0x4e   :  { %1101 = vst [vmem:[%s2902_s4 + $0x170] sm:$0xff] %v973_v40  ;;  %v1551_v51 = vunpack.c.l.bf16 %v1789_v39  ;;  %v1296_v52 = vunpack.c.h.bf16 %v1726_v34  ;;  %v465_v54 = vadd.f32 %v1874_v7, %v330_v45  ;;  %v332_v56 = vmul.f32 %v1295_v47, %v1860_v1 }
  0x4f   :  { %v848_v53 = vadd.f32 %v1544_v29, %v464_v44  ;;  %v466_v55 = vadd.f32 %v1874_v7, %v331_v46  ;;  %1102 = vst [vmem:[%s2902_s4 + $0x178] sm:$0xff] %v974_v49  ;;  %v975_v58 = vmax.f32 %v847_v50, 0.0  ;;  %v1552_v60 = vunpack.c.h.bf16 %v1789_v39 }
  0x50   :  { %v333_v59 = vmul.f32 %v1296_v52, %v1860_v1  ;;  %v1299_v61 = vunpack.c.l.bf16 %v1727_v48  ;;  %v849_v63 = vadd.f32 %v1547_v37, %v465_v54  ;;  %v467_v2 = vadd.f32 %v1874_v7, %v332_v56 }
  0x51   :  { %v976_v62 = vmax.f32 %v848_v53, 0.0  ;;  %v850_v0 = vadd.f32 %v1548_v43, %v466_v55  ;;  %1103 = vst [vmem:[%s2902_s4 + $0x180] sm:$0xff] %v975_v58  ;;  %v1555_v6 = vunpack.c.l.bf16 %v1790_v57  ;;  %v1300_v8 = vunpack.c.h.bf16 %v1727_v48 }
  0x52   :  { %v468_v4 = vadd.f32 %v1874_v7, %v333_v59  ;;  %v334_v5 = vmul.f32 %v1299_v61, %v1860_v1  ;;  %v977_v10 = vmax.f32 %v849_v63, 0.0  ;;  %v851_v12 = vadd.f32 %v1551_v51, %v467_v2  ;;  %v1794_v51 = vld [vmem:[%s2901_s3 + $0xf8] sm:$0xff]   ;;  %v1795_v2 = vld [vmem:[%s2901_s3 + $0x100] sm:$0xff]  }
  0x53   :  { %1104 = vst [vmem:[%s2902_s4 + $0x188] sm:$0xff] %v976_v62  ;;  %v978_v11 = vmax.f32 %v850_v0, 0.0  ;;  %v1556_v13 = vunpack.c.h.bf16 %v1790_v57  ;;  %v335_v16 = vmul.f32 %v1300_v8, %v1860_v1  ;;  %v1303_v17 = vunpack.c.l.bf16 %v1728_v3 }
  0x54   :  { %v852_v14 = vadd.f32 %v1552_v60, %v468_v4  ;;  %v469_v15 = vadd.f32 %v1874_v7, %v334_v5  ;;  %1105 = vst [vmem:[%s2902_s4 + $0x190] sm:$0xff] %v977_v10  ;;  %v979_v20 = vmax.f32 %v851_v12, 0.0  ;;  %v1559_v21 = vunpack.c.l.bf16 %v1791_v9  ;;  %v1732_v60 = vld [vmem:[%s2898_s0 + $0x100] sm:$0xff]   ;;  %v1733_v12 = vld [vmem:[%s2898_s0 + $0x108] sm:$0xff]  }
  0x55   :  { %1106 = vst [vmem:[%s2902_s4 + $0x198] sm:$0xff] %v978_v11  ;;  %v1304_v22 = vunpack.c.h.bf16 %v1728_v3  ;;  %v1560_v23 = vunpack.c.h.bf16 %v1791_v9  ;;  %v470_v26 = vadd.f32 %v1874_v7, %v335_v16  ;;  %v336_v27 = vmul.f32 %v1303_v17, %v1860_v1 }
  0x56   :  { %v980_v24 = vmax.f32 %v852_v14, 0.0  ;;  %v853_v25 = vadd.f32 %v1555_v6, %v469_v15  ;;  %1107 = vst [vmem:[%s2902_s4 + $0x1a0] sm:$0xff] %v979_v20  ;;  %v1307_v30 = vunpack.c.l.bf16 %v1729_v18  ;;  %v1563_v31 = vunpack.c.l.bf16 %v1792_v19  ;;  %v2379_v20 = vld [vmem:[%s2899_s1] ss:$0 sm:$0xff] }
  0x57   :  { %v337_v29 = vmul.f32 %v1304_v22, %v1860_v1  ;;  %v1308_v32 = vunpack.c.h.bf16 %v1729_v18  ;;  %v854_v35 = vadd.f32 %v1556_v13, %v470_v26  ;;  %v471_v36 = vadd.f32 %v1874_v7, %v336_v27  ;;  %v1796_v13 = vld [vmem:[%s2901_s3 + $0x108] sm:$0xff]   ;;  %v1734_v22 = vld [vmem:[%s2898_s0 + $0x110] sm:$0xff]  }
  0x58   :  { %1108 = vst [vmem:[%s2902_s4 + $0x1a8] sm:$0xff] %v980_v24  ;;  %v981_v34 = vmax.f32 %v853_v25, 0.0  ;;  %v1564_v37 = vunpack.c.h.bf16 %v1792_v19  ;;  %v338_v39 = vmul.f32 %v1307_v30, %v1860_v1  ;;  %v1311_v41 = vunpack.c.l.bf16 %v1730_v28  ;;  %v1797_v26 = vld [vmem:[%s2901_s3 + $0x110] sm:$0xff]  }
  0x59   :  { %v472_v38 = vadd.f32 %v1874_v7, %v337_v29  ;;  %v339_v40 = vmul.f32 %v1308_v32, %v1860_v1  ;;  %v982_v43 = vmax.f32 %v854_v35, 0.0  ;;  %v855_v44 = vadd.f32 %v1559_v21, %v471_v36  ;;  %v2398_v29 = vld [vmem:[%s2900_s2] ss:$0 sm:$0xff]  ;;  %v1735_v36 = vld [vmem:[%s2898_s0 + $0x118] sm:$0xff]  }
  0x5a   :  { %1109 = vst [vmem:[%s2902_s4 + $0x1b0] sm:$0xff] %v981_v34  ;;  %v1567_v45 = vunpack.c.l.bf16 %v1793_v33  ;;  %v1312_v46 = vunpack.c.h.bf16 %v1730_v28  ;;  %v473_v48 = vadd.f32 %v1874_v7, %v338_v39  ;;  %v340_v50 = vmul.f32 %v1311_v41, %v1860_v1 }
  0x5b   :  { %v856_v47 = vadd.f32 %v1560_v23, %v472_v38  ;;  %v474_v49 = vadd.f32 %v1874_v7, %v339_v40  ;;  %1110 = vst [vmem:[%s2902_s4 + $0x1b8] sm:$0xff] %v982_v43  ;;  %v983_v52 = vmax.f32 %v855_v44, 0.0  ;;  %v1568_v54 = vunpack.c.h.bf16 %v1793_v33 }
  0x5c   :  { %v341_v53 = vmul.f32 %v1312_v46, %v1860_v1  ;;  %v1315_v55 = vunpack.c.l.bf16 %v1731_v42  ;;  %v857_v57 = vadd.f32 %v1563_v31, %v473_v48  ;;  %v475_v59 = vadd.f32 %v1874_v7, %v340_v50 }
  0x5d   :  { %v984_v56 = vmax.f32 %v856_v47, 0.0  ;;  %v858_v58 = vadd.f32 %v1564_v37, %v474_v49  ;;  %1111 = vst [vmem:[%s2902_s4 + $0x1c0] sm:$0xff] %v983_v52  ;;  %v1571_v63 = vunpack.c.l.bf16 %v1794_v51  ;;  %v1316_v0 = vunpack.c.h.bf16 %v1731_v42 }
  0x5e   :  { %v476_v61 = vadd.f32 %v1874_v7, %v341_v53  ;;  %v342_v62 = vmul.f32 %v1315_v55, %v1860_v1  ;;  %v985_v3 = vmax.f32 %v857_v57, 0.0  ;;  %v859_v5 = vadd.f32 %v1567_v45, %v475_v59  ;;  %v1798_v45 = vld [vmem:[%s2901_s3 + $0x118] sm:$0xff]   ;;  %v1799_v59 = vld [vmem:[%s2901_s3 + $0x120] sm:$0xff]  }
  0x5f   :  { %1112 = vst [vmem:[%s2902_s4 + $0x1c8] sm:$0xff] %v984_v56  ;;  %v986_v4 = vmax.f32 %v858_v58, 0.0  ;;  %v1572_v6 = vunpack.c.h.bf16 %v1794_v51  ;;  %v343_v10 = vmul.f32 %v1316_v0, %v1860_v1  ;;  %v1319_v11 = vunpack.c.l.bf16 %v1732_v60 }
  0x60   :  { %v860_v8 = vadd.f32 %v1568_v54, %v476_v61  ;;  %v477_v9 = vadd.f32 %v1874_v7, %v342_v62  ;;  %1113 = vst [vmem:[%s2902_s4 + $0x1d0] sm:$0xff] %v985_v3  ;;  %v987_v14 = vmax.f32 %v859_v5, 0.0  ;;  %v1575_v15 = vunpack.c.l.bf16 %v1795_v2  ;;  %v1736_v54 = vld [vmem:[%s2898_s0 + $0x120] sm:$0xff]   ;;  %v1737_v5 = vld [vmem:[%s2898_s0 + $0x128] sm:$0xff]  }
  0x61   :  { %1114 = vst [vmem:[%s2902_s4 + $0x1d8] sm:$0xff] %v986_v4  ;;  %v1320_v1 = vunpack.c.h.bf16 %v1732_v60  ;;  %v1576_v16 = vunpack.c.h.bf16 %v1795_v2  ;;  %v478_v19 = vadd.f32 %v1874_v7, %v343_v10  ;;  %v344_v21 = vmul.f32 %v2379_v20, %v1319_v11 }
  0x62   :  { %v988_v17 = vmax.f32 %v860_v8, 0.0  ;;  %v861_v18 = vadd.f32 %v1571_v63, %v477_v9  ;;  %1115 = vst [vmem:[%s2902_s4 + $0x1e0] sm:$0xff] %v987_v14  ;;  %v1323_v24 = vunpack.c.l.bf16 %v1733_v12  ;;  %v1579_v25 = vunpack.c.l.bf16 %v1796_v13 }
  0x63   :  { %v345_v23 = vmul.f32 %v2379_v20, %v1320_v1  ;;  %v1324_v7 = vunpack.c.h.bf16 %v1733_v12  ;;  %v862_v28 = vadd.f32 %v1572_v6, %v478_v19  ;;  %v479_v30 = vadd.f32 %v2398_v29, %v344_v21  ;;  %v1800_v6 = vld [vmem:[%s2901_s3 + $0x128] sm:$0xff]   ;;  %v1738_v1 = vld [vmem:[%s2898_s0 + $0x130] sm:$0xff]  }
  0x64   :  { %1116 = vst [vmem:[%s2902_s4 + $0x1e8] sm:$0xff] %v988_v17  ;;  %v989_v27 = vmax.f32 %v861_v18, 0.0  ;;  %v1580_v31 = vunpack.c.h.bf16 %v1796_v13  ;;  %v346_v33 = vmul.f32 %v2379_v20, %v1323_v24  ;;  %v1327_v35 = vunpack.c.l.bf16 %v1734_v22  ;;  %v1801_v21 = vld [vmem:[%s2901_s3 + $0x130] sm:$0xff]  }
  0x65   :  { %v480_v32 = vadd.f32 %v2398_v29, %v345_v23  ;;  %v347_v34 = vmul.f32 %v2379_v20, %v1324_v7  ;;  %v990_v37 = vmax.f32 %v862_v28, 0.0  ;;  %v863_v38 = vadd.f32 %v1575_v15, %v479_v30  ;;  %v1739_v30 = vld [vmem:[%s2898_s0 + $0x138] sm:$0xff]  }
  0x66   :  { %1117 = vst [vmem:[%s2902_s4 + $0x1f0] sm:$0xff] %v989_v27  ;;  %v1583_v39 = vunpack.c.l.bf16 %v1797_v26  ;;  %v1328_v40 = vunpack.c.h.bf16 %v1734_v22  ;;  %v481_v42 = vadd.f32 %v2398_v29, %v346_v33  ;;  %v348_v44 = vmul.f32 %v2379_v20, %v1327_v35 }
  0x67   :  { %v864_v41 = vadd.f32 %v1576_v16, %v480_v32  ;;  %v482_v43 = vadd.f32 %v2398_v29, %v347_v34  ;;  %1118 = vst [vmem:[%s2902_s4 + $0x1f8] sm:$0xff] %v990_v37  ;;  %v991_v46 = vmax.f32 %v863_v38, 0.0  ;;  %v1584_v48 = vunpack.c.h.bf16 %v1797_v26 }
  0x68   :  { %v349_v47 = vmul.f32 %v2379_v20, %v1328_v40  ;;  %v1331_v49 = vunpack.c.l.bf16 %v1735_v36  ;;  %v865_v51 = vadd.f32 %v1579_v25, %v481_v42  ;;  %v483_v53 = vadd.f32 %v2398_v29, %v348_v44 }
  0x69   :  { %v992_v50 = vmax.f32 %v864_v41, 0.0  ;;  %v866_v52 = vadd.f32 %v1580_v31, %v482_v43  ;;  %1119 = vst [vmem:[%s2902_s4 + $0x200] sm:$0xff] %v991_v46  ;;  %v1587_v57 = vunpack.c.l.bf16 %v1798_v45  ;;  %v1332_v58 = vunpack.c.h.bf16 %v1735_v36 }
  0x6a   :  { %v484_v55 = vadd.f32 %v2398_v29, %v349_v47  ;;  %v350_v56 = vmul.f32 %v2379_v20, %v1331_v49  ;;  %v993_v60 = vmax.f32 %v865_v51, 0.0  ;;  %v867_v62 = vadd.f32 %v1583_v39, %v483_v53  ;;  %v1802_v39 = vld [vmem:[%s2901_s3 + $0x138] sm:$0xff]   ;;  %v1803_v53 = vld [vmem:[%s2901_s3 + $0x140] sm:$0xff]  }
  0x6b   :  { %1120 = vst [vmem:[%s2902_s4 + $0x208] sm:$0xff] %v992_v50  ;;  %v994_v61 = vmax.f32 %v866_v52, 0.0  ;;  %v1588_v63 = vunpack.c.h.bf16 %v1798_v45  ;;  %v351_v3 = vmul.f32 %v2379_v20, %v1332_v58  ;;  %v1335_v4 = vunpack.c.l.bf16 %v1736_v54 }
  0x6c   :  { %v868_v0 = vadd.f32 %v1584_v48, %v484_v55  ;;  %v485_v2 = vadd.f32 %v2398_v29, %v350_v56  ;;  %1121 = vst [vmem:[%s2902_s4 + $0x210] sm:$0xff] %v993_v60  ;;  %v995_v8 = vmax.f32 %v867_v62, 0.0  ;;  %v1591_v9 = vunpack.c.l.bf16 %v1799_v59  ;;  %v1740_v48 = vld [vmem:[%s2898_s0 + $0x140] sm:$0xff]   ;;  %v1741_v62 = vld [vmem:[%s2898_s0 + $0x148] sm:$0xff]  }
  0x6d   :  { %1122 = vst [vmem:[%s2902_s4 + $0x218] sm:$0xff] %v994_v61  ;;  %v1336_v10 = vunpack.c.h.bf16 %v1736_v54  ;;  %v1592_v11 = vunpack.c.h.bf16 %v1799_v59  ;;  %v486_v14 = vadd.f32 %v2398_v29, %v351_v3  ;;  %v352_v15 = vmul.f32 %v2379_v20, %v1335_v4 }
  0x6e   :  { %v996_v12 = vmax.f32 %v868_v0, 0.0  ;;  %v869_v13 = vadd.f32 %v1587_v57, %v485_v2  ;;  %1123 = vst [vmem:[%s2902_s4 + $0x220] sm:$0xff] %v995_v8  ;;  %v1339_v17 = vunpack.c.l.bf16 %v1737_v5  ;;  %v1595_v18 = vunpack.c.l.bf16 %v1800_v6 }
  0x6f   :  { %v353_v16 = vmul.f32 %v2379_v20, %v1336_v10  ;;  %v1340_v19 = vunpack.c.h.bf16 %v1737_v5  ;;  %v870_v23 = vadd.f32 %v1588_v63, %v486_v14  ;;  %v487_v24 = vadd.f32 %v2398_v29, %v352_v15  ;;  %v1804_v63 = vld [vmem:[%s2901_s3 + $0x148] sm:$0xff]   ;;  %v1742_v10 = vld [vmem:[%s2898_s0 + $0x150] sm:$0xff]  }
  0x70   :  { %1124 = vst [vmem:[%s2902_s4 + $0x228] sm:$0xff] %v996_v12  ;;  %v997_v22 = vmax.f32 %v869_v13, 0.0  ;;  %v1596_v25 = vunpack.c.h.bf16 %v1800_v6  ;;  %v354_v26 = vmul.f32 %v2379_v20, %v1339_v17  ;;  %v1343_v28 = vunpack.c.l.bf16 %v1738_v1  ;;  %v1805_v15 = vld [vmem:[%s2901_s3 + $0x150] sm:$0xff]  }
  0x71   :  { %v488_v7 = vadd.f32 %v2398_v29, %v353_v16  ;;  %v355_v27 = vmul.f32 %v2379_v20, %v1340_v19  ;;  %v998_v31 = vmax.f32 %v870_v23, 0.0  ;;  %v871_v32 = vadd.f32 %v1591_v9, %v487_v24  ;;  %v1743_v24 = vld [vmem:[%s2898_s0 + $0x158] sm:$0xff]  }
  0x72   :  { %1125 = vst [vmem:[%s2902_s4 + $0x230] sm:$0xff] %v997_v22  ;;  %v1599_v33 = vunpack.c.l.bf16 %v1801_v21  ;;  %v1344_v34 = vunpack.c.h.bf16 %v1738_v1  ;;  %v489_v36 = vadd.f32 %v2398_v29, %v354_v26  ;;  %v356_v38 = vmul.f32 %v2379_v20, %v1343_v28 }
  0x73   :  { %v872_v35 = vadd.f32 %v1592_v11, %v488_v7  ;;  %v490_v37 = vadd.f32 %v2398_v29, %v355_v27  ;;  %1126 = vst [vmem:[%s2902_s4 + $0x238] sm:$0xff] %v998_v31  ;;  %v999_v40 = vmax.f32 %v871_v32, 0.0  ;;  %v1600_v42 = vunpack.c.h.bf16 %v1801_v21 }
  0x74   :  { %v357_v41 = vmul.f32 %v2379_v20, %v1344_v34  ;;  %v1347_v43 = vunpack.c.l.bf16 %v1739_v30  ;;  %v873_v45 = vadd.f32 %v1595_v18, %v489_v36  ;;  %v491_v47 = vadd.f32 %v2398_v29, %v356_v38 }
  0x75   :  { %v1000_v44 = vmax.f32 %v872_v35, 0.0  ;;  %v874_v46 = vadd.f32 %v1596_v25, %v490_v37  ;;  %1127 = vst [vmem:[%s2902_s4 + $0x240] sm:$0xff] %v999_v40  ;;  %v1603_v51 = vunpack.c.l.bf16 %v1802_v39  ;;  %v1348_v52 = vunpack.c.h.bf16 %v1739_v30 }
  0x76   :  { %v492_v49 = vadd.f32 %v2398_v29, %v357_v41  ;;  %v358_v50 = vmul.f32 %v2379_v20, %v1347_v43  ;;  %v1001_v54 = vmax.f32 %v873_v45, 0.0  ;;  %v875_v56 = vadd.f32 %v1599_v33, %v491_v47  ;;  %v1806_v33 = vld [vmem:[%s2901_s3 + $0x158] sm:$0xff]   ;;  %v1807_v47 = vld [vmem:[%s2901_s3 + $0x160] sm:$0xff]  }
  0x77   :  { %1128 = vst [vmem:[%s2902_s4 + $0x248] sm:$0xff] %v1000_v44  ;;  %v1002_v55 = vmax.f32 %v874_v46, 0.0  ;;  %v1604_v57 = vunpack.c.h.bf16 %v1802_v39  ;;  %v359_v60 = vmul.f32 %v2379_v20, %v1348_v52  ;;  %v1351_v61 = vunpack.c.l.bf16 %v1740_v48 }
  0x78   :  { %v876_v58 = vadd.f32 %v1600_v42, %v492_v49  ;;  %v493_v59 = vadd.f32 %v2398_v29, %v358_v50  ;;  %1129 = vst [vmem:[%s2902_s4 + $0x250] sm:$0xff] %v1001_v54  ;;  %v1003_v0 = vmax.f32 %v875_v56, 0.0  ;;  %v1607_v2 = vunpack.c.l.bf16 %v1803_v53  ;;  %v1744_v42 = vld [vmem:[%s2898_s0 + $0x160] sm:$0xff]   ;;  %v1745_v56 = vld [vmem:[%s2898_s0 + $0x168] sm:$0xff]  }
  0x79   :  { %1130 = vst [vmem:[%s2902_s4 + $0x258] sm:$0xff] %v1002_v55  ;;  %v1352_v3 = vunpack.c.h.bf16 %v1740_v48  ;;  %v1608_v4 = vunpack.c.h.bf16 %v1803_v53  ;;  %v494_v8 = vadd.f32 %v2398_v29, %v359_v60  ;;  %v360_v9 = vmul.f32 %v2379_v20, %v1351_v61 }
  0x7a   :  { %v1004_v5 = vmax.f32 %v876_v58, 0.0  ;;  %v877_v6 = vadd.f32 %v1603_v51, %v493_v59  ;;  %1131 = vst [vmem:[%s2902_s4 + $0x260] sm:$0xff] %v1003_v0  ;;  %v1355_v12 = vunpack.c.l.bf16 %v1741_v62  ;;  %v1611_v13 = vunpack.c.l.bf16 %v1804_v63 }
  0x7b   :  { %v361_v11 = vmul.f32 %v2379_v20, %v1352_v3  ;;  %v1356_v14 = vunpack.c.h.bf16 %v1741_v62  ;;  %v878_v16 = vadd.f32 %v1604_v57, %v494_v8  ;;  %v495_v17 = vadd.f32 %v2398_v29, %v360_v9  ;;  %v1808_v57 = vld [vmem:[%s2901_s3 + $0x168] sm:$0xff]   ;;  %v1746_v3 = vld [vmem:[%s2898_s0 + $0x170] sm:$0xff]  }
  0x7c   :  { %1132 = vst [vmem:[%s2902_s4 + $0x268] sm:$0xff] %v1004_v5  ;;  %v1005_v1 = vmax.f32 %v877_v6, 0.0  ;;  %v1612_v18 = vunpack.c.h.bf16 %v1804_v63  ;;  %v362_v21 = vmul.f32 %v2379_v20, %v1355_v12  ;;  %v1359_v23 = vunpack.c.l.bf16 %v1742_v10  ;;  %v1809_v9 = vld [vmem:[%s2901_s3 + $0x170] sm:$0xff]  }
  0x7d   :  { %v496_v19 = vadd.f32 %v2398_v29, %v361_v11  ;;  %v363_v22 = vmul.f32 %v2379_v20, %v1356_v14  ;;  %v1006_v25 = vmax.f32 %v878_v16, 0.0  ;;  %v879_v7 = vadd.f32 %v1607_v2, %v495_v17  ;;  %v1747_v17 = vld [vmem:[%s2898_s0 + $0x178] sm:$0xff]  }
  0x7e   :  { %1133 = vst [vmem:[%s2902_s4 + $0x270] sm:$0xff] %v1005_v1  ;;  %v1615_v26 = vunpack.c.l.bf16 %v1805_v15  ;;  %v1360_v27 = vunpack.c.h.bf16 %v1742_v10  ;;  %v497_v30 = vadd.f32 %v2398_v29, %v362_v21  ;;  %v364_v32 = vmul.f32 %v2379_v20, %v1359_v23 }
  0x7f   :  { %v880_v28 = vadd.f32 %v1608_v4, %v496_v19  ;;  %v498_v31 = vadd.f32 %v2398_v29, %v363_v22  ;;  %1134 = vst [vmem:[%s2902_s4 + $0x278] sm:$0xff] %v1006_v25  ;;  %v1007_v34 = vmax.f32 %v879_v7, 0.0  ;;  %v1616_v36 = vunpack.c.h.bf16 %v1805_v15 }
  0x80   :  { %v365_v35 = vmul.f32 %v2379_v20, %v1360_v27  ;;  %v1363_v37 = vunpack.c.l.bf16 %v1743_v24  ;;  %v881_v39 = vadd.f32 %v1611_v13, %v497_v30  ;;  %v499_v41 = vadd.f32 %v2398_v29, %v364_v32 }
  0x81   :  { %v1008_v38 = vmax.f32 %v880_v28, 0.0  ;;  %v882_v40 = vadd.f32 %v1612_v18, %v498_v31  ;;  %1135 = vst [vmem:[%s2902_s4 + $0x280] sm:$0xff] %v1007_v34  ;;  %v1619_v45 = vunpack.c.l.bf16 %v1806_v33  ;;  %v1364_v46 = vunpack.c.h.bf16 %v1743_v24 }
  0x82   :  { %v500_v43 = vadd.f32 %v2398_v29, %v365_v35  ;;  %v366_v44 = vmul.f32 %v2379_v20, %v1363_v37  ;;  %v1009_v48 = vmax.f32 %v881_v39, 0.0  ;;  %v883_v50 = vadd.f32 %v1615_v26, %v499_v41  ;;  %v1810_v26 = vld [vmem:[%s2901_s3 + $0x178] sm:$0xff]   ;;  %v1811_v41 = vld [vmem:[%s2901_s3 + $0x180] sm:$0xff]  }
  0x83   :  { %1136 = vst [vmem:[%s2902_s4 + $0x288] sm:$0xff] %v1008_v38  ;;  %v1010_v49 = vmax.f32 %v882_v40, 0.0  ;;  %v1620_v51 = vunpack.c.h.bf16 %v1806_v33  ;;  %v367_v54 = vmul.f32 %v2379_v20, %v1364_v46  ;;  %v1367_v55 = vunpack.c.l.bf16 %v1744_v42 }
  0x84   :  { %v884_v52 = vadd.f32 %v1616_v36, %v500_v43  ;;  %v501_v53 = vadd.f32 %v2398_v29, %v366_v44  ;;  %1137 = vst [vmem:[%s2902_s4 + $0x290] sm:$0xff] %v1009_v48  ;;  %v1011_v58 = vmax.f32 %v883_v50, 0.0  ;;  %v1623_v59 = vunpack.c.l.bf16 %v1807_v47  ;;  %v1748_v36 = vld [vmem:[%s2898_s0 + $0x180] sm:$0xff]   ;;  %v1749_v50 = vld [vmem:[%s2898_s0 + $0x188] sm:$0xff]  }
  0x85   :  { %1138 = vst [vmem:[%s2902_s4 + $0x298] sm:$0xff] %v1010_v49  ;;  %v1368_v60 = vunpack.c.h.bf16 %v1744_v42  ;;  %v1624_v61 = vunpack.c.h.bf16 %v1807_v47  ;;  %v502_v0 = vadd.f32 %v2398_v29, %v367_v54  ;;  %v368_v2 = vmul.f32 %v2379_v20, %v1367_v55 }
  0x86   :  { %v1012_v62 = vmax.f32 %v884_v52, 0.0  ;;  %v885_v63 = vadd.f32 %v1619_v45, %v501_v53  ;;  %1139 = vst [vmem:[%s2902_s4 + $0x2a0] sm:$0xff] %v1011_v58  ;;  %v1371_v5 = vunpack.c.l.bf16 %v1745_v56  ;;  %v1627_v6 = vunpack.c.l.bf16 %v1808_v57 }
  0x87   :  { %v369_v4 = vmul.f32 %v2379_v20, %v1368_v60  ;;  %v1372_v8 = vunpack.c.h.bf16 %v1745_v56  ;;  %v886_v11 = vadd.f32 %v1620_v51, %v502_v0  ;;  %v503_v12 = vadd.f32 %v2398_v29, %v368_v2  ;;  %v1812_v51 = vld [vmem:[%s2901_s3 + $0x188] sm:$0xff]   ;;  %v1750_v60 = vld [vmem:[%s2898_s0 + $0x190] sm:$0xff]  }
  0x88   :  { %1140 = vst [vmem:[%s2902_s4 + $0x2a8] sm:$0xff] %v1012_v62  ;;  %v1013_v10 = vmax.f32 %v885_v63, 0.0  ;;  %v1628_v13 = vunpack.c.h.bf16 %v1808_v57  ;;  %v370_v15 = vmul.f32 %v2379_v20, %v1371_v5  ;;  %v1375_v16 = vunpack.c.l.bf16 %v1746_v3  ;;  %v1813_v2 = vld [vmem:[%s2901_s3 + $0x190] sm:$0xff]  }
  0x89   :  { %v504_v14 = vadd.f32 %v2398_v29, %v369_v4  ;;  %v371_v1 = vmul.f32 %v2379_v20, %v1372_v8  ;;  %v1014_v18 = vmax.f32 %v886_v11, 0.0  ;;  %v887_v19 = vadd.f32 %v1623_v59, %v503_v12  ;;  %v1751_v12 = vld [vmem:[%s2898_s0 + $0x198] sm:$0xff]  }
  0x8a   :  { %1141 = vst [vmem:[%s2902_s4 + $0x2b0] sm:$0xff] %v1013_v10  ;;  %v1631_v21 = vunpack.c.l.bf16 %v1809_v9  ;;  %v1376_v22 = vunpack.c.h.bf16 %v1746_v3  ;;  %v505_v24 = vadd.f32 %v2398_v29, %v370_v15  ;;  %v372_v7 = vmul.f32 %v2379_v20, %v1375_v16 }
  0x8b   :  { %v888_v23 = vadd.f32 %v1624_v61, %v504_v14  ;;  %v506_v25 = vadd.f32 %v2398_v29, %v371_v1  ;;  %1142 = vst [vmem:[%s2902_s4 + $0x2b8] sm:$0xff] %v1014_v18  ;;  %v1015_v27 = vmax.f32 %v887_v19, 0.0  ;;  %v1632_v30 = vunpack.c.h.bf16 %v1809_v9 }
  0x8c   :  { %v373_v28 = vmul.f32 %v2379_v20, %v1376_v22  ;;  %v1379_v31 = vunpack.c.l.bf16 %v1747_v17  ;;  %v889_v33 = vadd.f32 %v1627_v6, %v505_v24  ;;  %v507_v35 = vadd.f32 %v2398_v29, %v372_v7 }
  0x8d   :  { %v1016_v32 = vmax.f32 %v888_v23, 0.0  ;;  %v890_v34 = vadd.f32 %v1628_v13, %v506_v25  ;;  %1143 = vst [vmem:[%s2902_s4 + $0x2c0] sm:$0xff] %v1015_v27  ;;  %v1635_v39 = vunpack.c.l.bf16 %v1810_v26  ;;  %v1380_v40 = vunpack.c.h.bf16 %v1747_v17 }
  0x8e   :  { %v508_v37 = vadd.f32 %v2398_v29, %v373_v28  ;;  %v374_v38 = vmul.f32 %v2379_v20, %v1379_v31  ;;  %v1017_v42 = vmax.f32 %v889_v33, 0.0  ;;  %v891_v44 = vadd.f32 %v1631_v21, %v507_v35  ;;  %v1814_v21 = vld [vmem:[%s2901_s3 + $0x198] sm:$0xff]   ;;  %v1815_v35 = vld [vmem:[%s2901_s3 + $0x1a0] sm:$0xff]  }
  0x8f   :  { %1144 = vst [vmem:[%s2902_s4 + $0x2c8] sm:$0xff] %v1016_v32  ;;  %v1018_v43 = vmax.f32 %v890_v34, 0.0  ;;  %v1636_v45 = vunpack.c.h.bf16 %v1810_v26  ;;  %v375_v48 = vmul.f32 %v2379_v20, %v1380_v40  ;;  %v1383_v49 = vunpack.c.l.bf16 %v1748_v36 }
  0x90   :  { %v892_v46 = vadd.f32 %v1632_v30, %v508_v37  ;;  %v509_v47 = vadd.f32 %v2398_v29, %v374_v38  ;;  %1145 = vst [vmem:[%s2902_s4 + $0x2d0] sm:$0xff] %v1017_v42  ;;  %v1019_v52 = vmax.f32 %v891_v44, 0.0  ;;  %v1639_v53 = vunpack.c.l.bf16 %v1811_v41  ;;  %v1752_v30 = vld [vmem:[%s2898_s0 + $0x1a0] sm:$0xff]   ;;  %v1753_v44 = vld [vmem:[%s2898_s0 + $0x1a8] sm:$0xff]  }
  0x91   :  { %1146 = vst [vmem:[%s2902_s4 + $0x2d8] sm:$0xff] %v1018_v43  ;;  %v1384_v54 = vunpack.c.h.bf16 %v1748_v36  ;;  %v1640_v55 = vunpack.c.h.bf16 %v1811_v41  ;;  %v510_v58 = vadd.f32 %v2398_v29, %v375_v48  ;;  %v376_v59 = vmul.f32 %v2379_v20, %v1383_v49 }
  0x92   :  { %v1020_v56 = vmax.f32 %v892_v46, 0.0  ;;  %v893_v57 = vadd.f32 %v1635_v39, %v509_v47  ;;  %1147 = vst [vmem:[%s2902_s4 + $0x2e0] sm:$0xff] %v1019_v52  ;;  %v1387_v62 = vunpack.c.l.bf16 %v1749_v50  ;;  %v1643_v63 = vunpack.c.l.bf16 %v1812_v51 }
  0x93   :  { %v377_v61 = vmul.f32 %v2379_v20, %v1384_v54  ;;  %v1388_v0 = vunpack.c.h.bf16 %v1749_v50  ;;  %v894_v4 = vadd.f32 %v1636_v45, %v510_v58  ;;  %v511_v5 = vadd.f32 %v2398_v29, %v376_v59  ;;  %v1816_v45 = vld [vmem:[%s2901_s3 + $0x1a8] sm:$0xff]   ;;  %v1754_v54 = vld [vmem:[%s2898_s0 + $0x1b0] sm:$0xff]  }
  0x94   :  { %1148 = vst [vmem:[%s2902_s4 + $0x2e8] sm:$0xff] %v1020_v56  ;;  %v1021_v3 = vmax.f32 %v893_v57, 0.0  ;;  %v1644_v6 = vunpack.c.h.bf16 %v1812_v51  ;;  %v378_v9 = vmul.f32 %v2379_v20, %v1387_v62  ;;  %v1391_v11 = vunpack.c.l.bf16 %v1750_v60  ;;  %v1817_v59 = vld [vmem:[%s2901_s3 + $0x1b0] sm:$0xff]  }
  0x95   :  { %v512_v8 = vadd.f32 %v2398_v29, %v377_v61  ;;  %v379_v10 = vmul.f32 %v2379_v20, %v1388_v0  ;;  %v1022_v13 = vmax.f32 %v894_v4, 0.0  ;;  %v895_v14 = vadd.f32 %v1639_v53, %v511_v5  ;;  %v1755_v5 = vld [vmem:[%s2898_s0 + $0x1b8] sm:$0xff]  }
  0x96   :  { %1149 = vst [vmem:[%s2902_s4 + $0x2f0] sm:$0xff] %v1021_v3  ;;  %v1647_v15 = vunpack.c.l.bf16 %v1813_v2  ;;  %v1392_v1 = vunpack.c.h.bf16 %v1750_v60  ;;  %v513_v17 = vadd.f32 %v2398_v29, %v378_v9  ;;  %v380_v19 = vmul.f32 %v2379_v20, %v1391_v11 }
  0x97   :  { %v896_v16 = vadd.f32 %v1640_v55, %v512_v8  ;;  %v514_v18 = vadd.f32 %v2398_v29, %v379_v10  ;;  %1150 = vst [vmem:[%s2902_s4 + $0x2f8] sm:$0xff] %v1022_v13  ;;  %v1023_v22 = vmax.f32 %v895_v14, 0.0  ;;  %v1648_v24 = vunpack.c.h.bf16 %v1813_v2 }
  0x98   :  { %v381_v23 = vmul.f32 %v2379_v20, %v1392_v1  ;;  %v1395_v25 = vunpack.c.l.bf16 %v1751_v12  ;;  %v897_v26 = vadd.f32 %v1643_v63, %v513_v17  ;;  %v515_v28 = vadd.f32 %v2398_v29, %v380_v19 }
  0x99   :  { %v1024_v7 = vmax.f32 %v896_v16, 0.0  ;;  %v898_v27 = vadd.f32 %v1644_v6, %v514_v18  ;;  %1151 = vst [vmem:[%s2902_s4 + $0x300] sm:$0xff] %v1023_v22  ;;  %v1651_v33 = vunpack.c.l.bf16 %v1814_v21  ;;  %v1396_v34 = vunpack.c.h.bf16 %v1751_v12 }
  0x9a   :  { %v516_v31 = vadd.f32 %v2398_v29, %v381_v23  ;;  %v382_v32 = vmul.f32 %v2379_v20, %v1395_v25  ;;  %v1025_v36 = vmax.f32 %v897_v26, 0.0  ;;  %v899_v38 = vadd.f32 %v1647_v15, %v515_v28  ;;  %v1818_v15 = vld [vmem:[%s2901_s3 + $0x1b8] sm:$0xff]   ;;  %v1819_v28 = vld [vmem:[%s2901_s3 + $0x1c0] sm:$0xff]  }
  0x9b   :  { %1152 = vst [vmem:[%s2902_s4 + $0x308] sm:$0xff] %v1024_v7  ;;  %v1026_v37 = vmax.f32 %v898_v27, 0.0  ;;  %v1652_v39 = vunpack.c.h.bf16 %v1814_v21  ;;  %v383_v42 = vmul.f32 %v2379_v20, %v1396_v34  ;;  %v1399_v43 = vunpack.c.l.bf16 %v1752_v30 }
  0x9c   :  { %v900_v40 = vadd.f32 %v1648_v24, %v516_v31  ;;  %v517_v41 = vadd.f32 %v2398_v29, %v382_v32  ;;  %1153 = vst [vmem:[%s2902_s4 + $0x310] sm:$0xff] %v1025_v36  ;;  %v1027_v46 = vmax.f32 %v899_v38, 0.0  ;;  %v1655_v47 = vunpack.c.l.bf16 %v1815_v35  ;;  %v1756_v24 = vld [vmem:[%s2898_s0 + $0x1c0] sm:$0xff]   ;;  %v1757_v38 = vld [vmem:[%s2898_s0 + $0x1c8] sm:$0xff]  }
  0x9d   :  { %1154 = vst [vmem:[%s2902_s4 + $0x318] sm:$0xff] %v1026_v37  ;;  %v1400_v48 = vunpack.c.h.bf16 %v1752_v30  ;;  %v1656_v49 = vunpack.c.h.bf16 %v1815_v35  ;;  %v518_v52 = vadd.f32 %v2398_v29, %v383_v42  ;;  %v384_v53 = vmul.f32 %v2379_v20, %v1399_v43 }
  0x9e   :  { %v1028_v50 = vmax.f32 %v900_v40, 0.0  ;;  %v901_v51 = vadd.f32 %v1651_v33, %v517_v41  ;;  %1155 = vst [vmem:[%s2902_s4 + $0x320] sm:$0xff] %v1027_v46  ;;  %v1403_v56 = vunpack.c.l.bf16 %v1753_v44  ;;  %v1659_v57 = vunpack.c.l.bf16 %v1816_v45 }
  0x9f   :  { %v385_v55 = vmul.f32 %v2379_v20, %v1400_v48  ;;  %v1404_v58 = vunpack.c.h.bf16 %v1753_v44  ;;  %v902_v61 = vadd.f32 %v1652_v39, %v518_v52  ;;  %v519_v62 = vadd.f32 %v2398_v29, %v384_v53  ;;  %v1820_v39 = vld [vmem:[%s2901_s3 + $0x1c8] sm:$0xff]   ;;  %v1758_v48 = vld [vmem:[%s2898_s0 + $0x1d0] sm:$0xff]  }
  0xa0   :  { %1156 = vst [vmem:[%s2902_s4 + $0x328] sm:$0xff] %v1028_v50  ;;  %v1029_v60 = vmax.f32 %v901_v51, 0.0  ;;  %v1660_v63 = vunpack.c.h.bf16 %v1816_v45  ;;  %v386_v2 = vmul.f32 %v2379_v20, %v1403_v56  ;;  %v1407_v4 = vunpack.c.l.bf16 %v1754_v54  ;;  %v1821_v53 = vld [vmem:[%s2901_s3 + $0x1d0] sm:$0xff]  }
  0xa1   :  { %v520_v0 = vadd.f32 %v2398_v29, %v385_v55  ;;  %v387_v3 = vmul.f32 %v2379_v20, %v1404_v58  ;;  %v1030_v6 = vmax.f32 %v902_v61, 0.0  ;;  %v903_v8 = vadd.f32 %v1655_v47, %v519_v62  ;;  %v1759_v62 = vld [vmem:[%s2898_s0 + $0x1d8] sm:$0xff]  }
  0xa2   :  { %1157 = vst [vmem:[%s2902_s4 + $0x330] sm:$0xff] %v1029_v60  ;;  %v1663_v9 = vunpack.c.l.bf16 %v1817_v59  ;;  %v1408_v10 = vunpack.c.h.bf16 %v1754_v54  ;;  %v521_v12 = vadd.f32 %v2398_v29, %v386_v2  ;;  %v388_v14 = vmul.f32 %v2379_v20, %v1407_v4 }
  0xa3   :  { %v904_v11 = vadd.f32 %v1656_v49, %v520_v0  ;;  %v522_v13 = vadd.f32 %v2398_v29, %v387_v3  ;;  %1158 = vst [vmem:[%s2902_s4 + $0x338] sm:$0xff] %v1030_v6  ;;  %v1031_v1 = vmax.f32 %v903_v8, 0.0  ;;  %v1664_v17 = vunpack.c.h.bf16 %v1817_v59 }
  0xa4   :  { %v389_v16 = vmul.f32 %v2379_v20, %v1408_v10  ;;  %v1411_v18 = vunpack.c.l.bf16 %v1755_v5  ;;  %v905_v21 = vadd.f32 %v1659_v57, %v521_v12  ;;  %v523_v23 = vadd.f32 %v2398_v29, %v388_v14 }
  0xa5   :  { %v1032_v19 = vmax.f32 %v904_v11, 0.0  ;;  %v906_v22 = vadd.f32 %v1660_v63, %v522_v13  ;;  %1159 = vst [vmem:[%s2902_s4 + $0x340] sm:$0xff] %v1031_v1  ;;  %v1667_v26 = vunpack.c.l.bf16 %v1818_v15  ;;  %v1412_v27 = vunpack.c.h.bf16 %v1755_v5 }
  0xa6   :  { %v524_v25 = vadd.f32 %v2398_v29, %v389_v16  ;;  %v390_v7 = vmul.f32 %v2379_v20, %v1411_v18  ;;  %v1033_v30 = vmax.f32 %v905_v21, 0.0  ;;  %v907_v32 = vadd.f32 %v1663_v9, %v523_v23  ;;  %v1822_v9 = vld [vmem:[%s2901_s3 + $0x1d8] sm:$0xff]   ;;  %v1823_v23 = vld [vmem:[%s2901_s3 + $0x1e0] sm:$0xff]  }
  0xa7   :  { %1160 = vst [vmem:[%s2902_s4 + $0x348] sm:$0xff] %v1032_v19  ;;  %v1034_v31 = vmax.f32 %v906_v22, 0.0  ;;  %v1668_v33 = vunpack.c.h.bf16 %v1818_v15  ;;  %v391_v36 = vmul.f32 %v2379_v20, %v1412_v27  ;;  %v1415_v37 = vunpack.c.l.bf16 %v1756_v24 }
  0xa8   :  { %v908_v34 = vadd.f32 %v1664_v17, %v524_v25  ;;  %v525_v35 = vadd.f32 %v2398_v29, %v390_v7  ;;  %1161 = vst [vmem:[%s2902_s4 + $0x350] sm:$0xff] %v1033_v30  ;;  %v1035_v40 = vmax.f32 %v907_v32, 0.0  ;;  %v1671_v41 = vunpack.c.l.bf16 %v1819_v28  ;;  %v1760_v17 = vld [vmem:[%s2898_s0 + $0x1e0] sm:$0xff]   ;;  %v1761_v32 = vld [vmem:[%s2898_s0 + $0x1e8] sm:$0xff]  }
  0xa9   :  { %1162 = vst [vmem:[%s2902_s4 + $0x358] sm:$0xff] %v1034_v31  ;;  %v1416_v42 = vunpack.c.h.bf16 %v1756_v24  ;;  %v1672_v43 = vunpack.c.h.bf16 %v1819_v28  ;;  %v526_v46 = vadd.f32 %v2398_v29, %v391_v36  ;;  %v392_v47 = vmul.f32 %v2379_v20, %v1415_v37 }
  0xaa   :  { %v1036_v44 = vmax.f32 %v908_v34, 0.0  ;;  %v909_v45 = vadd.f32 %v1667_v26, %v525_v35  ;;  %1163 = vst [vmem:[%s2902_s4 + $0x360] sm:$0xff] %v1035_v40  ;;  %v1419_v50 = vunpack.c.l.bf16 %v1757_v38  ;;  %v1675_v51 = vunpack.c.l.bf16 %v1820_v39 }
  0xab   :  { %v393_v49 = vmul.f32 %v2379_v20, %v1416_v42  ;;  %v1420_v52 = vunpack.c.h.bf16 %v1757_v38  ;;  %v910_v55 = vadd.f32 %v1668_v33, %v526_v46  ;;  %v527_v56 = vadd.f32 %v2398_v29, %v392_v47  ;;  %v1824_v33 = vld [vmem:[%s2901_s3 + $0x1e8] sm:$0xff]   ;;  %v1762_v42 = vld [vmem:[%s2898_s0 + $0x1f0] sm:$0xff]  }
  0xac   :  { %1164 = vst [vmem:[%s2902_s4 + $0x368] sm:$0xff] %v1036_v44  ;;  %v1037_v54 = vmax.f32 %v909_v45, 0.0  ;;  %v1676_v57 = vunpack.c.h.bf16 %v1820_v39  ;;  %v394_v59 = vmul.f32 %v2379_v20, %v1419_v50  ;;  %v1423_v61 = vunpack.c.l.bf16 %v1758_v48  ;;  %v1825_v47 = vld [vmem:[%s2901_s3 + $0x1f0] sm:$0xff]  }
  0xad   :  { %v528_v58 = vadd.f32 %v2398_v29, %v393_v49  ;;  %v395_v60 = vmul.f32 %v2379_v20, %v1420_v52  ;;  %v1038_v63 = vmax.f32 %v910_v55, 0.0  ;;  %v911_v0 = vadd.f32 %v1671_v41, %v527_v56  ;;  %v1763_v56 = vld [vmem:[%s2898_s0 + $0x1f8] sm:$0xff]  }
  0xae   :  { %1165 = vst [vmem:[%s2902_s4 + $0x370] sm:$0xff] %v1037_v54  ;;  %v1679_v2 = vunpack.c.l.bf16 %v1821_v53  ;;  %v1424_v3 = vunpack.c.h.bf16 %v1758_v48  ;;  %v529_v5 = vadd.f32 %v2398_v29, %v394_v59  ;;  %v396_v8 = vmul.f32 %v2379_v20, %v1423_v61 }
  0xaf   :  { %v912_v4 = vadd.f32 %v1672_v43, %v528_v58  ;;  %v530_v6 = vadd.f32 %v2398_v29, %v395_v60  ;;  %1166 = vst [vmem:[%s2902_s4 + $0x378] sm:$0xff] %v1038_v63  ;;  %v1039_v10 = vmax.f32 %v911_v0, 0.0  ;;  %v1680_v12 = vunpack.c.h.bf16 %v1821_v53 }
  0xb0   :  { %v397_v11 = vmul.f32 %v2379_v20, %v1424_v3  ;;  %v1427_v13 = vunpack.c.l.bf16 %v1759_v62  ;;  %v913_v15 = vadd.f32 %v1675_v51, %v529_v5  ;;  %v531_v16 = vadd.f32 %v2398_v29, %v396_v8 }
  0xb1   :  { %v1040_v14 = vmax.f32 %v912_v4, 0.0  ;;  %v914_v1 = vadd.f32 %v1676_v57, %v530_v6  ;;  %1167 = vst [vmem:[%s2902_s4 + $0x380] sm:$0xff] %v1039_v10  ;;  %v1683_v21 = vunpack.c.l.bf16 %v1822_v9  ;;  %v1428_v22 = vunpack.c.h.bf16 %v1759_v62 }
  0xb2   :  { %v532_v18 = vadd.f32 %v2398_v29, %v397_v11  ;;  %v398_v19 = vmul.f32 %v2379_v20, %v1427_v13  ;;  %v1041_v24 = vmax.f32 %v913_v15, 0.0  ;;  %v915_v7 = vadd.f32 %v1679_v2, %v531_v16  ;;  %v1826_v2 = vld [vmem:[%s2901_s3 + $0x1f8] sm:$0xff]  }
  0xb3   :  { %1168 = vst [vmem:[%s2902_s4 + $0x388] sm:$0xff] %v1040_v14  ;;  %v1042_v25 = vmax.f32 %v914_v1, 0.0  ;;  %v1684_v26 = vunpack.c.h.bf16 %v1822_v9  ;;  %v399_v30 = vmul.f32 %v2379_v20, %v1428_v22  ;;  %v1431_v31 = vunpack.c.l.bf16 %v1760_v17 }
  0xb4   :  { %v916_v27 = vadd.f32 %v1680_v12, %v532_v18  ;;  %v533_v28 = vadd.f32 %v2398_v29, %v398_v19  ;;  %1169 = vst [vmem:[%s2902_s4 + $0x390] sm:$0xff] %v1041_v24  ;;  %v1043_v34 = vmax.f32 %v915_v7, 0.0  ;;  %v1687_v35 = vunpack.c.l.bf16 %v1823_v23 }
  0xb5   :  { %1170 = vst [vmem:[%s2902_s4 + $0x398] sm:$0xff] %v1042_v25  ;;  %v1432_v36 = vunpack.c.h.bf16 %v1760_v17  ;;  %v1688_v37 = vunpack.c.h.bf16 %v1823_v23  ;;  %v534_v40 = vadd.f32 %v2398_v29, %v399_v30  ;;  %v400_v41 = vmul.f32 %v2379_v20, %v1431_v31 }
  0xb6   :  { %v1044_v38 = vmax.f32 %v916_v27, 0.0  ;;  %v917_v39 = vadd.f32 %v1683_v21, %v533_v28  ;;  %1171 = vst [vmem:[%s2902_s4 + $0x3a0] sm:$0xff] %v1043_v34  ;;  %v1435_v44 = vunpack.c.l.bf16 %v1761_v32  ;;  %v1691_v45 = vunpack.c.l.bf16 %v1824_v33 }
  0xb7   :  { %v401_v43 = vmul.f32 %v2379_v20, %v1432_v36  ;;  %v1436_v46 = vunpack.c.h.bf16 %v1761_v32  ;;  %v918_v49 = vadd.f32 %v1684_v26, %v534_v40  ;;  %v535_v50 = vadd.f32 %v2398_v29, %v400_v41 }
  0xb8   :  { %1172 = vst [vmem:[%s2902_s4 + $0x3a8] sm:$0xff] %v1044_v38  ;;  %v1045_v48 = vmax.f32 %v917_v39, 0.0  ;;  %v1692_v51 = vunpack.c.h.bf16 %v1824_v33  ;;  %v402_v53 = vmul.f32 %v2379_v20, %v1435_v44  ;;  %v1439_v55 = vunpack.c.l.bf16 %v1762_v42 }
  0xb9   :  { %v536_v52 = vadd.f32 %v2398_v29, %v401_v43  ;;  %v403_v54 = vmul.f32 %v2379_v20, %v1436_v46  ;;  %v1046_v57 = vmax.f32 %v918_v49, 0.0  ;;  %v919_v58 = vadd.f32 %v1687_v35, %v535_v50 }
  0xba   :  { %1173 = vst [vmem:[%s2902_s4 + $0x3b0] sm:$0xff] %v1045_v48  ;;  %v1695_v59 = vunpack.c.l.bf16 %v1825_v47  ;;  %v1440_v60 = vunpack.c.h.bf16 %v1762_v42  ;;  %v537_v62 = vadd.f32 %v2398_v29, %v402_v53  ;;  %v404_v0 = vmul.f32 %v2379_v20, %v1439_v55 }
  0xbb   :  { %v920_v61 = vadd.f32 %v1688_v37, %v536_v52  ;;  %v538_v63 = vadd.f32 %v2398_v29, %v403_v54  ;;  %1174 = vst [vmem:[%s2902_s4 + $0x3b8] sm:$0xff] %v1046_v57  ;;  %v1047_v3 = vmax.f32 %v919_v58, 0.0  ;;  %v1696_v5 = vunpack.c.h.bf16 %v1825_v47 }
  0xbc   :  { %v405_v4 = vmul.f32 %v2379_v20, %v1440_v60  ;;  %v1443_v6 = vunpack.c.l.bf16 %v1763_v56  ;;  %v921_v9 = vadd.f32 %v1691_v45, %v537_v62  ;;  %v539_v11 = vadd.f32 %v2398_v29, %v404_v0 }
  0xbd   :  { %v1048_v8 = vmax.f32 %v920_v61, 0.0  ;;  %v922_v10 = vadd.f32 %v1692_v51, %v538_v63  ;;  %1175 = vst [vmem:[%s2902_s4 + $0x3c0] sm:$0xff] %v1047_v3  ;;  %v1699_v14 = vunpack.c.l.bf16 %v1826_v2  ;;  %v1444_v15 = vunpack.c.h.bf16 %v1763_v56 }
  0xbe   :  { %v540_v12 = vadd.f32 %v2398_v29, %v405_v4  ;;  %v406_v13 = vmul.f32 %v2379_v20, %v1443_v6  ;;  %v1049_v1 = vmax.f32 %v921_v9, 0.0  ;;  %v923_v17 = vadd.f32 %v1695_v59, %v539_v11 }
  0xbf   :  { %1176 = vst [vmem:[%s2902_s4 + $0x3c8] sm:$0xff] %v1048_v8  ;;  %v1050_v16 = vmax.f32 %v922_v10, 0.0  ;;  %v407_v21 = vmul.f32 %v2379_v20, %v1444_v15  ;;  %v1700_v22 = vunpack.c.h.bf16 %v1826_v2 }
  0xc0   :  { %v924_v18 = vadd.f32 %v1696_v5, %v540_v12  ;;  %v541_v19 = vadd.f32 %v2398_v29, %v406_v13  ;;  %1177 = vst [vmem:[%s2902_s4 + $0x3d0] sm:$0xff] %v1049_v1  ;;  %v1051_v23 = vmax.f32 %v923_v17, 0.0 }
  0xc1   :  { %1178 = vst [vmem:[%s2902_s4 + $0x3d8] sm:$0xff] %v1050_v16  ;;  %v542_v7 = vadd.f32 %v2398_v29, %v407_v21 }
  0xc2   :  { %v1052_v24 = vmax.f32 %v924_v18, 0.0  ;;  %v925_v25 = vadd.f32 %v1699_v14, %v541_v19  ;;  %1179 = vst [vmem:[%s2902_s4 + $0x3e0] sm:$0xff] %v1051_v23 }
  0xc3   :  { %v926_v26 = vadd.f32 %v1700_v22, %v542_v7 }
  0xc4   :  { %1180 = vst [vmem:[%s2902_s4 + $0x3e8] sm:$0xff] %v1052_v24  ;;  %v1053_v20 = vmax.f32 %v925_v25, 0.0 }
  0xc5   :  { %v1054_v27 = vmax.f32 %v926_v26, 0.0 }
  0xc6   :  { %1181 = vst [vmem:[%s2902_s4 + $0x3f0] sm:$0xff] %v1053_v20 }
  0xc7   :  { %1182 = vst [vmem:[%s2902_s4 + $0x3f8] sm:$0xff] %v1054_v27 }

// kernel: resblock_forward.4
= control target key start
LH: loop header
LB: loop body
LE: loop exit
PB: predicated region body
PF: predicated region fallthrough
CT: control target
= control target key end

     0   :  { %s6418_s15 = smov 0   ;;  %s6420_s16 = smov 0   ;;  %s7631_s0 = inlined_call_operand.vmem [shape: bf16[2,10,80,384], index: 0, kind: input, shape index: {}]   ;;  %s7632_s1 = inlined_call_operand.vmem [shape: bf16[9,384,128], index: 1, kind: input, shape index: {}]   ;;  %s7633_s2 = inlined_call_operand.vmem [shape: bf16[2,8,64,128], index: 2, kind: output, shape index: {0}]   ;;  %s7634_s3 = inlined_call_operand.vmem [shape: f32[2,8,128], index: 3, kind: output, shape index: {1}]   ;;  %s7635_s4 = inlined_call_operand.vmem [shape: f32[2,8,128], index: 4, kind: output, shape index: {2}]  }
   0x1   :  { %s6422_s17 = smov 0   ;;  %s6424_s18 = smov 0  }
   0x2   :  { %s6426_s19 = smov 0  }
   0x3 LB: > { %s24_s20 = sadd.s32 1, %s6382_s17  ;;  %s27_s21 = sadd.s32 1, %s6386_s18  ;;  %s6390_s19 = sphi %s6426_s19, %s15_s19   ;;  %s6386_s18 = sphi %s6424_s18, %s7639_s18   ;;  %s6382_s17 = sphi %s6422_s17, %s7638_s17   ;;  %s6378_s16 = sphi %s6420_s16, %s7637_s16   ;;  %s6374_s15 = sphi %s6418_s15, %s7636_s15  }
   0x4   : > { %p25_p0 = scmp.ge.s32.totalorder %s24_s20, 8  ;;  %p4483_p1 = scmp.ge.s32.totalorder %s6390_s19, 1 }
   0x5   : > { %p147_p2 = scmp.lt.s32.totalorder %s6390_s19, 17 }
   0x6   : > { %s7641_s20 = smov (%p25_p0, %s24_s20), 0  ;;  %s7643_s21 = smov (!%p25_p0, %s27_s21), %s6386_s18 }
   0x7   : > { %p148_p3 = pnand %p4483_p1, %p147_p2  ;;  %p29_p4 = scmp.ge.s32.totalorder %s7643_s21, 2 }
   0x8   : > { %p178_p5 = scmp.lt.s32.totalorder (!%p148_p3), %s6378_s16, 1  ;;  %p180_p6 = scmp.lt.s32.totalorder (!%p148_p3), %s6374_s15, 7 }
   0x9   : > { %s7645_s21 = smov (%p29_p4, %s7643_s21), 0  ;;  %151 = sbr.rel (%p148_p3) target bundleno = 631 (0x277), region = 24 }
   0xa   : > { %p4489_p7 = scmp.ne.s32.totalorder (!%p148_p3), %s6374_s15, 0 }
   0xe   : > { %s179_s22 = scalar_select %p178_p5, %s6378_s16, 1 }
   0xf   : > { %s181_s23 = scalar_select %p180_p6, %s6374_s15, 7 }
  0x10   : > { %s4485_s24 = sshll.u32 %s179_s22, 6  ;;  %s4487_s25 = sshll.u32 %s179_s22, 3 }
  0x11   : > { %s4484_s26 = sshll.u32 %s181_s23, 3  ;;  %s6459_s29 = scalar_lea.vmem %s7634_s3, %s4487_s25 }
  0x12   : > { %s184_s30 = sadd.s32 %s4485_s24, %s4484_s26  ;;  %s6464_s7 = scalar_lea.vmem %s7635_s4, %s4487_s25 }
  0x13   : > { %s4486_s8 = sshll.u32 %s184_s30, 2  ;;  %199 = sbr.rel (%p4489_p7) target bundleno = 52 (0x34), region = 28 }
  0x14   : > { %s6469_s11 = scalar_lea.vmem %s7633_s2, %s4486_s8  ;;  %s5271_s12 = smul.u32 (!%p4489_p7), 1200, %s6378_s16 }
  0x16   : > { %s6478_s22 = scalar_lea.vmem (!%p4489_p7), %s7631_s0, %s5271_s12 }
  0x18   : > { %v236_v0 = vld [vmem:[%s6478_s22] sm:$0xff]  ;;  %v238_v1 = vld [vmem:[%s6478_s22 + $0x8] sm:$0xff]  ;;  %v240_v2 = vld [vmem:[%s6478_s22 + $0x10] sm:$0xff] }
  0x19   : > { %237 = vst [vmem:[#allocation2] sm:$0xff] %v236_v0  ;;  %239 = vst [vmem:[#allocation2 + $0x8] sm:$0xff] %v238_v1  ;;  %v242_v3 = vld [vmem:[%s6478_s22 + $0x18] sm:$0xff]  ;;  %v244_v4 = vld [vmem:[%s6478_s22 + $0x20] sm:$0xff] }
  0x1a   : > { %241 = vst [vmem:[#allocation2 + $0x10] sm:$0xff] %v240_v2  ;;  %v246_v5 = vld [vmem:[%s6478_s22 + $0x28] sm:$0xff]  ;;  %243 = vst [vmem:[#allocation2 + $0x18] sm:$0xff] %v242_v3  ;;  %v248_v6 = vld [vmem:[%s6478_s22 + $0x30] sm:$0xff] }
  0x1b   : > { %245 = vst [vmem:[#allocation2 + $0x20] sm:$0xff] %v244_v4  ;;  %247 = vst [vmem:[#allocation2 + $0x28] sm:$0xff] %v246_v5  ;;  %v250_v7 = vld [vmem:[%s6478_s22 + $0x38] sm:$0xff]  ;;  %v252_v8 = vld [vmem:[%s6478_s22 + $0x40] sm:$0xff] }
  0x1c   : > { %249 = vst [vmem:[#allocation2 + $0x30] sm:$0xff] %v248_v6  ;;  %251 = vst [vmem:[#allocation2 + $0x38] sm:$0xff] %v250_v7  ;;  %v254_v9 = vld [vmem:[%s6478_s22 + $0x48] sm:$0xff]  ;;  %v256_v10 = vld [vmem:[%s6478_s22 + $0x50] sm:$0xff] }
  0x1d   : > { %253 = vst [vmem:[#allocation2 + $0x40] sm:$0xff] %v252_v8  ;;  %v258_v11 = vld [vmem:[%s6478_s22 + $0x58] sm:$0xff]  ;;  %255 = vst [vmem:[#allocation2 + $0x48] sm:$0xff] %v254_v9  ;;  %v260_v12 = vld [vmem:[%s6478_s22 + $0x60] sm:$0xff] }
  0x1e   : > { %257 = vst [vmem:[#allocation2 + $0x50] sm:$0xff] %v256_v10  ;;  %259 = vst [vmem:[#allocation2 + $0x58] sm:$0xff] %v258_v11  ;;  %v262_v13 = vld [vmem:[%s6478_s22 + $0x68] sm:$0xff]  ;;  %v264_v14 = vld [vmem:[%s6478_s22 + $0x70] sm:$0xff] }
  0x1f   : > { %261 = vst [vmem:[#allocation2 + $0x60] sm:$0xff] %v260_v12  ;;  %263 = vst [vmem:[#allocation2 + $0x68] sm:$0xff] %v262_v13 }
  0x20   : > { %265 = vst [vmem:[#allocation2 + $0x70] sm:$0xff] %v264_v14 }
  0x21   : > { %273 = vsyncadd [#allocation3], 1920  ;;  %v4492_v15 = vld [vmem:[%s6478_s22 + $0x78] sm:$0xff]  ;;  %v4493_v16 = vld [vmem:[%s6478_s22 + $0x80] sm:$0xff] }
  0x22   : > { %313 = vst [vmem:[#allocation2 + $0x78] sm:$0xff] %v4492_v15  ;;  %315 = vst [vmem:[#allocation2 + $0x80] sm:$0xff] %v4493_v16  ;;  %v4494_v17 = vld [vmem:[%s6478_s22 + $0x88] sm:$0xff]  ;;  %v4495_v18 = vld [vmem:[%s6478_s22 + $0x90] sm:$0xff] }
  0x23   : > { %v4496_v19 = vld [vmem:[%s6478_s22 + $0x98] sm:$0xff]  ;;  %317 = vst [vmem:[#allocation2 + $0x88] sm:$0xff] %v4494_v17  ;;  %319 = vst [vmem:[#allocation2 + $0x90] sm:$0xff] %v4495_v18  ;;  %v4497_v20 = vld [vmem:[%s6478_s22 + $0xa0] sm:$0xff] }
  0x24   : > { %321 = vst [vmem:[#allocation2 + $0x98] sm:$0xff] %v4496_v19  ;;  %v4498_v21 = vld [vmem:[%s6478_s22 + $0xa8] sm:$0xff]  ;;  %v4499_v22 = vld [vmem:[%s6478_s22 + $0xb0] sm:$0xff]  ;;  %323 = vst [vmem:[#allocation2 + $0xa0] sm:$0xff] %v4497_v20 }
  0x25   : > { %325 = vst [vmem:[#allocation2 + $0xa8] sm:$0xff] %v4498_v21  ;;  %327 = vst [vmem:[#allocation2 + $0xb0] sm:$0xff] %v4499_v22  ;;  %v4500_v23 = vld [vmem:[%s6478_s22 + $0xb8] sm:$0xff]  ;;  %v4501_v24 = vld [vmem:[%s6478_s22 + $0xc0] sm:$0xff] }
  0x26   : > { %v4502_v25 = vld [vmem:[%s6478_s22 + $0xc8] sm:$0xff]  ;;  %329 = vst [vmem:[#allocation2 + $0xb8] sm:$0xff] %v4500_v23  ;;  %331 = vst [vmem:[#allocation2 + $0xc0] sm:$0xff] %v4501_v24  ;;  %v4503_v26 = vld [vmem:[%s6478_s22 + $0xd0] sm:$0xff] }
  0x27   : > { %333 = vst [vmem:[#allocation2 + $0xc8] sm:$0xff] %v4502_v25  ;;  %v4504_v27 = vld [vmem:[%s6478_s22 + $0xd8] sm:$0xff]  ;;  %v4505_v28 = vld [vmem:[%s6478_s22 + $0xe0] sm:$0xff]  ;;  %335 = vst [vmem:[#allocation2 + $0xd0] sm:$0xff] %v4503_v26 }
  0x28   : > { %337 = vst [vmem:[#allocation2 + $0xd8] sm:$0xff] %v4504_v27  ;;  %339 = vst [vmem:[#allocation2 + $0xe0] sm:$0xff] %v4505_v28  ;;  %v4506_v29 = vld [vmem:[%s6478_s22 + $0xe8] sm:$0xff] }
  0x29   : > { %341 = vst [vmem:[#allocation2 + $0xe8] sm:$0xff] %v4506_v29 }
  0x2a   : > { %349 = vsyncadd [#allocation3 + $0x1], 1920  ;;  %v4509_v30 = vld [vmem:[%s6478_s22 + $0xf0] sm:$0xff]  ;;  %v4510_v31 = vld [vmem:[%s6478_s22 + $0xf8] sm:$0xff] }
  0x2b   : > { %389 = vst [vmem:[#allocation2 + $0xf0] sm:$0xff] %v4509_v30  ;;  %391 = vst [vmem:[#allocation2 + $0xf8] sm:$0xff] %v4510_v31  ;;  %v4511_v32 = vld [vmem:[%s6478_s22 + $0x100] sm:$0xff]  ;;  %v4512_v33 = vld [vmem:[%s6478_s22 + $0x108] sm:$0xff] }
  0x2c   : > { %v4513_v34 = vld [vmem:[%s6478_s22 + $0x110] sm:$0xff]  ;;  %393 = vst [vmem:[#allocation2 + $0x100] sm:$0xff] %v4511_v32  ;;  %395 = vst [vmem:[#allocation2 + $0x108] sm:$0xff] %v4512_v33  ;;  %v4514_v35 = vld [vmem:[%s6478_s22 + $0x118] sm:$0xff] }
  0x2d   : > { %397 = vst [vmem:[#allocation2 + $0x110] sm:$0xff] %v4513_v34  ;;  %v4515_v36 = vld [vmem:[%s6478_s22 + $0x120] sm:$0xff]  ;;  %v4516_v37 = vld [vmem:[%s6478_s22 + $0x128] sm:$0xff]  ;;  %399 = vst [vmem:[#allocation2 + $0x118] sm:$0xff] %v4514_v35 }
  0x2e   : > { %401 = vst [vmem:[#allocation2 + $0x120] sm:$0xff] %v4515_v36  ;;  %403 = vst [vmem:[#allocation2 + $0x128] sm:$0xff] %v4516_v37  ;;  %v4517_v38 = vld [vmem:[%s6478_s22 + $0x130] sm:$0xff]  ;;  %v4518_v39 = vld [vmem:[%s6478_s22 + $0x138] sm:$0xff] }
  0x2f   : > { %v4519_v40 = vld [vmem:[%s6478_s22 + $0x140] sm:$0xff]  ;;  %405 = vst [vmem:[#allocation2 + $0x130] sm:$0xff] %v4517_v38  ;;  %407 = vst [vmem:[#allocation2 + $0x138] sm:$0xff] %v4518_v39  ;;  %v4520_v41 = vld [vmem:[%s6478_s22 + $0x148] sm:$0xff] }
  0x30   : > { %409 = vst [vmem:[#allocation2 + $0x140] sm:$0xff] %v4519_v40  ;;  %v4521_v42 = vld [vmem:[%s6478_s22 + $0x150] sm:$0xff]  ;;  %v4522_v43 = vld [vmem:[%s6478_s22 + $0x158] sm:$0xff]  ;;  %411 = vst [vmem:[#allocation2 + $0x148] sm:$0xff] %v4520_v41 }
  0x31   : > { %413 = vst [vmem:[#allocation2 + $0x150] sm:$0xff] %v4521_v42  ;;  %415 = vst [vmem:[#allocation2 + $0x158] sm:$0xff] %v4522_v43  ;;  %v4523_v44 = vld [vmem:[%s6478_s22 + $0x160] sm:$0xff] }
  0x32   : > { %417 = vst [vmem:[#allocation2 + $0x160] sm:$0xff] %v4523_v44 }
  0x33   : > { %425 = vsyncadd [#allocation3 + $0x2], 1920 }
  0x34 PF: > { %s426_s23 = sadd.s32 2, %s6374_s15 }
  0x35   : > { %p4525_p8 = scmp.gt.s32.totalorder %s426_s23, 8 }
  0x36   : > { %s431_s24 = sadd.s32 (!%p4525_p8), 3, %s6374_s15  ;;  %s4371_s25 = smul.u32 (!%p4525_p8), 30, %s6374_s15 }
  0x37   : > { %430 = sbr.rel (%p4525_p8) target bundleno = 71 (0x47), region = 134  ;;  %s6530_s26 = sand.u32 (!%p4525_p8), 3, %s431_s24 }
  0x38   : > { %s4372_s27 = smul.u32 (!%p4525_p8), 300, %s6378_s16  ;;  %s441_s16 = scalar_lea.sflag (!%p4525_p8), [#allocation3], %s6530_s26 }
  0x39   : > { %s5272_s28 = smul.u32 (!%p4525_p8), 120, %s6530_s26 }
  0x3a   : > { %s4373_s30 = sadd.s32 (!%p4525_p8), %s4372_s27, %s4371_s25 }
  0x3b   : > { %s4526_s5 = sshll.u32 (!%p4525_p8), %s4373_s30, 2  ;;  %s440_s10 = scalar_lea.vmem (!%p4525_p8), [#allocation2], %s5272_s28 }
  0x3c   : > { %s4375_s9 = scalar_lea.vmem %s7631_s0, %s4526_s5 }
  0x3d   : > { %v4528_v45 = vld [vmem:[%s4375_s9 + $0x168] sm:$0xff]  ;;  %v4529_v46 = vld [vmem:[%s4375_s9 + $0x170] sm:$0xff]  ;;  %v4530_v47 = vld [vmem:[%s4375_s9 + $0x178] sm:$0xff] }
  0x3e   : > { %476 = vst [vmem:[%s440_s10] sm:$0xff] %v4528_v45  ;;  %478 = vst [vmem:[%s440_s10 + $0x8] sm:$0xff] %v4529_v46  ;;  %v4531_v48 = vld [vmem:[%s4375_s9 + $0x180] sm:$0xff]  ;;  %v4532_v49 = vld [vmem:[%s4375_s9 + $0x188] sm:$0xff] }
  0x3f   : > { %480 = vst [vmem:[%s440_s10 + $0x10] sm:$0xff] %v4530_v47  ;;  %v4533_v50 = vld [vmem:[%s4375_s9 + $0x190] sm:$0xff]  ;;  %482 = vst [vmem:[%s440_s10 + $0x18] sm:$0xff] %v4531_v48  ;;  %v4534_v51 = vld [vmem:[%s4375_s9 + $0x198] sm:$0xff] }
  0x40   : > { %484 = vst [vmem:[%s440_s10 + $0x20] sm:$0xff] %v4532_v49  ;;  %486 = vst [vmem:[%s440_s10 + $0x28] sm:$0xff] %v4533_v50  ;;  %v4535_v52 = vld [vmem:[%s4375_s9 + $0x1a0] sm:$0xff]  ;;  %v4536_v53 = vld [vmem:[%s4375_s9 + $0x1a8] sm:$0xff] }
  0x41   : > { %488 = vst [vmem:[%s440_s10 + $0x30] sm:$0xff] %v4534_v51  ;;  %490 = vst [vmem:[%s440_s10 + $0x38] sm:$0xff] %v4535_v52  ;;  %v4537_v54 = vld [vmem:[%s4375_s9 + $0x1b0] sm:$0xff]  ;;  %v4538_v55 = vld [vmem:[%s4375_s9 + $0x1b8] sm:$0xff] }
  0x42   : > { %492 = vst [vmem:[%s440_s10 + $0x40] sm:$0xff] %v4536_v53  ;;  %v4539_v56 = vld [vmem:[%s4375_s9 + $0x1c0] sm:$0xff]  ;;  %494 = vst [vmem:[%s440_s10 + $0x48] sm:$0xff] %v4537_v54  ;;  %v4540_v57 = vld [vmem:[%s4375_s9 + $0x1c8] sm:$0xff] }
  0x43   : > { %496 = vst [vmem:[%s440_s10 + $0x50] sm:$0xff] %v4538_v55  ;;  %498 = vst [vmem:[%s440_s10 + $0x58] sm:$0xff] %v4539_v56  ;;  %v4541_v58 = vld [vmem:[%s4375_s9 + $0x1d0] sm:$0xff]  ;;  %v4542_v59 = vld [vmem:[%s4375_s9 + $0x1d8] sm:$0xff] }
  0x44   : > { %500 = vst [vmem:[%s440_s10 + $0x60] sm:$0xff] %v4540_v57  ;;  %502 = vst [vmem:[%s440_s10 + $0x68] sm:$0xff] %v4541_v58 }
  0x45   : > { %504 = vst [vmem:[%s440_s10 + $0x70] sm:$0xff] %v4542_v59 }
  0x46   : > { %512 = vsyncadd %s441_s16, 1920 }
  0x47 PF: > { %p5994_p9 = scmp.eq.s32.totalorder %s6374_s15, 0 }
  0x49   : > { %6363 = dma.done.wait (%p5994_p9), [#allocation3], 1920 }
  0x4a   : > { %6365 = vsyncadd (%p5994_p9), [#allocation3], 4294965376 }
  0x4b   : > { %6367 = dma.done.wait (%p5994_p9), [#allocation3 + $0x1], 1920 }
  0x4c   : > { %6369 = vsyncadd (%p5994_p9), [#allocation3 + $0x1], 4294965376  ;;  %s523_s12 = sand.u32 3, %s426_s23 }
  0x4d   : > { %s5273_s13 = smul.u32 120, %s523_s12  ;;  %s527_s22 = scalar_lea.sflag [#allocation3], %s523_s12 }
  0x4f   : > { %s6541_s14 = scalar_lea.vmem [#allocation2], %s5273_s13 }
  0x50   : > { %6370 = dma.done.wait %s527_s22, 1920 }
  0x51   : > { %6371 = vsyncadd %s527_s22, 4294965376  ;;  %v6036_v60 = vld [vmem:[%s7632_s1 + $0x138] sm:$0xff]   ;;  %v6039_v63 = vld [vmem:[%s7632_s1 + $0x130] sm:$0xff]   ;;  %s532_s16 = sand.u32 3, %s6374_s15  ;;  %s1703_s26 = sadd.s32 1, %s6374_s15 }
  0x52   : > { %v6037_v61 = vld [vmem:[%s7632_s1 + $0xf8] sm:$0xff]   ;;  %5307 = vmatprep.subr.bf16.mxu0 %v6036_v60  ;;  %v6040_v0 = vld [vmem:[%s7632_s1 + $0xf0] sm:$0xff]   ;;  %v6042_v2 = vld [vmem:[%s7632_s1 + $0x128] sm:$0xff]   ;;  %s5274_s25 = smul.u32 120, %s532_s16  ;;  %s1704_s8 = sand.u32 3, %s1703_s26 }
  0x53   : > { %v6038_v62 = vld [vmem:[%s7632_s1 + $0x178] sm:$0xff]   ;;  %5308 = vmatpush3.bf16.msra.mxu0 %v6037_v61  ;;  %v6041_v1 = vld [vmem:[%s7632_s1 + $0x170] sm:$0xff]   ;;  %v6043_v3 = vld [vmem:[%s7632_s1 + $0xe8] sm:$0xff]  }
  0x54   : > { %5775 = vmatprep.subr.bf16.mxu1 %v6038_v62  ;;  %5309 = vmatprep.subr.bf16.mxu0 %v6039_v63  ;;  %v6044_v4 = vld [vmem:[%s7632_s1 + $0x168] sm:$0xff]   ;;  %v6045_v5 = vld [vmem:[%s7632_s1 + $0x120] sm:$0xff]   ;;  %v6048_v8 = vld [vmem:[%s7632_s1 + $0x118] sm:$0xff]   ;;  %s6610_s13 = scalar_lea.vmem [#allocation2], %s5274_s25  ;;  %s5275_s25 = smul.u32 120, %s1704_s8 }
  0x55   : > { %5776 = vmatpush3.bf16.msra.mxu1 %v6038_v62  ;;  %v6046_v6 = vld [vmem:[%s7632_s1 + $0xe0] sm:$0xff]   ;;  %v6050_v9 = vld [vmem:[%s7632_s1 + $0x158] sm:$0xff]   ;;  %v6051_v11 = vld [vmem:[%s7632_s1 + $0x110] sm:$0xff]  }
  0x56   : > { %5777 = vmatprep.subr.bf16.mxu1 %v6041_v1  ;;  %v6047_v7 = vld [vmem:[%s7632_s1 + $0x160] sm:$0xff]   ;;  %v6049_v10 = vld [vmem:[%s7632_s1 + $0xd8] sm:$0xff]   ;;  %v6053_v12 = vld [vmem:[%s7632_s1 + $0x150] sm:$0xff]   ;;  %s6922_s6 = scalar_lea.vmem [#allocation2], %s5275_s25 }
  0x57   : > { %5310 = vmatpush3.bf16.msra.mxu0 %v6040_v0  ;;  %v6052_v13 = vld [vmem:[%s7632_s1 + $0xd0] sm:$0xff]   ;;  %v6054_v14 = vld [vmem:[%s7632_s1 + $0x108] sm:$0xff]   ;;  %v6057_v17 = vld [vmem:[%s7632_s1 + $0x100] sm:$0xff]  }
  0x58   : > { %5311 = vmatprep.subr.bf16.mxu0 %v6042_v2  ;;  %v6055_v15 = vld [vmem:[%s7632_s1 + $0xc8] sm:$0xff]   ;;  %v6616_v19 = vld [vmem:[%s6610_s13 + $0x18] sm:$0xff]  ;;  %v6058_v20 = vld [vmem:[%s7632_s1 + $0xc0] sm:$0xff]  }
  0x59   : > { %5778 = vmatpush3.bf16.msra.mxu1 %v6041_v1  ;;  %v6056_v16 = vld [vmem:[%s7632_s1 + $0x148] sm:$0xff]   ;;  %v6059_v22 = vld [vmem:[%s7632_s1 + $0x140] sm:$0xff]   ;;  %v6627_v23 = vld [vmem:[%s6610_s13 + $0x14] sm:$0xf] }
  0x5a   : > { %5779 = vmatprep.subr.bf16.mxu1 %v6044_v4  ;;  %v6613_v18 = vld [vmem:[%s6610_s13 + $0xc] sm:$0xff]  ;;  %v6630_v24 = vld [vmem:[%s6610_s13 + $0x20] sm:$0xf]  ;;  %v6062_v25 = vld [vmem:[%s7632_s1 + $0x78] sm:$0xff]  }
  0x5b   : > { %5312 = vmatpush3.bf16.msra.mxu0 %v6043_v3  ;;  %v4596_v21 = vcombine.high %v6613_v18, %v6616_v19  ;;  %v4597_v26 = vcombine.low %v6627_v23, %v6630_v24  ;;  %v6638_v27 = vld [vmem:[%s6610_s13 + $0x2c] sm:$0xf]  ;;  %v6641_v28 = vld [vmem:[%s6610_s13 + $0x38] sm:$0xf]  ;;  %v4595_v29 = vcombine.low %v6613_v18, %v6616_v19  ;;  %v6069_v33 = vld [vmem:[%s7632_s1 + $0x70] sm:$0xff]  }
  0x5c   : > { %5313 = vmatprep.subr.bf16.mxu0 %v6045_v5  ;;  %v6068_v30 = vld [vmem:[%s7632_s1 + $0xb8] sm:$0xff]   ;;  %v4600_v32 = vcombine.low %v6638_v27, %v6641_v28  ;;  %v6657_v34 = vld [vmem:[%s6610_s13 + $0x24] sm:$0xff]  ;;  %v6660_v35 = vld [vmem:[%s6610_s13 + $0x30] sm:$0xff] }
  0x5d   : > { %5780 = vmatpush3.bf16.msra.mxu1 %v6044_v4  ;;  %891 = vmatprep.mubr.bf16.mxu0 %v4596_v21  ;;  %v6066_v31 = vld [vmem:[%s7632_s1 + $0x38] sm:$0xff]   ;;  %v4599_v36 = vcombine.high %v6657_v34, %v6660_v35  ;;  %v6071_v37 = vld [vmem:[%s7632_s1 + $0xb0] sm:$0xff]   ;;  %v6074_v39 = vld [vmem:[%s7632_s1 + $0x68] sm:$0xff]   ;;  %v4598_v42 = vcombine.low %v6657_v34, %v6660_v35 }
  0x5e   : > { %5781 = vmatprep.subr.bf16.mxu1 %v6047_v7  ;;  %5791 = vmatprep.mubr.bf16.mxu1 %v4597_v26  ;;  %v6070_v38 = vld [vmem:[%s7632_s1 + $0x30] sm:$0xff]   ;;  %v6075_v40 = vld [vmem:[%s7632_s1 + $0x28] sm:$0xff]   ;;  %v6683_v44 = vld [vmem:[%s6610_s13 + $0x3c] sm:$0xff] }
  0x5f   : > { %5314 = vmatpush3.bf16.msra.mxu0 %v6046_v6  ;;  %v537_v41 = vld [vmem:[%s6610_s13 + $0x8] sm:$0xf]  ;;  %v6077_v46 = vld [vmem:[%s7632_s1 + $0x60] sm:$0xff]   ;;  %v6697_v49 = vld [vmem:[%s6610_s13 + $0x50] sm:$0xf] }
  0x60   : > { %5315 = vmatprep.subr.bf16.mxu0 %v6048_v8  ;;  %v6076_v43 = vld [vmem:[%s7632_s1 + $0xa8] sm:$0xff]   ;;  %v6694_v48 = vld [vmem:[%s6610_s13 + $0x44] sm:$0xf]  ;;  %v6705_v52 = vld [vmem:[%s6610_s13 + $0x5c] sm:$0xf]  ;;  %v4633_v54 = vcombine.low %v537_v41, %v6627_v23 }
  0x61   : > { %5782 = vmatpush3.bf16.msra.mxu1 %v6047_v7  ;;  %v6686_v45 = vld [vmem:[%s6610_s13 + $0x48] sm:$0xff]  ;;  %v6079_v50 = vld [vmem:[%s7632_s1 + $0xa0] sm:$0xff]   ;;  %v4603_v51 = vcombine.low %v6694_v48, %v6697_v49  ;;  %v6082_v57 = vld [vmem:[%s7632_s1 + $0x58] sm:$0xff]  }
  0x62   : > { %5783 = vmatprep.subr.bf16.mxu1 %v6050_v9  ;;  %v4602_v47 = vcombine.high %v6683_v44, %v6686_v45  ;;  %v601_v53 = vld [vmem:[%s6610_s13 + $0x68] sm:$0xf]  ;;  %v6078_v55 = vld [vmem:[%s7632_s1 + $0x20] sm:$0xff]   ;;  %v6084_v58 = vld [vmem:[%s7632_s1 + $0x18] sm:$0xff]   ;;  %v4601_v59 = vcombine.low %v6683_v44, %v6686_v45 }
  0x63   : > { %5316 = vmatpush3.bf16.msra.mxu0 %v6049_v10  ;;  %v4606_v56 = vcombine.low %v6705_v52, %v601_v53  ;;  %v6086_v60 = vld [vmem:[%s7632_s1 + $0x98] sm:$0xff]   ;;  %v6728_v62 = vld [vmem:[%s6610_s13 + $0x60] sm:$0xff]  ;;  %v6087_v63 = vld [vmem:[%s7632_s1 + $0x50] sm:$0xff]  }
  0x64   : > { %5317 = vmatprep.subr.bf16.mxu0 %v6051_v11  ;;  %v6725_v61 = vld [vmem:[%s6610_s13 + $0x54] sm:$0xff]  ;;  %v6092_v3 = vld [vmem:[%s7632_s1 + $0x48] sm:$0xff]   ;;  %v536_v4 = vld [vmem:[%s6610_s13] sm:$0xff] }
  0x65   : > { %5784 = vmatpush3.bf16.msra.mxu1 %v6050_v9  ;;  %v4605_v0 = vcombine.high %v6725_v61, %v6728_v62  ;;  %v6089_v1 = vld [vmem:[%s7632_s1 + $0x90] sm:$0xff]   ;;  %v4604_v5 = vcombine.low %v6725_v61, %v6728_v62  ;;  %v6094_v6 = vld [vmem:[%s7632_s1 + $0x88] sm:$0xff]   ;;  %v4632_v8 = vcombine.high %v536_v4, %v6613_v18  ;;  %v6095_v9 = vld [vmem:[%s7632_s1 + $0x40] sm:$0xff]   ;;  %v6855_v41 = vcombine.low %v6686_v45, %v6725_v61 }
  0x66   : > { %5785 = vmatprep.subr.bf16.mxu1 %v6053_v12  ;;  %v6088_v2 = vld [vmem:[%s7632_s1 + $0x10] sm:$0xff]   ;;  %v6093_v7 = vld [vmem:[%s7632_s1 + $0x8] sm:$0xff]   ;;  %v6097_v10 = vld [vmem:[%s7632_s1 + $0x80] sm:$0xff]  }
  0x67   : > { %5318 = vmatpush3.bf16.msra.mxu0 %v6052_v13  ;;  %v6096_v11 = vld [vmem:[%s7632_s1] sm:$0xff]   ;;  %v4631_v13 = vcombine.low %v536_v4, %v6613_v18  ;;  %v6103_v18 = vld [vmem:[%s7632_s1 + $0x1f0] sm:$0xff]   ;;  %v6108_v23 = vld [vmem:[%s7632_s1 + $0x1e8] sm:$0xff]  }
  0x68   : > { %5319 = vmatprep.subr.bf16.mxu0 %v6054_v14  ;;  %v6102_v14 = vld [vmem:[%s7632_s1 + $0x238] sm:$0xff]   ;;  %v6105_v21 = vld [vmem:[%s7632_s1 + $0x230] sm:$0xff]   ;;  %v6109_v26 = vld [vmem:[%s7632_s1 + $0x1a8] sm:$0xff]  }
  0x69   : > { %5786 = vmatpush3.bf16.msra.mxu1 %v6053_v12  ;;  %v6100_v12 = vld [vmem:[%s7632_s1 + $0x1f8] sm:$0xff]   ;;  %v6139_v53 = vld [vmem:[%s7632_s1 + $0x2f0] sm:$0xff]  }
  0x6a   : > { %5787 = vmatprep.subr.bf16.mxu1 %v6056_v16 }
  0x6b   : > { %5320 = vmatpush3.bf16.msra.mxu0 %v6055_v15  ;;  %v6101_v15 = vld [vmem:[%s7632_s1 + $0x1b8] sm:$0xff]  }
  0x6c   : > { %5321 = vmatprep.subr.bf16.mxu0 %v6057_v17  ;;  %v4636_v17 = vcombine.low %v6630_v24, %v6638_v27  ;;  %v6796_v24 = vcombine.low %v6616_v19, %v6657_v34  ;;  %v6806_v27 = vcombine.high %v6660_v35, %v6683_v44 }
  0x6d   : > { %5788 = vmatpush3.bf16.msra.mxu1 %v6056_v16  ;;  %v6775_v16 = vcombine.high %v6616_v19, %v6657_v34  ;;  %v4642_v19 = vcombine.low %v6697_v49, %v6705_v52  ;;  %v6118_v34 = vld [vmem:[%s7632_s1 + $0x218] sm:$0xff]  }
  0x6e   : > { %5789 = vmatprep.subr.bf16.mxu1 %v6059_v22  ;;  %v6136_v49 = vld [vmem:[%s7632_s1 + $0x2f8] sm:$0xff]  }
  0x6f   : > { %5322 = vmatpush3.bf16.msra.mxu0 %v6058_v20  ;;  %v4639_v20 = vcombine.low %v6641_v28, %v6694_v48  ;;  %v6111_v28 = vld [vmem:[%s7632_s1 + $0x1e0] sm:$0xff]   ;;  %v6134_v48 = vld [vmem:[%s7632_s1 + $0x278] sm:$0xff]  }
  0x70   : > { %5359 = vmatprep.subr.bf16.mxu0 %v6062_v25  ;;  %v6110_v25 = vld [vmem:[%s7632_s1 + $0x228] sm:$0xff]   ;;  %v6147_v52 = vld [vmem:[%s6610_s13 + $0x50] ss:$12 sps:$4 sm:$0xff]  }
  0x71   : > { %5790 = vmatpush3.bf16.msra.mxu1 %v6059_v22  ;;  %v6104_v22 = vld [vmem:[%s7632_s1 + $0x1b0] sm:$0xff]  }
  0x72   : > { %892 = vmatmul.mubr.bf16.vlgmr.msra.gmra.mxu0 %v4595_v29  ;;  %5799 = vmatprep.subr.bf16.mxu1 %v6068_v30  ;;  %v6113_v29 = vld [vmem:[%s7632_s1 + $0x220] sm:$0xff]  }
  0x73   : > { %5360 = vmatpush3.bf16.msra.mxu0 %v6066_v31  ;;  %899 = vmatprep.mubr.bf16.mxu0 %v4599_v36  ;;  %v6116_v31 = vld [vmem:[%s7632_s1 + $0x1d8] sm:$0xff]   ;;  %v6836_v36 = vcombine.high %v6686_v45, %v6725_v61  ;;  %v6131_v45 = vld [vmem:[%s7632_s1 + $0x200] sm:$0xff]  }
  0x74   : > { %5792 = vmatmul.mubr.bf16.vlgmr.msra.gmra.mxu1 %v4600_v32  ;;  %5361 = vmatprep.subr.bf16.mxu0 %v6069_v33  ;;  %v6117_v32 = vld [vmem:[%s7632_s1 + $0x198] sm:$0xff]   ;;  %v6829_v33 = vcombine.low %v6660_v35, %v6683_v44  ;;  %v6123_v35 = vld [vmem:[%s7632_s1 + $0x210] sm:$0xff]   ;;  %v6129_v44 = vld [vmem:[%s7632_s1 + $0x1c0] sm:$0xff]  }
  0x75   : > { %5800 = vmatpush3.bf16.msra.mxu1 %v6068_v30  ;;  %5795 = vmatprep.mubr.bf16.mxu1 %v4603_v51  ;;  %v6112_v30 = vld [vmem:[%s7632_s1 + $0x1a0] sm:$0xff]   ;;  %v6137_v51 = vld [vmem:[%s7632_s1 + $0x2b0] sm:$0xff]  }
  0x76   : > { %5801 = vmatprep.subr.bf16.mxu1 %v6071_v37  ;;  %v6145_v61 = vld [vmem:[%s7632_s1 + $0x2e0] sm:$0xff]  }
  0x77   : > { %5362 = vmatpush3.bf16.msra.mxu0 %v6070_v38  ;;  %v6121_v38 = vld [vmem:[%s7632_s1 + $0x1d0] sm:$0xff]  }
  0x78   : > { %5363 = vmatprep.subr.bf16.mxu0 %v6074_v39  ;;  %v6122_v39 = vld [vmem:[%s7632_s1 + $0x190] sm:$0xff]  }
  0x79   : > { %5802 = vmatpush3.bf16.msra.mxu1 %v6071_v37  ;;  %v6133_v37 = vld [vmem:[%s6610_s13 + $0x20] ss:$12 sps:$4 sm:$0xff]  }
  0x7a   : > { %900 = vmatmul.mubr.bf16.gmra.mxu0 %v4598_v42  ;;  %5803 = vmatprep.subr.bf16.mxu1 %v6076_v43  ;;  %v6128_v42 = vld [vmem:[%s7632_s1 + $0x208] sm:$0xff]  }
  0x7b   : > { %5364 = vmatpush3.bf16.msra.mxu0 %v6075_v40  ;;  %907 = vmatprep.mubr.bf16.mxu0 %v4602_v47  ;;  %v6126_v40 = vld [vmem:[%s7632_s1 + $0x1c8] sm:$0xff]   ;;  %v6132_v47 = vld [vmem:[%s7632_s1 + $0x2b8] sm:$0xff]  }
  0x7c   : > { %5365 = vmatprep.subr.bf16.mxu0 %v6077_v46  ;;  %5796 = vmatmul.mubr.bf16.gmra.mxu1 %v4606_v56  ;;  %v6130_v46 = vld [vmem:[%s7632_s1 + $0x180] sm:$0xff]   ;;  %v6141_v56 = vld [vmem:[%s7632_s1 + $0x268] sm:$0xff]  }
  0x7d   : > { %5804 = vmatpush3.bf16.msra.mxu1 %v6076_v43  ;;  %5815 = vmatprep.mubr.bf16.mxu1 %v4633_v54  ;;  %v6127_v43 = vld [vmem:[%s7632_s1 + $0x188] sm:$0xff]   ;;  %v6138_v54 = vld [vmem:[%s7632_s1 + $0x270] sm:$0xff]  }
  0x7e   : > { %5805 = vmatprep.subr.bf16.mxu1 %v6079_v50 }
  0x7f   : > { %5366 = vmatpush3.bf16.msra.mxu0 %v6078_v55  ;;  %v6140_v55 = vld [vmem:[%s7632_s1 + $0x2a8] sm:$0xff]  }
  0x80   : > { %5367 = vmatprep.subr.bf16.mxu0 %v6082_v57  ;;  %v6142_v57 = vld [vmem:[%s7632_s1 + $0x2e8] sm:$0xff]  }
  0x81   : > { %5806 = vmatpush3.bf16.msra.mxu1 %v6079_v50  ;;  %v6135_v50 = vld [vmem:[%s6610_s13 + $0x38] ss:$12 sps:$4 sm:$0xff]  }
  0x82   : > { %908 = vmatmul.mubr.bf16.gmra.mxu0 %v4601_v59  ;;  %5807 = vmatprep.subr.bf16.mxu1 %v6086_v60  ;;  %v6149_v59 = vld [vmem:[%s6610_s13 + $0x68] ss:$12 sps:$4 sm:$0xff]  }
  0x83   : > { %5368 = vmatpush3.bf16.msra.mxu0 %v6084_v58  ;;  %915 = vmatprep.mubr.bf16.mxu0 %v4605_v0  ;;  %v6143_v58 = vld [vmem:[%s7632_s1 + $0x2a0] sm:$0xff]   ;;  %v1306_v0 = vld [vmem:[%s6610_s13 + $0x6c] sm:$0xff] }
  0x84   : > { %5369 = vmatprep.subr.bf16.mxu0 %v6087_v63  ;;  %v6146_v63 = vld [vmem:[%s7632_s1 + $0x298] sm:$0xff]   ;;  %v4725_v4 = vcombine.high %v6728_v62, %v1306_v0 }
  0x85   : > { %5808 = vmatpush3.bf16.msra.mxu1 %v6086_v60  ;;  %v6144_v60 = vld [vmem:[%s7632_s1 + $0x260] sm:$0xff]  }
  0x86   : > { %5809 = vmatprep.subr.bf16.mxu1 %v6089_v1 }
  0x87   : > { %5370 = vmatpush3.bf16.msra.mxu0 %v6088_v2  ;;  %v6150_v2 = vld [vmem:[%s7632_s1 + $0x2d8] sm:$0xff]  }
  0x88   : > { %5371 = vmatprep.subr.bf16.mxu0 %v6092_v3  ;;  %v6148_v3 = vld [vmem:[%s7632_s1 + $0x258] sm:$0xff]  }
  0x89   : > { %5810 = vmatpush3.bf16.msra.mxu1 %v6089_v1  ;;  %v6165_v1 = vld [vmem:[%s6922_s6 + $0x8] ss:$12 sps:$4 sm:$0xff]  }
  0x8a   : > { %916 = vmatmul.mubr.bf16.gmra.mxu0 %v4604_v5  ;;  %5811 = vmatprep.subr.bf16.mxu1 %v6094_v6  ;;  %v6151_v5 = vld [vmem:[%s7632_s1 + $0x290] sm:$0xff]  }
  0x8b   : > { %5372 = vmatpush3.bf16.msra.mxu0 %v6093_v7  ;;  %1194 = vmatprep.mubr.bf16.mxu0 %v4632_v8  ;;  %v6153_v7 = vld [vmem:[%s7632_s1 + $0x2d0] sm:$0xff]   ;;  %v6156_v8 = vld [vmem:[%s7632_s1 + $0x288] sm:$0xff]  }
  0x8c   : > { %5373 = vmatprep.subr.bf16.mxu0 %v6095_v9  ;;  %v1708_v9 = vld [vmem:[%s6922_s6] sm:$0xff] }
  0x8d   : > { %5812 = vmatpush3.bf16.msra.mxu1 %v6094_v6  ;;  %v6152_v6 = vld [vmem:[%s7632_s1 + $0x250] sm:$0xff]  }
  0x8e   : > { %5813 = vmatprep.subr.bf16.mxu1 %v6097_v10 }
  0x8f   : > { %5374 = vmatpush3.bf16.msra.mxu0 %v6096_v11  ;;  %v4724_v11 = vcombine.low %v6728_v62, %v1306_v0  ;;  %v6160_v62 = vld [vmem:[%s7632_s1 + $0x240] sm:$0xff]   ;;  %v6203_v0 = vld [vmem:[%s6922_s6 + $0x2c] ss:$12 sps:$4 sm:$0xff]  }
  0x90   : > { %5411 = vmatprep.subr.bf16.mxu0 %v6100_v12  ;;  %v6158_v12 = vld [vmem:[%s7632_s1 + $0x2c8] sm:$0xff]  }
  0x91   : > { %5814 = vmatpush3.bf16.msra.mxu1 %v6097_v10  ;;  %v6947_v10 = vld [vmem:[%s6922_s6 + $0xc] sm:$0xff] }
  0x92   : > { %1195 = vmatmul.mubr.bf16.vlgmr.msra.gmra.mxu0 %v4631_v13  ;;  %5823 = vmatprep.subr.bf16.mxu1 %v6102_v14  ;;  %v6157_v13 = vld [vmem:[%s7632_s1 + $0x248] sm:$0xff]  }
  0x93   : > { %5412 = vmatpush3.bf16.msra.mxu0 %v6101_v15  ;;  %1202 = vmatprep.mubr.bf16.mxu0 %v6775_v16  ;;  %v6159_v15 = vld [vmem:[%s7632_s1 + $0x280] sm:$0xff]  }
  0x94   : > { %5816 = vmatmul.mubr.bf16.vlgmr.msra.gmra.mxu1 %v4636_v17  ;;  %5413 = vmatprep.subr.bf16.mxu0 %v6103_v18  ;;  %v6164_v17 = vld [vmem:[%s7632_s1 + $0x378] sm:$0xff]  }
  0x95   : > { %5824 = vmatpush3.bf16.msra.mxu1 %v6102_v14  ;;  %5819 = vmatprep.mubr.bf16.mxu1 %v4639_v20  ;;  %v4801_v14 = vcombine.high %v1708_v9, %v6947_v10  ;;  %v6970_v18 = vld [vmem:[%s6922_s6 + $0x18] sm:$0xff]  ;;  %v6973_v20 = vld [vmem:[%s6922_s6 + $0x24] sm:$0xff] }
  0x96   : > { %5825 = vmatprep.subr.bf16.mxu1 %v6105_v21 }
  0x97   : > { %5414 = vmatpush3.bf16.msra.mxu0 %v6104_v22  ;;  %v4800_v22 = vcombine.low %v1708_v9, %v6947_v10  ;;  %v6212_v9 = vld [vmem:[%s7632_s1 + $0x468] sm:$0xff]  }
  0x98   : > { %5415 = vmatprep.subr.bf16.mxu0 %v6108_v23  ;;  %v6168_v23 = vld [vmem:[%s7632_s1 + $0x3b8] sm:$0xff]  }
  0x99   : > { %5826 = vmatpush3.bf16.msra.mxu1 %v6105_v21  ;;  %v6166_v21 = vld [vmem:[%s7632_s1 + $0x338] sm:$0xff]  }
  0x9a   : > { %1203 = vmatmul.mubr.bf16.gmra.mxu0 %v6796_v24  ;;  %5827 = vmatprep.subr.bf16.mxu1 %v6110_v25 }
  0x9b   : > { %5416 = vmatpush3.bf16.msra.mxu0 %v6109_v26  ;;  %1210 = vmatprep.mubr.bf16.mxu0 %v6806_v27  ;;  %v6169_v26 = vld [vmem:[%s7632_s1 + $0x370] sm:$0xff]  }
  0x9c   : > { %5417 = vmatprep.subr.bf16.mxu0 %v6111_v28  ;;  %5820 = vmatmul.mubr.bf16.gmra.mxu1 %v4642_v19  ;;  %v6170_v28 = vld [vmem:[%s7632_s1 + $0x330] sm:$0xff]  }
  0x9d   : > { %5828 = vmatpush3.bf16.msra.mxu1 %v6110_v25  ;;  %5839 = vmatprep.mubr.bf16.mxu1 %v6133_v37  ;;  %v6985_v25 = vcombine.high %v6970_v18, %v6973_v20  ;;  %v6171_v19 = vld [vmem:[%s7632_s1 + $0x3b0] sm:$0xff]  }
  0x9e   : > { %5829 = vmatprep.subr.bf16.mxu1 %v6113_v29 }
  0x9f   : > { %5418 = vmatpush3.bf16.msra.mxu0 %v6112_v30  ;;  %v7002_v30 = vld [vmem:[%s6922_s6 + $0x30] sm:$0xff] }
  0xa0   : > { %5419 = vmatprep.subr.bf16.mxu0 %v6116_v31  ;;  %v7005_v31 = vld [vmem:[%s6922_s6 + $0x3c] sm:$0xff] }
  0xa1   : > { %5830 = vmatpush3.bf16.msra.mxu1 %v6113_v29  ;;  %v6174_v29 = vld [vmem:[%s7632_s1 + $0x368] sm:$0xff]   ;;  %v7022_v37 = vcombine.high %v7002_v30, %v7005_v31 }
  0xa2   : > { %1211 = vmatmul.mubr.bf16.gmra.mxu0 %v6829_v33  ;;  %5831 = vmatprep.subr.bf16.mxu1 %v6118_v34 }
  0xa3   : > { %5420 = vmatpush3.bf16.msra.mxu0 %v6117_v32  ;;  %1218 = vmatprep.mubr.bf16.mxu0 %v6836_v36  ;;  %v6175_v32 = vld [vmem:[%s7632_s1 + $0x328] sm:$0xff]  }
  0xa4   : > { %5421 = vmatprep.subr.bf16.mxu0 %v6121_v38  ;;  %v6185_v38 = vld [vmem:[%s6922_s6 + $0x50] ss:$12 sps:$4 sm:$0xff]  }
  0xa5   : > { %5832 = vmatpush3.bf16.msra.mxu1 %v6118_v34  ;;  %v6176_v34 = vld [vmem:[%s7632_s1 + $0x3a8] sm:$0xff]  }
  0xa6   : > { %5833 = vmatprep.subr.bf16.mxu1 %v6123_v35 }
  0xa7   : > { %5422 = vmatpush3.bf16.msra.mxu0 %v6122_v39  ;;  %v6179_v39 = vld [vmem:[%s7632_s1 + $0x3a0] sm:$0xff]  }
  0xa8   : > { %5423 = vmatprep.subr.bf16.mxu0 %v6126_v40  ;;  %v6182_v40 = vld [vmem:[%s7632_s1 + $0x358] sm:$0xff]  }
  0xa9   : > { %5834 = vmatpush3.bf16.msra.mxu1 %v6123_v35  ;;  %v6178_v35 = vld [vmem:[%s7632_s1 + $0x320] sm:$0xff]  }
  0xaa   : > { %1219 = vmatmul.mubr.bf16.gmra.mxu0 %v6855_v41  ;;  %5835 = vmatprep.subr.bf16.mxu1 %v6128_v42 }
  0xab   : > { %5424 = vmatpush3.bf16.msra.mxu0 %v6127_v43  ;;  %1597 = vmatprep.mubr.bf16.mxu0 %v6775_v16  ;;  %v6161_v16 = vld [vmem:[%s7632_s1 + $0x2c0] sm:$0xff]   ;;  %v7041_v43 = vld [vmem:[%s6922_s6 + $0x54] sm:$0xff] }
  0xac   : > { %5425 = vmatprep.subr.bf16.mxu0 %v6129_v44  ;;  %v7045_v44 = vcombine.low %v7002_v30, %v7005_v31 }
  0xad   : > { %5836 = vmatpush3.bf16.msra.mxu1 %v6128_v42  ;;  %v7038_v42 = vld [vmem:[%s6922_s6 + $0x48] sm:$0xff] }
  0xae   : > { %5837 = vmatprep.subr.bf16.mxu1 %v6131_v45 }
  0xaf   : > { %5426 = vmatpush3.bf16.msra.mxu0 %v6130_v46  ;;  %v6184_v46 = vld [vmem:[%s7632_s1 + $0x318] sm:$0xff]  }
  0xb0   : > { %5463 = vmatprep.subr.bf16.mxu0 %v6132_v47  ;;  %v7055_v47 = vcombine.high %v7038_v42, %v7041_v43 }
  0xb1   : > { %5838 = vmatpush3.bf16.msra.mxu1 %v6131_v45  ;;  %v6186_v45 = vld [vmem:[%s7632_s1 + $0x398] sm:$0xff]  }
  0xb2   : > { %1598 = vmatmul.mubr.bf16.vlgmr.msra.gmra.mxu0 %v6796_v24  ;;  %5847 = vmatprep.subr.bf16.mxu1 %v6136_v49  ;;  %v6167_v24 = vld [vmem:[%s6922_s6 + $0x20] ss:$12 sps:$4 sm:$0xff]  }
  0xb3   : > { %5464 = vmatpush3.bf16.msra.mxu0 %v6134_v48  ;;  %1605 = vmatprep.mubr.bf16.mxu0 %v6806_v27  ;;  %v6183_v27 = vld [vmem:[%s6922_s6 + $0x38] ss:$12 sps:$4 sm:$0xff]   ;;  %v6187_v48 = vld [vmem:[%s7632_s1 + $0x350] sm:$0xff]  }
  0xb4   : > { %5840 = vmatmul.mubr.bf16.vlgmr.msra.gmra.mxu1 %v6135_v50  ;;  %5465 = vmatprep.subr.bf16.mxu0 %v6137_v51  ;;  %v6188_v50 = vld [vmem:[%s7632_s1 + $0x310] sm:$0xff]   ;;  %v6192_v51 = vld [vmem:[%s7632_s1 + $0x348] sm:$0xff]  }
  0xb5   : > { %5848 = vmatpush3.bf16.msra.mxu1 %v6136_v49  ;;  %5843 = vmatprep.mubr.bf16.mxu1 %v6147_v52  ;;  %v6189_v49 = vld [vmem:[%s7632_s1 + $0x390] sm:$0xff]   ;;  %v7073_v52 = vcombine.low %v7038_v42, %v7041_v43 }
  0xb6   : > { %5849 = vmatprep.subr.bf16.mxu1 %v6139_v53 }
  0xb7   : > { %5466 = vmatpush3.bf16.msra.mxu0 %v6138_v54  ;;  %v6193_v54 = vld [vmem:[%s7632_s1 + $0x308] sm:$0xff]  }
  0xb8   : > { %5467 = vmatprep.subr.bf16.mxu0 %v6140_v55  ;;  %v4885_v55 = vcombine.high %v6947_v10, %v6970_v18 }
  0xb9   : > { %5850 = vmatpush3.bf16.msra.mxu1 %v6139_v53  ;;  %v6194_v53 = vld [vmem:[%s7632_s1 + $0x388] sm:$0xff]  }
  0xba   : > { %1606 = vmatmul.mubr.bf16.gmra.mxu0 %v6829_v33  ;;  %5851 = vmatprep.subr.bf16.mxu1 %v6142_v57  ;;  %v7012_v33 = vcombine.low %v6970_v18, %v6973_v20 }
  0xbb   : > { %5468 = vmatpush3.bf16.msra.mxu0 %v6141_v56  ;;  %1613 = vmatprep.mubr.bf16.mxu0 %v6836_v36  ;;  %v6177_v36 = vld [vmem:[%s7632_s1 + $0x360] sm:$0xff]  }
  0xbc   : > { %5469 = vmatprep.subr.bf16.mxu0 %v6143_v58  ;;  %5844 = vmatmul.mubr.bf16.gmra.mxu1 %v6149_v59  ;;  %v6195_v56 = vld [vmem:[%s7632_s1 + $0x340] sm:$0xff]   ;;  %v6200_v59 = vld [vmem:[%s7632_s1 + $0x438] sm:$0xff]  }
  0xbd   : > { %5852 = vmatpush3.bf16.msra.mxu1 %v6142_v57  ;;  %5863 = vmatprep.mubr.bf16.mxu1 %v6165_v1  ;;  %v6197_v57 = vld [vmem:[%s7632_s1 + $0x380] sm:$0xff]   ;;  %v4888_v1 = vcombine.high %v6973_v20, %v7002_v30 }
  0xbe   : > { %5853 = vmatprep.subr.bf16.mxu1 %v6145_v61  ;;  %v6196_v58 = vld [vmem:[%s7632_s1 + $0x300] sm:$0xff]  }
  0xbf   : > { %5470 = vmatpush3.bf16.msra.mxu0 %v6144_v60  ;;  %v6202_v60 = vld [vmem:[%s7632_s1 + $0x3f8] sm:$0xff]  }
  0xc0   : > { %5471 = vmatprep.subr.bf16.mxu0 %v6146_v63  ;;  %v6204_v63 = vld [vmem:[%s7632_s1 + $0x478] sm:$0xff]  }
  0xc1   : > { %5854 = vmatpush3.bf16.msra.mxu1 %v6145_v61  ;;  %v4884_v61 = vcombine.low %v6947_v10, %v6970_v18  ;;  %v6213_v10 = vld [vmem:[%s7632_s1 + $0x420] sm:$0xff]   ;;  %v6222_v18 = vld [vmem:[%s7632_s1 + $0x458] sm:$0xff]  }
  0xc2   : > { %1614 = vmatmul.mubr.bf16.gmra.mxu0 %v6855_v41  ;;  %5855 = vmatprep.subr.bf16.mxu1 %v6150_v2  ;;  %v6201_v41 = vld [vmem:[%s6922_s6 + $0x14] ss:$12 sps:$4 sm:$0xff]  }
  0xc3   : > { %5472 = vmatpush3.bf16.msra.mxu0 %v6148_v3  ;;  %1621 = vmatprep.mubr.bf16.mxu0 %v4725_v4  ;;  %v6219_v3 = vld [vmem:[%s6922_s6 + $0x44] ss:$12 sps:$4 sm:$0xff]  }
  0xc4   : > { %5473 = vmatprep.subr.bf16.mxu0 %v6151_v5  ;;  %v6207_v4 = vld [vmem:[%s7632_s1 + $0x470] sm:$0xff]  }
  0xc5   : > { %5856 = vmatpush3.bf16.msra.mxu1 %v6150_v2  ;;  %v6205_v2 = vld [vmem:[%s7632_s1 + $0x430] sm:$0xff]  }
  0xc6   : > { %5857 = vmatprep.subr.bf16.mxu1 %v6153_v7  ;;  %v6206_v5 = vld [vmem:[%s7632_s1 + $0x3f0] sm:$0xff]  }
  0xc7   : > { %5474 = vmatpush3.bf16.msra.mxu0 %v6152_v6  ;;  %v6210_v6 = vld [vmem:[%s7632_s1 + $0x428] sm:$0xff]  }
  0xc8   : > { %5475 = vmatprep.subr.bf16.mxu0 %v6156_v8  ;;  %v4887_v8 = vcombine.low %v6973_v20, %v7002_v30  ;;  %v6220_v20 = vld [vmem:[%s7632_s1 + $0x3d8] sm:$0xff]   ;;  %v6233_v30 = vld [vmem:[%s7632_s1 + $0x440] sm:$0xff]  }
  0xc9   : > { %5858 = vmatpush3.bf16.msra.mxu1 %v6153_v7  ;;  %v6211_v7 = vld [vmem:[%s7632_s1 + $0x3e8] sm:$0xff]  }
  0xca   : > { %1622 = vmatmul.mubr.bf16.gmra.mxu0 %v4724_v11  ;;  %5859 = vmatprep.subr.bf16.mxu1 %v6158_v12  ;;  %v4891_v11 = vcombine.high %v7005_v31, %v7038_v42 }
  0xcb   : > { %5476 = vmatpush3.bf16.msra.mxu0 %v6157_v13  ;;  %2013 = vmatprep.mubr.bf16.mxu0 %v4801_v14  ;;  %v6214_v13 = vld [vmem:[%s7632_s1 + $0x3e0] sm:$0xff]  }
  0xcc   : > { %5477 = vmatprep.subr.bf16.mxu0 %v6159_v15  ;;  %v6235_v14 = vld [vmem:[%s6922_s6 + $0x20] ss:$12 sps:$4 sm:$0xff]  }
  0xcd   : > { %5860 = vmatpush3.bf16.msra.mxu1 %v6158_v12  ;;  %v6221_v12 = vld [vmem:[%s6922_s6 + $0x5c] ss:$12 sps:$4 sm:$0xff]   ;;  %v6215_v15 = vld [vmem:[%s7632_s1 + $0x460] sm:$0xff]  }
  0xce   : > { %5861 = vmatprep.subr.bf16.mxu1 %v6161_v16 }
  0xcf   : > { %5478 = vmatpush3.bf16.msra.mxu0 %v6160_v62  ;;  %v6218_v62 = vld [vmem:[%s7632_s1 + $0x418] sm:$0xff]  }
  0xd0   : > { %5515 = vmatprep.subr.bf16.mxu0 %v6164_v17  ;;  %v4890_v17 = vcombine.low %v7005_v31, %v7038_v42  ;;  %v6232_v31 = vld [vmem:[%s7632_s1 + $0x3c0] sm:$0xff]   ;;  %v6244_v42 = vld [vmem:[%s7632_s1 + $0x528] sm:$0xff]  }
  0xd1   : > { %5862 = vmatpush3.bf16.msra.mxu1 %v6161_v16  ;;  %v7145_v16 = vld [vmem:[%s6922_s6 + $0x60] sm:$0xff] }
  0xd2   : > { %2014 = vmatmul.mubr.bf16.vlgmr.msra.gmra.mxu0 %v4800_v22  ;;  %5871 = vmatprep.subr.bf16.mxu1 %v6168_v23  ;;  %v6223_v22 = vld [vmem:[%s7632_s1 + $0x410] sm:$0xff]  }
  0xd3   : > { %5516 = vmatpush3.bf16.msra.mxu0 %v6166_v21  ;;  %2021 = vmatprep.mubr.bf16.mxu0 %v6985_v25  ;;  %v4894_v21 = vcombine.high %v7041_v43, %v7145_v16 }
  0xd4   : > { %5864 = vmatmul.mubr.bf16.vlgmr.msra.gmra.mxu1 %v6167_v24  ;;  %5517 = vmatprep.subr.bf16.mxu0 %v6169_v26  ;;  %v6224_v24 = vld [vmem:[%s7632_s1 + $0x3d0] sm:$0xff]   ;;  %v6228_v26 = vld [vmem:[%s7632_s1 + $0x408] sm:$0xff]  }
  0xd5   : > { %5872 = vmatpush3.bf16.msra.mxu1 %v6168_v23  ;;  %5867 = vmatprep.mubr.bf16.mxu1 %v6183_v27  ;;  %v6225_v23 = vld [vmem:[%s7632_s1 + $0x450] sm:$0xff]   ;;  %v4893_v27 = vcombine.low %v7041_v43, %v7145_v16 }
  0xd6   : > { %5873 = vmatprep.subr.bf16.mxu1 %v6171_v19  ;;  %v6251_v43 = vld [vmem:[%s6922_s6 + $0x68] ss:$12 sps:$4 sm:$0xff]  }
  0xd7   : > { %5518 = vmatpush3.bf16.msra.mxu0 %v6170_v28  ;;  %v6230_v28 = vld [vmem:[%s7632_s1 + $0x448] sm:$0xff]  }
  0xd8   : > { %5519 = vmatprep.subr.bf16.mxu0 %v6174_v29  ;;  %v6231_v29 = vld [vmem:[%s7632_s1 + $0x400] sm:$0xff]  }
  0xd9   : > { %5874 = vmatpush3.bf16.msra.mxu1 %v6171_v19  ;;  %v6229_v19 = vld [vmem:[%s7632_s1 + $0x3c8] sm:$0xff]  }
  0xda   : > { %2022 = vmatmul.mubr.bf16.gmra.mxu0 %v7012_v33  ;;  %5875 = vmatprep.subr.bf16.mxu1 %v6176_v34 }
  0xdb   : > { %5520 = vmatpush3.bf16.msra.mxu0 %v6175_v32  ;;  %2029 = vmatprep.mubr.bf16.mxu0 %v7022_v37  ;;  %v6234_v32 = vld [vmem:[%s7632_s1 + $0x4f8] sm:$0xff]  }
  0xdc   : > { %5521 = vmatprep.subr.bf16.mxu0 %v6177_v36  ;;  %5868 = vmatmul.mubr.bf16.gmra.mxu1 %v6185_v38  ;;  %v6238_v36 = vld [vmem:[%s7632_s1 + $0x538] sm:$0xff]  }
  0xdd   : > { %5876 = vmatpush3.bf16.msra.mxu1 %v6176_v34  ;;  %5887 = vmatprep.mubr.bf16.mxu1 %v6201_v41  ;;  %v6236_v34 = vld [vmem:[%s7632_s1 + $0x4b8] sm:$0xff]   ;;  %v6243_v41 = vld [vmem:[%s7632_s1 + $0x4a8] sm:$0xff]  }
  0xde   : > { %5877 = vmatprep.subr.bf16.mxu1 %v6179_v39  ;;  %v6237_v38 = vld [vmem:[%s6922_s6 + $0x38] ss:$12 sps:$4 sm:$0xff]  }
  0xdf   : > { %5522 = vmatpush3.bf16.msra.mxu0 %v6178_v35  ;;  %v6249_v35 = vld [vmem:[%s6922_s6 + $0x50] ss:$12 sps:$4 sm:$0xff]  }
  0xe0   : > { %5523 = vmatprep.subr.bf16.mxu0 %v6182_v40  ;;  %v6240_v40 = vld [vmem:[%s7632_s1 + $0x4b0] sm:$0xff]  }
  0xe1   : > { %5878 = vmatpush3.bf16.msra.mxu1 %v6179_v39  ;;  %v6241_v39 = vld [vmem:[%s7632_s1 + $0x530] sm:$0xff]  }
  0xe2   : > { %2030 = vmatmul.mubr.bf16.gmra.mxu0 %v7045_v44  ;;  %5879 = vmatprep.subr.bf16.mxu1 %v6186_v45 }
  0xe3   : > { %5524 = vmatpush3.bf16.msra.mxu0 %v6184_v46  ;;  %2037 = vmatprep.mubr.bf16.mxu0 %v7055_v47  ;;  %v6246_v46 = vld [vmem:[%s7632_s1 + $0x4a0] sm:$0xff]  }
  0xe4   : > { %5525 = vmatprep.subr.bf16.mxu0 %v6187_v48  ;;  %v6247_v48 = vld [vmem:[%s7632_s1 + $0x520] sm:$0xff]  }
  0xe5   : > { %5880 = vmatpush3.bf16.msra.mxu1 %v6186_v45  ;;  %v6267_v45 = vld [vmem:[%s6541_s14 + $0x8] ss:$12 sps:$4 sm:$0xff]  }
  0xe6   : > { %5881 = vmatprep.subr.bf16.mxu1 %v6189_v49 }
  0xe7   : > { %5526 = vmatpush3.bf16.msra.mxu0 %v6188_v50  ;;  %v2544_v50 = vld [vmem:[%s6922_s6 + $0x6c] sm:$0xff] }
  0xe8   : > { %5527 = vmatprep.subr.bf16.mxu0 %v6192_v51  ;;  %v4978_v51 = vcombine.high %v7145_v16, %v2544_v50 }
  0xe9   : > { %5882 = vmatpush3.bf16.msra.mxu1 %v6189_v49  ;;  %v6248_v49 = vld [vmem:[%s7632_s1 + $0x4d8] sm:$0xff]  }
  0xea   : > { %2038 = vmatmul.mubr.bf16.gmra.mxu0 %v7073_v52  ;;  %5883 = vmatprep.subr.bf16.mxu1 %v6194_v53 }
  0xeb   : > { %5528 = vmatpush3.bf16.msra.mxu0 %v6193_v54  ;;  %2424 = vmatprep.mubr.bf16.mxu0 %v4885_v55  ;;  %v6254_v54 = vld [vmem:[%s7632_s1 + $0x490] sm:$0xff]  }
  0xec   : > { %5529 = vmatprep.subr.bf16.mxu0 %v6195_v56  ;;  %v6255_v55 = vld [vmem:[%s7632_s1 + $0x510] sm:$0xff]   ;;  %v6258_v56 = vld [vmem:[%s7632_s1 + $0x4c8] sm:$0xff]  }
  0xed   : > { %5884 = vmatpush3.bf16.msra.mxu1 %v6194_v53  ;;  %v6253_v53 = vld [vmem:[%s7632_s1 + $0x4d0] sm:$0xff]  }
  0xee   : > { %5885 = vmatprep.subr.bf16.mxu1 %v6197_v57 }
  0xef   : > { %5530 = vmatpush3.bf16.msra.mxu0 %v6196_v58  ;;  %v7257_v58 = vld [vmem:[%s6541_s14 + $0xc] sm:$0xff] }
  0xf0   : > { %5567 = vmatprep.subr.bf16.mxu0 %v6200_v59  ;;  %v4977_v59 = vcombine.low %v7145_v16, %v2544_v50  ;;  %v6286_v50 = vld [vmem:[%s7632_s1 + $0x558] sm:$0xff]  }
  0xf1   : > { %5886 = vmatpush3.bf16.msra.mxu1 %v6197_v57  ;;  %v2941_v57 = vld [vmem:[%s6541_s14] sm:$0xff] }
  0xf2   : > { %2425 = vmatmul.mubr.bf16.vlgmr.msra.gmra.mxu0 %v4884_v61  ;;  %5895 = vmatprep.subr.bf16.mxu1 %v6204_v63  ;;  %v5053_v61 = vcombine.high %v2941_v57, %v7257_v58 }
  0xf3   : > { %5568 = vmatpush3.bf16.msra.mxu0 %v6202_v60  ;;  %2432 = vmatprep.mubr.bf16.mxu0 %v4888_v1  ;;  %v6259_v60 = vld [vmem:[%s7632_s1 + $0x488] sm:$0xff]   ;;  %v6263_v1 = vld [vmem:[%s7632_s1 + $0x500] sm:$0xff]  }
  0xf4   : > { %5888 = vmatmul.mubr.bf16.vlgmr.msra.gmra.mxu1 %v6203_v0  ;;  %5569 = vmatprep.subr.bf16.mxu0 %v6205_v2  ;;  %v6262_v0 = vld [vmem:[%s7632_s1 + $0x480] sm:$0xff]   ;;  %v6266_v2 = vld [vmem:[%s7632_s1 + $0x5b8] sm:$0xff]  }
  0xf5   : > { %5896 = vmatpush3.bf16.msra.mxu1 %v6204_v63  ;;  %5891 = vmatprep.mubr.bf16.mxu1 %v6219_v3  ;;  %v6261_v63 = vld [vmem:[%s7632_s1 + $0x4c0] sm:$0xff]   ;;  %v7280_v3 = vld [vmem:[%s6541_s14 + $0x18] sm:$0xff] }
  0xf6   : > { %5897 = vmatprep.subr.bf16.mxu1 %v6207_v4 }
  0xf7   : > { %5570 = vmatpush3.bf16.msra.mxu0 %v6206_v5  ;;  %v6268_v5 = vld [vmem:[%s7632_s1 + $0x578] sm:$0xff]  }
  0xf8   : > { %5571 = vmatprep.subr.bf16.mxu0 %v6210_v6  ;;  %v5052_v6 = vcombine.low %v2941_v57, %v7257_v58 }
  0xf9   : > { %5898 = vmatpush3.bf16.msra.mxu1 %v6207_v4  ;;  %v7283_v4 = vld [vmem:[%s6541_s14 + $0x24] sm:$0xff] }
  0xfa   : > { %2433 = vmatmul.mubr.bf16.gmra.mxu0 %v4887_v8  ;;  %5899 = vmatprep.subr.bf16.mxu1 %v6212_v9  ;;  %v6270_v8 = vld [vmem:[%s7632_s1 + $0x5f8] sm:$0xff]  }
  0xfb   : > { %5572 = vmatpush3.bf16.msra.mxu0 %v6211_v7  ;;  %2440 = vmatprep.mubr.bf16.mxu0 %v4891_v11  ;;  %v6269_v7 = vld [vmem:[%s6541_s14 + $0x20] ss:$12 sps:$4 sm:$0xff]   ;;  %v6273_v11 = vld [vmem:[%s7632_s1 + $0x5f0] sm:$0xff]  }
  0xfc   : > { %5573 = vmatprep.subr.bf16.mxu0 %v6213_v10  ;;  %5892 = vmatmul.mubr.bf16.gmra.mxu1 %v6221_v12  ;;  %v7298_v10 = vcombine.high %v7280_v3, %v7283_v4  ;;  %v6272_v12 = vld [vmem:[%s7632_s1 + $0x570] sm:$0xff]  }
  0xfd   : > { %5900 = vmatpush3.bf16.msra.mxu1 %v6212_v9  ;;  %5911 = vmatprep.mubr.bf16.mxu1 %v6235_v14  ;;  %v6271_v9 = vld [vmem:[%s7632_s1 + $0x5b0] sm:$0xff]  }
  0xfe   : > { %5901 = vmatprep.subr.bf16.mxu1 %v6215_v15 }
  0xff   : > { %5574 = vmatpush3.bf16.msra.mxu0 %v6214_v13  ;;  %v6285_v13 = vld [vmem:[%s6541_s14 + $0x38] ss:$12 sps:$4 sm:$0xff]  }
 0x100   : > { %5575 = vmatprep.subr.bf16.mxu0 %v6218_v62  ;;  %v7312_v62 = vld [vmem:[%s6541_s14 + $0x30] sm:$0xff] }
 0x101   : > { %5902 = vmatpush3.bf16.msra.mxu1 %v6215_v15  ;;  %v6276_v15 = vld [vmem:[%s7632_s1 + $0x5a8] sm:$0xff]  }
 0x102   : > { %2441 = vmatmul.mubr.bf16.gmra.mxu0 %v4890_v17  ;;  %5903 = vmatprep.subr.bf16.mxu1 %v6222_v18 }
 0x103   : > { %5576 = vmatpush3.bf16.msra.mxu0 %v6220_v20  ;;  %2448 = vmatprep.mubr.bf16.mxu0 %v4894_v21  ;;  %v6277_v21 = vld [vmem:[%s7632_s1 + $0x568] sm:$0xff]  }
 0x104   : > { %5577 = vmatprep.subr.bf16.mxu0 %v6223_v22 }
 0x105   : > { %5904 = vmatpush3.bf16.msra.mxu1 %v6222_v18  ;;  %v7315_v18 = vld [vmem:[%s6541_s14 + $0x3c] sm:$0xff] }
 0x106   : > { %5905 = vmatprep.subr.bf16.mxu1 %v6225_v23 }
 0x107   : > { %5578 = vmatpush3.bf16.msra.mxu0 %v6224_v24  ;;  %v7322_v24 = vcombine.low %v7280_v3, %v7283_v4 }
 0x108   : > { %5579 = vmatprep.subr.bf16.mxu0 %v6228_v26  ;;  %v6278_v26 = vld [vmem:[%s7632_s1 + $0x5e8] sm:$0xff]  }
 0x109   : > { %5906 = vmatpush3.bf16.msra.mxu1 %v6225_v23 }
 0x10a   : > { %2449 = vmatmul.mubr.bf16.gmra.mxu0 %v4893_v27  ;;  %5907 = vmatprep.subr.bf16.mxu1 %v6230_v28 }
 0x10b   : > { %5580 = vmatpush3.bf16.msra.mxu0 %v6229_v19  ;;  %2835 = vmatprep.mubr.bf16.mxu0 %v6985_v25  ;;  %v6239_v25 = vld [vmem:[%s7632_s1 + $0x4f0] sm:$0xff]   ;;  %v7334_v19 = vcombine.high %v7312_v62, %v7315_v18 }
 0x10c   : > { %5581 = vmatprep.subr.bf16.mxu0 %v6231_v29 }
 0x10d   : > { %5908 = vmatpush3.bf16.msra.mxu1 %v6230_v28  ;;  %v6279_v28 = vld [vmem:[%s7632_s1 + $0x5a0] sm:$0xff]  }
 0x10e   : > { %5909 = vmatprep.subr.bf16.mxu1 %v6233_v30 }
 0x10f   : > { %5582 = vmatpush3.bf16.msra.mxu0 %v6232_v31  ;;  %v6281_v31 = vld [vmem:[%s7632_s1 + $0x5e0] sm:$0xff]  }
 0x110   : > { %5619 = vmatprep.subr.bf16.mxu0 %v6234_v32  ;;  %v6287_v32 = vld [vmem:[%s6541_s14 + $0x50] ss:$12 sps:$4 sm:$0xff]  }
 0x111   : > { %5910 = vmatpush3.bf16.msra.mxu1 %v6233_v30 }
 0x112   : > { %2836 = vmatmul.mubr.bf16.vlgmr.msra.gmra.mxu0 %v7012_v33  ;;  %5919 = vmatprep.subr.bf16.mxu1 %v6238_v36  ;;  %v6242_v33 = vld [vmem:[%s7632_s1 + $0x4e8] sm:$0xff]  }
 0x113   : > { %5620 = vmatpush3.bf16.msra.mxu0 %v6236_v34  ;;  %2843 = vmatprep.mubr.bf16.mxu0 %v7022_v37  ;;  %v6245_v37 = vld [vmem:[%s7632_s1 + $0x4e0] sm:$0xff]  }
 0x114   : > { %5912 = vmatmul.mubr.bf16.vlgmr.msra.gmra.mxu1 %v6237_v38  ;;  %5621 = vmatprep.subr.bf16.mxu0 %v6239_v25  ;;  %v6303_v38 = vld [vmem:[%s6541_s14 + $0x14] ss:$12 sps:$4 sm:$0xff]  }
 0x115   : > { %5920 = vmatpush3.bf16.msra.mxu1 %v6238_v36  ;;  %5915 = vmatprep.mubr.bf16.mxu1 %v6249_v35  ;;  %v6280_v36 = vld [vmem:[%s7632_s1 + $0x560] sm:$0xff]  }
 0x116   : > { %5921 = vmatprep.subr.bf16.mxu1 %v6241_v39 }
 0x117   : > { %5622 = vmatpush3.bf16.msra.mxu0 %v6240_v40 }
 0x118   : > { %5623 = vmatprep.subr.bf16.mxu0 %v6242_v33  ;;  %v7352_v33 = vld [vmem:[%s6541_s14 + $0x48] sm:$0xff] }
 0x119   : > { %5922 = vmatpush3.bf16.msra.mxu1 %v6241_v39  ;;  %v6284_v39 = vld [vmem:[%s7632_s1 + $0x598] sm:$0xff]  }
 0x11a   : > { %2844 = vmatmul.mubr.bf16.gmra.mxu0 %v7045_v44  ;;  %5923 = vmatprep.subr.bf16.mxu1 %v6244_v42  ;;  %v6252_v44 = vld [vmem:[%s7632_s1 + $0x518] sm:$0xff]  }
 0x11b   : > { %5624 = vmatpush3.bf16.msra.mxu0 %v6243_v41  ;;  %2851 = vmatprep.mubr.bf16.mxu0 %v7055_v47  ;;  %v6250_v47 = vld [vmem:[%s7632_s1 + $0x498] sm:$0xff]  }
 0x11c   : > { %5625 = vmatprep.subr.bf16.mxu0 %v6245_v37  ;;  %5916 = vmatmul.mubr.bf16.gmra.mxu1 %v6251_v43 }
 0x11d   : > { %5924 = vmatpush3.bf16.msra.mxu1 %v6244_v42  ;;  %5935 = vmatprep.mubr.bf16.mxu1 %v6267_v45  ;;  %v7355_v42 = vld [vmem:[%s6541_s14 + $0x54] sm:$0xff]  ;;  %v7359_v45 = vcombine.low %v7312_v62, %v7315_v18 }
 0x11e   : > { %5925 = vmatprep.subr.bf16.mxu1 %v6247_v48 }
 0x11f   : > { %5626 = vmatpush3.bf16.msra.mxu0 %v6246_v46 }
 0x120   : > { %5627 = vmatprep.subr.bf16.mxu0 %v6248_v49 }
 0x121   : > { %5926 = vmatpush3.bf16.msra.mxu1 %v6247_v48  ;;  %v6288_v48 = vld [vmem:[%s7632_s1 + $0x5d8] sm:$0xff]  }
 0x122   : > { %2852 = vmatmul.mubr.bf16.gmra.mxu0 %v7073_v52  ;;  %5927 = vmatprep.subr.bf16.mxu1 %v6252_v44  ;;  %v6260_v52 = vld [vmem:[%s7632_s1 + $0x508] sm:$0xff]  }
 0x123   : > { %5628 = vmatpush3.bf16.msra.mxu0 %v6250_v47  ;;  %2859 = vmatprep.mubr.bf16.mxu0 %v4978_v51 }
 0x124   : > { %5629 = vmatprep.subr.bf16.mxu0 %v6253_v53  ;;  %v6289_v53 = vld [vmem:[%s7632_s1 + $0x590] sm:$0xff]  }
 0x125   : > { %5928 = vmatpush3.bf16.msra.mxu1 %v6252_v44  ;;  %v7371_v44 = vcombine.high %v7352_v33, %v7355_v42 }
 0x126   : > { %5929 = vmatprep.subr.bf16.mxu1 %v6255_v55 }
 0x127   : > { %5630 = vmatpush3.bf16.msra.mxu0 %v6254_v54 }
 0x128   : > { %5631 = vmatprep.subr.bf16.mxu0 %v6258_v56  ;;  %v6291_v56 = vld [vmem:[%s7632_s1 + $0x5d0] sm:$0xff]  }
 0x129   : > { %5930 = vmatpush3.bf16.msra.mxu1 %v6255_v55 }
 0x12a   : > { %2860 = vmatmul.mubr.bf16.gmra.mxu0 %v4977_v59  ;;  %5931 = vmatprep.subr.bf16.mxu1 %v6260_v52  ;;  %v6290_v59 = vld [vmem:[%s7632_s1 + $0x550] sm:$0xff]  }
 0x12b   : > { %5632 = vmatpush3.bf16.msra.mxu0 %v6259_v60  ;;  %3246 = vmatprep.mubr.bf16.mxu0 %v5053_v61  ;;  %v6294_v61 = vld [vmem:[%s7632_s1 + $0x588] sm:$0xff]  }
 0x12c   : > { %5633 = vmatprep.subr.bf16.mxu0 %v6261_v63 }
 0x12d   : > { %5932 = vmatpush3.bf16.msra.mxu1 %v6260_v52 }
 0x12e   : > { %5933 = vmatprep.subr.bf16.mxu1 %v6263_v1 }
 0x12f   : > { %5634 = vmatpush3.bf16.msra.mxu0 %v6262_v0 }
 0x130   : > { %5671 = vmatprep.subr.bf16.mxu0 %v6266_v2  ;;  %v6296_v2 = vld [vmem:[%s7632_s1 + $0x5c8] sm:$0xff]  }
 0x131   : > { %5934 = vmatpush3.bf16.msra.mxu1 %v6263_v1  ;;  %v7391_v1 = vcombine.low %v7352_v33, %v7355_v42 }
 0x132   : > { %v5323_v14 = vpop.f32.mrf.mxu0  ;;  %3247 = vmatmul.mubr.bf16.vlgmr.msra.gmra.mxu0 %v5052_v6  ;;  %5943 = vmatprep.subr.bf16.mxu1 %v6270_v8  ;;  %v6295_v6 = vld [vmem:[%s7632_s1 + $0x548] sm:$0xff]  }
 0x133   : > { %5672 = vmatpush3.bf16.msra.mxu0 %v6268_v5  ;;  %3254 = vmatprep.mubr.bf16.mxu0 %v7298_v10 }
 0x134   : > { %v5324_v16 = vpop.f32.mrf.mxu0  ;;  %v5793_v17 = vpop.f32.mrf.mxu1  ;;  %5936 = vmatmul.mubr.bf16.vlgmr.msra.gmra.mxu1 %v6269_v7  ;;  %5673 = vmatprep.subr.bf16.mxu0 %v6271_v9  ;;  %v5137_v7 = vcombine.high %v7257_v58, %v7280_v3 }
 0x135   : > { %v5325_v20 = vadd.f32 %v5324_v16, %v5323_v14  ;;  %5944 = vmatpush3.bf16.msra.mxu1 %v6270_v8  ;;  %5939 = vmatprep.mubr.bf16.mxu1 %v6285_v13  ;;  %v6299_v14 = vld [vmem:[%s7632_s1 + $0x5c0] sm:$0xff]  }
 0x136   : > { %v5326_v22 = vpop.f32.mrf.mxu0  ;;  %v958_v23 = vpop.f32.mrf.mxu1  ;;  %5945 = vmatprep.subr.bf16.mxu1 %v6273_v11  ;;  %v6298_v16 = vld [vmem:[%s7632_s1 + $0x540] sm:$0xff]  }
 0x137   : > { %v7327_v27 = vadd.f32 %v5325_v20, %v958_v23  ;;  %5674 = vmatpush3.bf16.msra.mxu0 %v6272_v12  ;;  %v6302_v20 = vld [vmem:[%s7632_s1 + $0x678] sm:$0xff]   ;;  %v5136_v23 = vcombine.low %v7257_v58, %v7280_v3  ;;  %v6307_v58 = vld [vmem:[%s7632_s1 + $0x670] sm:$0xff]  }
 0x138   : > { %v5327_v29 = vpop.f32.mrf.mxu0  ;;  %v5794_v30 = vpop.f32.mrf.mxu1  ;;  %5675 = vmatprep.subr.bf16.mxu0 %v6276_v15 }
 0x139   : > { %v5328_v34 = vadd.f32 %v5327_v29, %v5326_v22  ;;  %5946 = vmatpush3.bf16.msra.mxu1 %v6273_v11  ;;  %v6297_v11 = vld [vmem:[%s7632_s1 + $0x580] sm:$0xff]   ;;  %v6304_v29 = vld [vmem:[%s7632_s1 + $0x638] sm:$0xff]  }
 0x13a   : > { %v5329_v25 = vpop.f32.mrf.mxu0  ;;  %v961_v35 = vpop.f32.mrf.mxu1  ;;  %3255 = vmatmul.mubr.bf16.gmra.mxu0 %v7322_v24  ;;  %5947 = vmatprep.subr.bf16.mxu1 %v6278_v26 }
 0x13b   : > { %v7348_v40 = vadd.f32 %v5328_v34, %v961_v35  ;;  %5676 = vmatpush3.bf16.msra.mxu0 %v6277_v21  ;;  %3262 = vmatprep.mubr.bf16.mxu0 %v7334_v19  ;;  %v6321_v34 = vld [vmem:[%s6541_s14 + $0x44] ss:$12 sps:$4 sm:$0xff]  }
 0x13c   : > { %v5330_v41 = vpop.f32.mrf.mxu0  ;;  %5677 = vmatprep.subr.bf16.mxu0 %v6279_v28  ;;  %5940 = vmatmul.mubr.bf16.gmra.mxu1 %v6287_v32  ;;  %v5797_v46 = vpop.f32.mrf.mxu1  ;;  %v6305_v32 = vld [vmem:[%s6541_s14 + $0x2c] ss:$12 sps:$4 sm:$0xff]   ;;  %v6308_v35 = vld [vmem:[%s7632_s1 + $0x630] sm:$0xff]  }
 0x13d   : > { %v5331_v37 = vadd.f32 %v5330_v41, %v5329_v25  ;;  %5948 = vmatpush3.bf16.msra.mxu1 %v6278_v26  ;;  %5959 = vmatprep.mubr.bf16.mxu1 %v6303_v38  ;;  %v6306_v26 = vld [vmem:[%s7632_s1 + $0x6b8] sm:$0xff]   ;;  %v6309_v38 = vld [vmem:[%s7632_s1 + $0x6b0] sm:$0xff]  }
 0x13e   : > { %v5332_v43 = vpop.f32.mrf.mxu0  ;;  %5949 = vmatprep.subr.bf16.mxu1 %v6281_v31  ;;  %v974_v51 = vpop.f32.mrf.mxu1 }
 0x13f   : > { %v7364_v49 = vadd.f32 %v5793_v17, %v5331_v37  ;;  %5678 = vmatpush3.bf16.msra.mxu0 %v6280_v36  ;;  %v6312_v37 = vld [vmem:[%s7632_s1 + $0x668] sm:$0xff]  }
 0x140   : > { %v5333_v47 = vpop.f32.mrf.mxu0  ;;  %5679 = vmatprep.subr.bf16.mxu0 %v6284_v39  ;;  %v5798_v60 = vpop.f32.mrf.mxu1 }
 0x141   : > { %v5334_v54 = vadd.f32 %v5333_v47, %v5332_v43  ;;  %5950 = vmatpush3.bf16.msra.mxu1 %v6281_v31  ;;  %v6314_v47 = vld [vmem:[%s7632_s1 + $0x6a8] sm:$0xff]  }
 0x142   : > { %v5335_v55 = vpop.f32.mrf.mxu0  ;;  %3263 = vmatmul.mubr.bf16.gmra.mxu0 %v7359_v45  ;;  %5951 = vmatprep.subr.bf16.mxu1 %v6288_v48  ;;  %v977_v9 = vpop.f32.mrf.mxu1 }
 0x143   : > { %v7380_v57 = vadd.f32 %v5794_v30, %v5334_v54  ;;  %5680 = vmatpush3.bf16.msra.mxu0 %v6286_v50  ;;  %3270 = vmatprep.mubr.bf16.mxu0 %v7371_v44  ;;  %v5140_v30 = vcombine.high %v7283_v4, %v7312_v62  ;;  %v5139_v50 = vcombine.low %v7283_v4, %v7312_v62  ;;  %v6315_v4 = vld [vmem:[%s7632_s1 + $0x660] sm:$0xff]   ;;  %v6323_v62 = vld [vmem:[%s6541_s14 + $0x5c] ss:$12 sps:$4 sm:$0xff]  }
 0x144   : > { %v5336_v52 = vpop.f32.mrf.mxu0  ;;  %5681 = vmatprep.subr.bf16.mxu0 %v6289_v53  ;;  %v6313_v53 = vld [vmem:[%s7632_s1 + $0x628] sm:$0xff]   ;;  %v5143_v54 = vcombine.high %v7315_v18, %v7352_v33 }
 0x145   : > { %v5337_v63 = vadd.f32 %v5336_v52, %v5335_v55  ;;  %5952 = vmatpush3.bf16.msra.mxu1 %v6288_v48 }
 0x146   : > { %v5338_v0 = vpop.f32.mrf.mxu0  ;;  %5953 = vmatprep.subr.bf16.mxu1 %v6291_v56 }
 0x147   : > { %v7396_v5 = vadd.f32 %v5337_v63, %v974_v51  ;;  %5682 = vmatpush3.bf16.msra.mxu0 %v6290_v59  ;;  %v6317_v63 = vld [vmem:[%s7632_s1 + $0x6a0] sm:$0xff]  }
 0x148   : > { %v5339_v8 = vpop.f32.mrf.mxu0  ;;  %5683 = vmatprep.subr.bf16.mxu0 %v6294_v61 }
 0x149   : > { %v5340_v12 = vadd.f32 %v5339_v8, %v5338_v0  ;;  %5954 = vmatpush3.bf16.msra.mxu1 %v6291_v56  ;;  %v7475_v8 = vld [vmem:[%s6541_s14 + $0x60] sm:$0xff] }
 0x14a   : > { %v5341_v13 = vpop.f32.mrf.mxu0  ;;  %3271 = vmatmul.mubr.bf16.gmra.mxu0 %v7391_v1  ;;  %5955 = vmatprep.subr.bf16.mxu1 %v6296_v2 }
 0x14b   : > { %v7410_v15 = vadd.f32 %v5340_v12, %v977_v9  ;;  %5684 = vmatpush3.bf16.msra.mxu0 %v6295_v6  ;;  %3657 = vmatprep.mubr.bf16.mxu0 %v5137_v7  ;;  %v6320_v7 = vld [vmem:[%s7632_s1 + $0x658] sm:$0xff]   ;;  %v5142_v12 = vcombine.low %v7315_v18, %v7352_v33  ;;  %v6325_v18 = vld [vmem:[%s7632_s1 + $0x650] sm:$0xff]  }
 0x14c   : > { %v5342_v17 = vpop.f32.mrf.mxu0  ;;  %5685 = vmatprep.subr.bf16.mxu0 %v6297_v11 }
 0x14d   : > { %v5343_v21 = vadd.f32 %v5342_v17, %v5341_v13  ;;  %5956 = vmatpush3.bf16.msra.mxu1 %v6296_v2  ;;  %v6316_v2 = vld [vmem:[%s7632_s1 + $0x620] sm:$0xff]   ;;  %v6324_v13 = vld [vmem:[%s7632_s1 + $0x698] sm:$0xff]  }
 0x14e   : > { %v5344_v22 = vpop.f32.mrf.mxu0  ;;  %5957 = vmatprep.subr.bf16.mxu1 %v6299_v14  ;;  %v6322_v17 = vld [vmem:[%s7632_s1 + $0x618] sm:$0xff]  }
 0x14f   : > { %v7423_v28 = vadd.f32 %v5797_v46, %v5343_v21  ;;  %5686 = vmatpush3.bf16.msra.mxu0 %v6298_v16 }
 0x150   : > { %v5345_v31 = vpop.f32.mrf.mxu0  ;;  %5723 = vmatprep.subr.bf16.mxu0 %v6302_v20  ;;  %v5146_v20 = vcombine.high %v7355_v42, %v7475_v8 }
 0x151   : > { %v5346_v3 = vadd.f32 %v5345_v31, %v5344_v22  ;;  %5958 = vmatpush3.bf16.msra.mxu1 %v6299_v14 }
 0x152   : > { %v5375_v36 = vpop.f32.mrf.mxu0  ;;  %3658 = vmatmul.mubr.bf16.vlgmr.msra.gmra.mxu0 %v5136_v23  ;;  %5967 = vmatprep.subr.bf16.mxu1 %v6306_v26 }
 0x153   : > { %v7438_v25 = vadd.f32 %v5798_v60, %v5346_v3  ;;  %5724 = vmatpush3.bf16.msra.mxu0 %v6304_v29  ;;  %3665 = vmatprep.mubr.bf16.mxu0 %v5140_v30  ;;  %v6326_v30 = vld [vmem:[%s7632_s1 + $0x610] sm:$0xff]  }
 0x154   : > { %v5376_v39 = vpop.f32.mrf.mxu0  ;;  %5960 = vmatmul.mubr.bf16.vlgmr.msra.gmra.mxu1 %v6305_v32  ;;  %v5817_v41 = vpop.f32.mrf.mxu1  ;;  %5725 = vmatprep.subr.bf16.mxu0 %v6307_v58  ;;  %v6330_v32 = vld [vmem:[%s7632_s1 + $0x648] sm:$0xff]  }
 0x155   : > { %v5377_v43 = vadd.f32 %v5376_v39, %v5375_v36  ;;  %5968 = vmatpush3.bf16.msra.mxu1 %v6306_v26  ;;  %5963 = vmatprep.mubr.bf16.mxu1 %v6321_v34  ;;  %v6327_v26 = vld [vmem:[%s7632_s1 + $0x690] sm:$0xff]   ;;  %v6331_v39 = vld [vmem:[%s7632_s1 + $0x608] sm:$0xff]  }
 0x156   : > { %v5378_v46 = vpop.f32.mrf.mxu0  ;;  %v1261_v48 = vpop.f32.mrf.mxu1  ;;  %5969 = vmatprep.subr.bf16.mxu1 %v6309_v38 }
 0x157   : > { %5726 = vmatpush3.bf16.msra.mxu0 %v6308_v35  ;;  %v1197_v51 = vadd.f32 %v5377_v43, %v7327_v27  ;;  %v6336_v27 = vld [vmem:[%s6541_s14 + $0x20] ss:$12 sps:$4 sm:$0xff]  }
 0x158   : > { %v5379_v55 = vpop.f32.mrf.mxu0  ;;  %v5818_v56 = vpop.f32.mrf.mxu1  ;;  %5727 = vmatprep.subr.bf16.mxu0 %v6312_v37  ;;  %v6333_v37 = vld [vmem:[%s7632_s1 + $0x640] sm:$0xff]  }
 0x159   : > { %v5380_v59 = vadd.f32 %v5379_v55, %v5378_v46  ;;  %v7461_v52 = vadd.f32 %v1261_v48, %v1197_v51  ;;  %5970 = vmatpush3.bf16.msra.mxu1 %v6309_v38  ;;  %v6332_v38 = vld [vmem:[%s7632_s1 + $0x688] sm:$0xff]  }
 0x15a   : > { %v5381_v60 = vpop.f32.mrf.mxu0  ;;  %3666 = vmatmul.mubr.bf16.gmra.mxu0 %v5139_v50  ;;  %v1264_v61 = vpop.f32.mrf.mxu1  ;;  %5971 = vmatprep.subr.bf16.mxu1 %v6314_v47 }
 0x15b   : > { %5728 = vmatpush3.bf16.msra.mxu0 %v6313_v53  ;;  %v1200_v0 = vadd.f32 %v5380_v59, %v7348_v40  ;;  %3673 = vmatprep.mubr.bf16.mxu0 %v5143_v54 }
 0x15c   : > { %v5382_v6 = vpop.f32.mrf.mxu0  ;;  %5729 = vmatprep.subr.bf16.mxu0 %v6315_v4  ;;  %5964 = vmatmul.mubr.bf16.gmra.mxu1 %v6323_v62  ;;  %v5821_v14 = vpop.f32.mrf.mxu1 }
 0x15d   : > { %v5383_v9 = vadd.f32 %v5382_v6, %v5381_v60  ;;  %v7477_v11 = vadd.f32 %v1264_v61, %v1200_v0  ;;  %5972 = vmatpush3.bf16.msra.mxu1 %v6314_v47  ;;  %5983 = vmatprep.mubr.bf16.mxu1 %v6336_v27  ;;  %v6334_v47 = vld [vmem:[%s7632_s1 + $0x600] sm:$0xff]   ;;  %v6338_v27 = vld [vmem:[%s6541_s14 + $0x50] ss:$12 sps:$4 sm:$0xff]  }
 0x15e   : > { %v5384_v40 = vpop.f32.mrf.mxu0  ;;  %5973 = vmatprep.subr.bf16.mxu1 %v6317_v63 }
 0x15f   : > { %v1205_v16 = vadd.f32 %v5383_v9, %v7364_v49  ;;  %5730 = vmatpush3.bf16.msra.mxu0 %v6316_v2  ;;  %v1277_v49 = vpop.f32.mrf.mxu1 }
 0x160   : > { %v5385_v21 = vpop.f32.mrf.mxu0  ;;  %5731 = vmatprep.subr.bf16.mxu0 %v6320_v7 }
 0x161   : > { %v7493_v33 = vadd.f32 %v5817_v41, %v1205_v16  ;;  %v5386_v22 = vadd.f32 %v5385_v21, %v5384_v40  ;;  %5974 = vmatpush3.bf16.msra.mxu1 %v6317_v63  ;;  %v5822_v36 = vpop.f32.mrf.mxu1 }
 0x162   : > { %v5387_v23 = vpop.f32.mrf.mxu0  ;;  %3674 = vmatmul.mubr.bf16.gmra.mxu0 %v5142_v12  ;;  %5975 = vmatprep.subr.bf16.mxu1 %v6324_v13  ;;  %v6339_v12 = vld [vmem:[%s6541_s14 + $0x68] ss:$12 sps:$4 sm:$0xff]  }
 0x163   : > { %v1208_v29 = vadd.f32 %v5386_v22, %v7380_v57  ;;  %5732 = vmatpush3.bf16.msra.mxu0 %v6322_v17  ;;  %3681 = vmatprep.mubr.bf16.mxu0 %v5146_v20  ;;  %v5145_v57 = vcombine.low %v7355_v42, %v7475_v8  ;;  %v1280_v48 = vpop.f32.mrf.mxu1  ;;  %v3777_v20 = vld [vmem:[%s6541_s14 + $0x6c] sm:$0xff] }
 0x164   : > { %v5388_v31 = vpop.f32.mrf.mxu0  ;;  %5733 = vmatprep.subr.bf16.mxu0 %v6325_v18 }
 0x165   : > { %v7505_v58 = vadd.f32 %v5818_v56, %v1208_v29  ;;  %v5389_v3 = vadd.f32 %v5388_v31, %v5387_v23  ;;  %5976 = vmatpush3.bf16.msra.mxu1 %v6324_v13 }
 0x166   : > { %v5390_v34 = vpop.f32.mrf.mxu0  ;;  %5977 = vmatprep.subr.bf16.mxu1 %v6327_v26 }
 0x167   : > { %5734 = vmatpush3.bf16.msra.mxu0 %v6326_v30  ;;  %v1213_v35 = vadd.f32 %v5389_v3, %v7396_v5  ;;  %v6335_v5 = vld [vmem:[%s7632_s1 + $0x680] sm:$0xff]  }
 0x168   : > { %v5391_v41 = vpop.f32.mrf.mxu0  ;;  %5735 = vmatprep.subr.bf16.mxu0 %v6330_v32 }
 0x169   : > { %v5392_v43 = vadd.f32 %v5391_v41, %v5390_v34  ;;  %v7519_v42 = vadd.f32 %v1277_v49, %v1213_v35  ;;  %5978 = vmatpush3.bf16.msra.mxu1 %v6327_v26  ;;  %v5230_v49 = vcombine.high %v7475_v8, %v3777_v20 }
 0x16a   : > { %v5393_v46 = vpop.f32.mrf.mxu0  ;;  %3682 = vmatmul.mubr.bf16.gmra.mxu0 %v5145_v57  ;;  %5979 = vmatprep.subr.bf16.mxu1 %v6332_v38  ;;  %v5229_v57 = vcombine.low %v7475_v8, %v3777_v20 }
 0x16b   : > { %5736 = vmatpush3.bf16.msra.mxu0 %v6331_v39  ;;  %v1216_v50 = vadd.f32 %v5392_v43, %v7410_v15  ;;  %4068 = vmatprep.mubr.bf16.mxu0 %v7298_v10  ;;  %v6337_v15 = vld [vmem:[%s6541_s14 + $0x38] ss:$12 sps:$4 sm:$0xff]  }
 0x16c   : > { %v5394_v51 = vpop.f32.mrf.mxu0  ;;  %5737 = vmatprep.subr.bf16.mxu0 %v6333_v37 }
 0x16d   : > { %v5395_v53 = vadd.f32 %v5394_v51, %v5393_v46  ;;  %v7529_v54 = vadd.f32 %v1280_v48, %v1216_v50  ;;  %5980 = vmatpush3.bf16.msra.mxu1 %v6332_v38 }
 0x16e   : > { %v5396_v55 = vpop.f32.mrf.mxu0  ;;  %5981 = vmatprep.subr.bf16.mxu1 %v6335_v5 }
 0x16f   : > { %v1221_v56 = vadd.f32 %v5395_v53, %v7423_v28  ;;  %5738 = vmatpush3.bf16.msra.mxu0 %v6334_v47 }
 0x170   : > { %v5397_v4 = vpop.f32.mrf.mxu0 }
 0x171   : > { %v7533_v62 = vadd.f32 %v5821_v14, %v1221_v56  ;;  %v5398_v59 = vadd.f32 %v5397_v4, %v5396_v55  ;;  %5982 = vmatpush3.bf16.msra.mxu1 %v6335_v5 }
 0x172   : > { %v5427_v10 = vpop.f32.mrf.mxu0  ;;  %4069 = vmatmul.mubr.bf16.vlgmr.msra.gmra.mxu0 %v7322_v24 }
 0x173   : > { %v1224_v60 = vadd.f32 %v5398_v59, %v7438_v25  ;;  %4076 = vmatprep.mubr.bf16.mxu0 %v7334_v19 }
 0x174   : > { %v5428_v61 = vpop.f32.mrf.mxu0  ;;  %v5841_v63 = vpop.f32.mrf.mxu1  ;;  %5984 = vmatmul.mubr.bf16.vlgmr.msra.gmra.mxu1 %v6337_v15 }
 0x175   : > { %v1289_v28 = vadd.f32 %v5822_v36, %v1224_v60  ;;  %v5429_v0 = vadd.f32 %v5428_v61, %v5427_v10  ;;  %5987 = vmatprep.mubr.bf16.mxu1 %v6338_v27 }
 0x176   : > { %v5430_v2 = vpop.f32.mrf.mxu0  ;;  %v1664_v6 = vpop.f32.mrf.mxu1 }
 0x177   : > { %v1665_v7 = vadd.f32 %v5429_v0, %v1664_v6 }
 0x178   : > { %v5431_v9 = vpop.f32.mrf.mxu0  ;;  %v5842_v40 = vpop.f32.mrf.mxu1 }
 0x179   : > { %v1695_v13 = vadd.f32 %v1665_v7, %v7461_v52  ;;  %v5432_v24 = vadd.f32 %v5431_v9, %v5430_v2 }
 0x17a   : > { %v5433_v14 = vpop.f32.mrf.mxu0  ;;  %v1667_v25 = vpop.f32.mrf.mxu1  ;;  %4077 = vmatmul.mubr.bf16.gmra.mxu0 %v7359_v45 }
 0x17b   : > { %v1668_v19 = vadd.f32 %v5432_v24, %v1667_v25  ;;  %4084 = vmatprep.mubr.bf16.mxu0 %v7371_v44 }
 0x17c   : > { %v5434_v16 = vpop.f32.mrf.mxu0  ;;  %v5845_v17 = vpop.f32.mrf.mxu1  ;;  %5988 = vmatmul.mubr.bf16.gmra.mxu1 %v6339_v12 }
 0x17d   : > { %v1696_v21 = vadd.f32 %v1668_v19, %v7477_v11  ;;  %v5435_v18 = vadd.f32 %v5434_v16, %v5433_v14 }
 0x17e   : > { %v5436_v22 = vpop.f32.mrf.mxu0  ;;  %v1680_v26 = vpop.f32.mrf.mxu1 }
 0x17f   : > { %v1673_v23 = vadd.f32 %v5841_v63, %v5435_v18 }
 0x180   : > { %v5437_v52 = vpop.f32.mrf.mxu0  ;;  %v5846_v32 = vpop.f32.mrf.mxu1 }
 0x181   : > { %v1697_v29 = vadd.f32 %v1673_v23, %v7493_v33  ;;  %v5438_v30 = vadd.f32 %v5437_v52, %v5436_v22 }
 0x182   : > { %v5439_v45 = vpop.f32.mrf.mxu0  ;;  %4085 = vmatmul.mubr.bf16.gmra.mxu0 %v7391_v1  ;;  %v1683_v35 = vpop.f32.mrf.mxu1 }
 0x183   : > { %v1676_v44 = vadd.f32 %v5842_v40, %v5438_v30  ;;  %4092 = vmatprep.mubr.bf16.mxu0 %v5230_v49 }
 0x184   : > { %v5440_v31 = vpop.f32.mrf.mxu0 }
 0x185   : > { %v1698_v3 = vadd.f32 %v1676_v44, %v7505_v58  ;;  %v5441_v11 = vadd.f32 %v5440_v31, %v5439_v45 }
 0x186   : > { %v5442_v34 = vpop.f32.mrf.mxu0 }
 0x187   : > { %v1681_v36 = vadd.f32 %v5441_v11, %v1680_v26 }
 0x188   : > { %v5443_v38 = vpop.f32.mrf.mxu0 }
 0x189   : > { %v1699_v39 = vadd.f32 %v1681_v36, %v7519_v42  ;;  %v5444_v33 = vadd.f32 %v5443_v38, %v5442_v34 }
 0x18a   : > { %v5445_v41 = vpop.f32.mrf.mxu0  ;;  %4093 = vmatmul.mubr.bf16.gmra.mxu0 %v5229_v57 }
 0x18b   : > { %v1684_v37 = vadd.f32 %v5444_v33, %v1683_v35 }
 0x18c   : > { %v5446_v1 = vpop.f32.mrf.mxu0 }
 0x18d   : > { %v1700_v43 = vadd.f32 %v1684_v37, %v7529_v54  ;;  %v5447_v46 = vadd.f32 %v5446_v1, %v5445_v41 }
 0x18e   : > { %v5448_v48 = vpop.f32.mrf.mxu0 }
 0x18f   : > { %v1689_v5 = vadd.f32 %v5845_v17, %v5447_v46 }
 0x190   : > { %v5449_v58 = vpop.f32.mrf.mxu0 }
 0x191   : > { %v1701_v50 = vadd.f32 %v1689_v5, %v7533_v62  ;;  %v5450_v47 = vadd.f32 %v5449_v58, %v5448_v48 }
 0x192   : > { %v5479_v8 = vpop.f32.mrf.mxu0 }
 0x193   : > { %v1692_v51 = vadd.f32 %v5846_v32, %v5450_v47 }
 0x194   : > { %v5480_v53 = vpop.f32.mrf.mxu0  ;;  %v5865_v55 = vpop.f32.mrf.mxu1 }
 0x195   : > { %v1702_v56 = vadd.f32 %v1692_v51, %v1289_v28  ;;  %v5481_v42 = vadd.f32 %v5480_v53, %v5479_v8 }
 0x196   : > { %v5482_v4 = vpop.f32.mrf.mxu0  ;;  %v2080_v15 = vpop.f32.mrf.mxu1 }
 0x197   : > { %v2081_v59 = vadd.f32 %v5481_v42, %v2080_v15 }
 0x198   : > { %v5483_v27 = vpop.f32.mrf.mxu0  ;;  %v5866_v10 = vpop.f32.mrf.mxu1 }
 0x199   : > { %v2111_v60 = vadd.f32 %v2081_v59, %v1695_v13  ;;  %v5484_v54 = vadd.f32 %v5483_v27, %v5482_v4 }
 0x19a   : > { %v5485_v61 = vpop.f32.mrf.mxu0  ;;  %v2083_v63 = vpop.f32.mrf.mxu1 }
 0x19b   : > { %v2084_v0 = vadd.f32 %v5484_v54, %v2083_v63 }
 0x19c   : > { %v5486_v2 = vpop.f32.mrf.mxu0  ;;  %v5869_v6 = vpop.f32.mrf.mxu1 }
 0x19d   : > { %v2112_v62 = vadd.f32 %v2084_v0, %v1696_v21  ;;  %v5487_v7 = vadd.f32 %v5486_v2, %v5485_v61 }
 0x19e   : > { %v5488_v9 = vpop.f32.mrf.mxu0  ;;  %v2096_v24 = vpop.f32.mrf.mxu1 }
 0x19f   : > { %v2089_v40 = vadd.f32 %v5865_v55, %v5487_v7 }
 0x1a0   : > { %v5489_v12 = vpop.f32.mrf.mxu0  ;;  %v5870_v17 = vpop.f32.mrf.mxu1 }
 0x1a1   : > { %v2113_v28 = vadd.f32 %v2089_v40, %v1697_v29  ;;  %v5490_v14 = vadd.f32 %v5489_v12, %v5488_v9 }
 0x1a2   : > { %v5491_v25 = vpop.f32.mrf.mxu0  ;;  %v2099_v49 = vpop.f32.mrf.mxu1 }
 0x1a3   : > { %v2092_v19 = vadd.f32 %v5866_v10, %v5490_v14 }
 0x1a4   : > { %v5492_v16 = vpop.f32.mrf.mxu0 }
 0x1a5   : > { %v2114_v20 = vadd.f32 %v2092_v19, %v1698_v3  ;;  %v5493_v13 = vadd.f32 %v5492_v16, %v5491_v25 }
 0x1a6   : > { %v5494_v18 = vpop.f32.mrf.mxu0 }
 0x1a7   : > { %v2097_v22 = vadd.f32 %v5493_v13, %v2096_v24 }
 0x1a8   : > { %v5495_v23 = vpop.f32.mrf.mxu0 }
 0x1a9   : > { %v2115_v52 = vadd.f32 %v2097_v22, %v1699_v39  ;;  %v5496_v26 = vadd.f32 %v5495_v23, %v5494_v18 }
 0x1aa   : > { %v5497_v21 = vpop.f32.mrf.mxu0 }
 0x1ab   : > { %v2100_v30 = vadd.f32 %v5496_v26, %v2099_v49 }
 0x1ac   : > { %v5498_v45 = vpop.f32.mrf.mxu0 }
 0x1ad   : > { %v2116_v44 = vadd.f32 %v2100_v30, %v1700_v43  ;;  %v5499_v31 = vadd.f32 %v5498_v45, %v5497_v21 }
 0x1ae   : > { %v5500_v32 = vpop.f32.mrf.mxu0 }
 0x1af   : > { %v2105_v29 = vadd.f32 %v5869_v6, %v5499_v31 }
 0x1b0   : > { %v5501_v11 = vpop.f32.mrf.mxu0 }
 0x1b1   : > { %v2117_v34 = vadd.f32 %v2105_v29, %v1701_v50  ;;  %v5502_v57 = vadd.f32 %v5501_v11, %v5500_v32 }
 0x1b2   : > { %v5531_v36 = vpop.f32.mrf.mxu0 }
 0x1b3   : > { %v2108_v38 = vadd.f32 %v5870_v17, %v5502_v57 }
 0x1b4   : > { %v5532_v3 = vpop.f32.mrf.mxu0  ;;  %v5889_v35 = vpop.f32.mrf.mxu1 }
 0x1b5   : > { %v2118_v33 = vadd.f32 %v2108_v38, %v1702_v56  ;;  %v5533_v41 = vadd.f32 %v5532_v3, %v5531_v36 }
 0x1b6   : > { %v5534_v37 = vpop.f32.mrf.mxu0  ;;  %v2491_v1 = vpop.f32.mrf.mxu1 }
 0x1b7   : > { %v2492_v39 = vadd.f32 %v5533_v41, %v2491_v1 }
 0x1b8   : > { %v5535_v46 = vpop.f32.mrf.mxu0  ;;  %v5890_v48 = vpop.f32.mrf.mxu1 }
 0x1b9   : > { %v2522_v5 = vadd.f32 %v2492_v39, %v2111_v60  ;;  %v5536_v58 = vadd.f32 %v5535_v46, %v5534_v37 }
 0x1ba   : > { %v5537_v43 = vpop.f32.mrf.mxu0  ;;  %v2494_v47 = vpop.f32.mrf.mxu1 }
 0x1bb   : > { %v2495_v8 = vadd.f32 %v5536_v58, %v2494_v47 }
 0x1bc   : > { %v5538_v51 = vpop.f32.mrf.mxu0  ;;  %v5893_v53 = vpop.f32.mrf.mxu1 }
 0x1bd   : > { %v2523_v50 = vadd.f32 %v2495_v8, %v2112_v62  ;;  %v5539_v55 = vadd.f32 %v5538_v51, %v5537_v43 }
 0x1be   : > { %v5540_v42 = vpop.f32.mrf.mxu0  ;;  %v2507_v59 = vpop.f32.mrf.mxu1 }
 0x1bf   : > { %v2500_v4 = vadd.f32 %v5889_v35, %v5539_v55 }
 0x1c0   : > { %v5541_v15 = vpop.f32.mrf.mxu0  ;;  %v5894_v63 = vpop.f32.mrf.mxu1 }
 0x1c1   : > { %v2524_v56 = vadd.f32 %v2500_v4, %v2113_v28  ;;  %v5542_v27 = vadd.f32 %v5541_v15, %v5540_v42 }
 0x1c2   : > { %v5543_v10 = vpop.f32.mrf.mxu0  ;;  %v2510_v9 = vpop.f32.mrf.mxu1 }
 0x1c3   : > { %v2503_v54 = vadd.f32 %v5890_v48, %v5542_v27 }
 0x1c4   : > { %v5544_v61 = vpop.f32.mrf.mxu0 }
 0x1c5   : > { %v2525_v0 = vadd.f32 %v2503_v54, %v2114_v20  ;;  %v5545_v60 = vadd.f32 %v5544_v61, %v5543_v10 }
 0x1c6   : > { %v5546_v2 = vpop.f32.mrf.mxu0 }
 0x1c7   : > { %v2508_v6 = vadd.f32 %v5545_v60, %v2507_v59 }
 0x1c8   : > { %v5547_v7 = vpop.f32.mrf.mxu0 }
 0x1c9   : > { %v2526_v40 = vadd.f32 %v2508_v6, %v2115_v52  ;;  %v5548_v12 = vadd.f32 %v5547_v7, %v5546_v2 }
 0x1ca   : > { %v5549_v62 = vpop.f32.mrf.mxu0 }
 0x1cb   : > { %v2511_v24 = vadd.f32 %v5548_v12, %v2510_v9 }
 0x1cc   : > { %v5550_v14 = vpop.f32.mrf.mxu0 }
 0x1cd   : > { %v2527_v25 = vadd.f32 %v2511_v24, %v2116_v44  ;;  %v5551_v19 = vadd.f32 %v5550_v14, %v5549_v62 }
 0x1ce   : > { %v5552_v16 = vpop.f32.mrf.mxu0 }
 0x1cf   : > { %v2516_v28 = vadd.f32 %v5893_v53, %v5551_v19 }
 0x1d0   : > { %v5553_v17 = vpop.f32.mrf.mxu0 }
 0x1d1   : > { %v2528_v13 = vadd.f32 %v2516_v28, %v2117_v34  ;;  %v5554_v18 = vadd.f32 %v5553_v17, %v5552_v16 }
 0x1d2   : > { %v5583_v22 = vpop.f32.mrf.mxu0 }
 0x1d3   : > { %v2519_v23 = vadd.f32 %v5894_v63, %v5554_v18 }
 0x1d4   : > { %v5584_v20 = vpop.f32.mrf.mxu0  ;;  %v5913_v49 = vpop.f32.mrf.mxu1 }
 0x1d5   : > { %v2529_v26 = vadd.f32 %v2519_v23, %v2118_v33  ;;  %v5585_v21 = vadd.f32 %v5584_v20, %v5583_v22 }
 0x1d6   : > { %v5586_v30 = vpop.f32.mrf.mxu0  ;;  %v2902_v45 = vpop.f32.mrf.mxu1 }
 0x1d7   : > { %v2903_v52 = vadd.f32 %v5585_v21, %v2902_v45 }
 0x1d8   : > { %v5587_v31 = vpop.f32.mrf.mxu0  ;;  %v5914_v32 = vpop.f32.mrf.mxu1 }
 0x1d9   : > { %v2933_v29 = vadd.f32 %v2903_v52, %v2522_v5  ;;  %v5588_v11 = vadd.f32 %v5587_v31, %v5586_v30 }
 0x1da   : > { %v5589_v44 = vpop.f32.mrf.mxu0  ;;  %v2905_v57 = vpop.f32.mrf.mxu1 }
 0x1db   : > { %v2906_v36 = vadd.f32 %v5588_v11, %v2905_v57 }
 0x1dc   : > { %v5590_v38 = vpop.f32.mrf.mxu0  ;;  %v5917_v3 = vpop.f32.mrf.mxu1 }
 0x1dd   : > { %v2934_v34 = vadd.f32 %v2906_v36, %v2523_v50  ;;  %v5591_v35 = vadd.f32 %v5590_v38, %v5589_v44 }
 0x1de   : > { %v5592_v41 = vpop.f32.mrf.mxu0  ;;  %v2918_v39 = vpop.f32.mrf.mxu1 }
 0x1df   : > { %v2911_v37 = vadd.f32 %v5913_v49, %v5591_v35 }
 0x1e0   : > { %v5593_v1 = vpop.f32.mrf.mxu0  ;;  %v5918_v47 = vpop.f32.mrf.mxu1 }
 0x1e1   : > { %v2935_v33 = vadd.f32 %v2911_v37, %v2524_v56  ;;  %v5594_v46 = vadd.f32 %v5593_v1, %v5592_v41 }
 0x1e2   : > { %v5595_v48 = vpop.f32.mrf.mxu0  ;;  %v2921_v42 = vpop.f32.mrf.mxu1 }
 0x1e3   : > { %v2914_v58 = vadd.f32 %v5914_v32, %v5594_v46 }
 0x1e4   : > { %v5596_v43 = vpop.f32.mrf.mxu0 }
 0x1e5   : > { %v2936_v8 = vadd.f32 %v2914_v58, %v2525_v0  ;;  %v5597_v5 = vadd.f32 %v5596_v43, %v5595_v48 }
 0x1e6   : > { %v5598_v51 = vpop.f32.mrf.mxu0 }
 0x1e7   : > { %v2919_v53 = vadd.f32 %v5597_v5, %v2918_v39 }
 0x1e8   : > { %v5599_v55 = vpop.f32.mrf.mxu0 }
 0x1e9   : > { %v2937_v4 = vadd.f32 %v2919_v53, %v2526_v40  ;;  %v5600_v15 = vadd.f32 %v5599_v55, %v5598_v51 }
 0x1ea   : > { %v5601_v50 = vpop.f32.mrf.mxu0 }
 0x1eb   : > { %v2922_v59 = vadd.f32 %v5600_v15, %v2921_v42 }
 0x1ec   : > { %v5602_v27 = vpop.f32.mrf.mxu0 }
 0x1ed   : > { %v2938_v10 = vadd.f32 %v2922_v59, %v2527_v25  ;;  %v5603_v54 = vadd.f32 %v5602_v27, %v5601_v50 }
 0x1ee   : > { %v5604_v61 = vpop.f32.mrf.mxu0 }
 0x1ef   : > { %v2927_v56 = vadd.f32 %v5917_v3, %v5603_v54 }
 0x1f0   : > { %v5605_v63 = vpop.f32.mrf.mxu0 }
 0x1f1   : > { %v2939_v60 = vadd.f32 %v2927_v56, %v2528_v13  ;;  %v5606_v2 = vadd.f32 %v5605_v63, %v5604_v61 }
 0x1f2   : > { %v5635_v6 = vpop.f32.mrf.mxu0 }
 0x1f3   : > { %v2930_v7 = vadd.f32 %v5918_v47, %v5606_v2 }
 0x1f4   : > { %v5636_v0 = vpop.f32.mrf.mxu0  ;;  %v5937_v9 = vpop.f32.mrf.mxu1 }
 0x1f5   : > { %v7553_v12 = vadd.f32 %v2930_v7, %v2529_v26  ;;  %v5637_v62 = vadd.f32 %v5636_v0, %v5635_v6 }
 0x1f6   : > { %v5638_v24 = vpop.f32.mrf.mxu0  ;;  %v3313_v40 = vpop.f32.mrf.mxu1 }
 0x1f7   : > { %v3314_v14 = vadd.f32 %v5637_v62, %v3313_v40 }
 0x1f8   : > { %v5639_v19 = vpop.f32.mrf.mxu0  ;;  %v5938_v16 = vpop.f32.mrf.mxu1 }
 0x1f9   : > { %v7555_v28 = vadd.f32 %v3314_v14, %v2933_v29  ;;  %v5640_v25 = vadd.f32 %v5639_v19, %v5638_v24 }
 0x1fa   : > { %v5641_v17 = vpop.f32.mrf.mxu0  ;;  %v3316_v18 = vpop.f32.mrf.mxu1 }
 0x1fb   : > { %v3317_v22 = vadd.f32 %v5640_v25, %v3316_v18 }
 0x1fc   : > { %v5642_v13 = vpop.f32.mrf.mxu0  ;;  %v5941_v23 = vpop.f32.mrf.mxu1 }
 0x1fd   : > { %v7557_v20 = vadd.f32 %v3317_v22, %v2934_v34  ;;  %v5643_v49 = vadd.f32 %v5642_v13, %v5641_v17 }
 0x1fe   : > { %v5644_v21 = vpop.f32.mrf.mxu0  ;;  %v3329_v45 = vpop.f32.mrf.mxu1 }
 0x1ff   : > { %v3322_v26 = vadd.f32 %v5937_v9, %v5643_v49 }
 0x200   : > { %v5645_v30 = vpop.f32.mrf.mxu0  ;;  %v7561_v44 = vpop.f32.mrf.mxu1 }
 0x201   : > { %v7559_v52 = vadd.f32 %v3322_v26, %v2935_v33  ;;  %v5646_v31 = vadd.f32 %v5645_v30, %v5644_v21 }
 0x202   : > { %v5647_v32 = vpop.f32.mrf.mxu0  ;;  %v3332_v35 = vpop.f32.mrf.mxu1 }
 0x203   : > { %v3325_v11 = vadd.f32 %v5938_v16, %v5646_v31 }
 0x204   : > { %v5648_v29 = vpop.f32.mrf.mxu0 }
 0x205   : > { %v7563_v57 = vadd.f32 %v3325_v11, %v2936_v8  ;;  %v5649_v36 = vadd.f32 %v5648_v29, %v5647_v32 }
 0x206   : > { %v5650_v38 = vpop.f32.mrf.mxu0 }
 0x207   : > { %v3330_v3 = vadd.f32 %v5649_v36, %v3329_v45 }
 0x208   : > { %v5651_v34 = vpop.f32.mrf.mxu0 }
 0x209   : > { %v7565_v41 = vadd.f32 %v3330_v3, %v2937_v4  ;;  %v5652_v37 = vadd.f32 %v5651_v34, %v5650_v38 }
 0x20a   : > { %v5653_v1 = vpop.f32.mrf.mxu0 }
 0x20b   : > { %v3333_v39 = vadd.f32 %v5652_v37, %v3332_v35 }
 0x20c   : > { %v5654_v33 = vpop.f32.mrf.mxu0 }
 0x20d   : > { %v7567_v46 = vadd.f32 %v3333_v39, %v2938_v10  ;;  %v5655_v48 = vadd.f32 %v5654_v33, %v5653_v1 }
 0x20e   : > { %v7569_v58 = vpop.f32.mrf.mxu0 }
 0x20f   : > { %v3338_v43 = vadd.f32 %v5941_v23, %v5655_v48 }
 0x210   : > { %v7571_v47 = vpop.f32.mrf.mxu0 }
 0x211   : > { %v7573_v8 = vadd.f32 %v3338_v43, %v2939_v60 }
 0x212   : > { %v5687_v5 = vpop.f32.mrf.mxu0 }
 0x214   : > { %v5688_v51 = vpop.f32.mrf.mxu0  ;;  %v5961_v55 = vpop.f32.mrf.mxu1 }
 0x215   : > { %v5689_v24 = vadd.f32 %v5688_v51, %v5687_v5 }
 0x216   : > { %v5690_v53 = vpop.f32.mrf.mxu0  ;;  %v3724_v15 = vpop.f32.mrf.mxu1 }
 0x217   : > { %v3725_v16 = vadd.f32 %v5689_v24, %v3724_v15 }
 0x218   : > { %v5691_v42 = vpop.f32.mrf.mxu0  ;;  %v5962_v27 = vpop.f32.mrf.mxu1 }
 0x219   : > { %v5692_v25 = vadd.f32 %v5691_v42, %v5690_v53  ;;  %v3755_v49 = vadd.f32 %v3725_v16, %v7555_v28 }
 0x21a   : > { %v5693_v4 = vpop.f32.mrf.mxu0  ;;  %v3727_v61 = vpop.f32.mrf.mxu1 }
 0x21b   : > { %v3728_v21 = vadd.f32 %v5692_v25, %v3727_v61 }
 0x21c   : > { %v5694_v50 = vpop.f32.mrf.mxu0  ;;  %v7575_v63 = vpop.f32.mrf.mxu1 }
 0x21d   : > { %v5695_v26 = vadd.f32 %v5694_v50, %v5693_v4  ;;  %v3756_v38 = vadd.f32 %v3728_v21, %v7557_v20 }
 0x21e   : > { %v5696_v59 = vpop.f32.mrf.mxu0  ;;  %v3740_v60 = vpop.f32.mrf.mxu1 }
 0x21f   : > { %v3733_v3 = vadd.f32 %v5961_v55, %v5695_v26 }
 0x220   : > { %v5697_v10 = vpop.f32.mrf.mxu0  ;;  %v7577_v9 = vpop.f32.mrf.mxu1 }
 0x221   : > { %v5698_v34 = vadd.f32 %v5697_v10, %v5696_v59  ;;  %v3757_v48 = vadd.f32 %v3733_v3, %v7559_v52 }
 0x222   : > { %v5699_v54 = vpop.f32.mrf.mxu0  ;;  %v3743_v14 = vpop.f32.mrf.mxu1 }
 0x223   : > { %v3736_v43 = vadd.f32 %v5962_v27, %v5698_v34 }
 0x224   : > { %v5700_v56 = vpop.f32.mrf.mxu0 }
 0x225   : > { %v5701_v5 = vadd.f32 %v5700_v56, %v5699_v54  ;;  %v3758_v20 = vadd.f32 %v3736_v43, %v7563_v57 }
 0x226   : > { %v5702_v2 = vpop.f32.mrf.mxu0 }
 0x227   : > { %v3741_v55 = vadd.f32 %v5701_v5, %v3740_v60 }
 0x228   : > { %v5703_v6 = vpop.f32.mrf.mxu0 }
 0x229   : > { %v5704_v59 = vadd.f32 %v5703_v6, %v5702_v2  ;;  %v3759_v52 = vadd.f32 %v3741_v55, %v7565_v41 }
 0x22a   : > { %v5705_v7 = vpop.f32.mrf.mxu0 }
 0x22b   : > { %v3744_v27 = vadd.f32 %v5704_v59, %v3743_v14 }
 0x22c   : > { %v5706_v0 = vpop.f32.mrf.mxu0 }
 0x22d   : > { %v5707_v54 = vadd.f32 %v5706_v0, %v5705_v7  ;;  %v3760_v2 = vadd.f32 %v3744_v27, %v7567_v46 }
 0x22e   : > { %v5708_v62 = vpop.f32.mrf.mxu0 }
 0x22f   : > { %v3749_v6 = vadd.f32 %v7575_v63, %v5707_v54 }
 0x230   : > { %v5709_v40 = vpop.f32.mrf.mxu0 }
 0x231   : > { %v3761_v26 = vadd.f32 %v3749_v6, %v7573_v8 }
 0x232   : > { %v5739_v19 = vpop.f32.mrf.mxu0 }
 0x234   : > { %v5740_v17 = vpop.f32.mrf.mxu0  ;;  %v5985_v18 = vpop.f32.mrf.mxu1 }
 0x235   : > { %v5741_v22 = vadd.f32 %v5740_v17, %v5739_v19 }
 0x236   : > { %v5742_v13 = vpop.f32.mrf.mxu0  ;;  %v4135_v23 = vpop.f32.mrf.mxu1 }
 0x237   : > { %v4136_v30 = vadd.f32 %v5741_v22, %v4135_v23  ;;  %v5658_v22 = vadd.f32 %v7571_v47, %v7569_v58  ;;  %v5710_v23 = vadd.f32 %v5709_v40, %v5708_v62 }
 0x238   : > { %v5743_v45 = vpop.f32.mrf.mxu0  ;;  %v5986_v31 = vpop.f32.mrf.mxu1 }
 0x239   : > { %v7580_v32 = vadd.f32 %v4136_v30, %v3755_v49  ;;  %v5744_v11 = vadd.f32 %v5743_v45, %v5742_v13  ;;  %v3341_v41 = vadd.f32 %v7561_v44, %v5658_v22  ;;  %v3752_v30 = vadd.f32 %v7577_v9, %v5710_v23 }
 0x23a   : > { %v5745_v29 = vpop.f32.mrf.mxu0  ;;  %v4138_v36 = vpop.f32.mrf.mxu1 }
 0x23b   : > { %v4139_v35 = vadd.f32 %v5744_v11, %v4138_v36  ;;  %v3351_v45 = vadd.f32 %v3341_v41, %v7553_v12 }
 0x23c   : > { %v5746_v37 = vpop.f32.mrf.mxu0  ;;  %v5989_v1 = vpop.f32.mrf.mxu1 }
 0x23d   : > { %v7583_v39 = vadd.f32 %v4139_v35, %v3756_v38  ;;  %v5747_v28 = vadd.f32 %v5746_v37, %v5745_v29  ;;  %v3762_v11 = vadd.f32 %v3752_v30, %v3351_v45 }
 0x23e   : > { %v5748_v33 = vpop.f32.mrf.mxu0  ;;  %v4151_v42 = vpop.f32.mrf.mxu1 }
 0x23f   : > { %v4144_v51 = vadd.f32 %v5985_v18, %v5747_v28 }
 0x240   : > { %v5749_v53 = vpop.f32.mrf.mxu0  ;;  %v5990_v24 = vpop.f32.mrf.mxu1 }
 0x241   : > { %v4168_v4 = vadd.f32 %v4144_v51, %v3757_v48  ;;  %v5750_v15 = vadd.f32 %v5749_v53, %v5748_v33 }
 0x242   : > { %v5751_v50 = vpop.f32.mrf.mxu0  ;;  %v4154_v18 = vpop.f32.mrf.mxu1 }
 0x243   : > { %v4147_v10 = vadd.f32 %v5986_v31, %v5750_v15 }
 0x244   : > { %v5752_v61 = vpop.f32.mrf.mxu0 }
 0x245   : > { %v4169_v19 = vadd.f32 %v4147_v10, %v3758_v20  ;;  %v5753_v16 = vadd.f32 %v5752_v61, %v5751_v50 }
 0x246   : > { %v5754_v25 = vpop.f32.mrf.mxu0 }
 0x247   : > { %v4152_v56 = vadd.f32 %v5753_v16, %v4151_v42 }
 0x248   : > { %v5755_v17 = vpop.f32.mrf.mxu0 }
 0x249   : > { %v4170_v13 = vadd.f32 %v4152_v56, %v3759_v52  ;;  %v5756_v57 = vadd.f32 %v5755_v17, %v5754_v25 }
 0x24a   : > { %v5757_v60 = vpop.f32.mrf.mxu0 }
 0x24b   : > { %v4155_v49 = vadd.f32 %v5756_v57, %v4154_v18 }
 0x24c   : > { %v5758_v21 = vpop.f32.mrf.mxu0 }
 0x24d   : > { %v4171_v14 = vadd.f32 %v4155_v49, %v3760_v2  ;;  %v5759_v7 = vadd.f32 %v5758_v21, %v5757_v60 }
 0x24e   : > { %v5760_v0 = vpop.f32.mrf.mxu0 }
 0x24f   : > { %v4160_v58 = vadd.f32 %v5989_v1, %v5759_v7 }
 0x250   : > { %v5761_v47 = vpop.f32.mrf.mxu0 }
 0x251   : > { %v4172_v31 = vadd.f32 %v4160_v58, %v3761_v26  ;;  %v5762_v46 = vadd.f32 %v5761_v47, %v5760_v0  ;;  %4176 = sbr.rel (%p4489_p7) target bundleno = 600 (0x258), region = 176 }
 0x253   : > { %v4163_v63 = vadd.f32 %v5990_v24, %v5762_v46 }
 0x255   : > { %v4173_v62 = vadd.f32 %v4163_v63, %v3762_v11 }
 0x256   : > { %v6392_v44 = vmov 0.0  }
 0x257   : > { %4177 = vst [vmem:[%s6459_s29] sm:$0xff] %v6392_v44  ;;  %4178 = vst [vmem:[%s6464_s7] sm:$0xff] %v6392_v44 }
 0x258 PF: > { %v4180_v8 = vadd.f32 %v7583_v39, %v7580_v32  ;;  %v4196_v12 = vmul.f32 %v7580_v32, %v7580_v32  ;;  %v4197_v9 = vmul.f32 %v7583_v39, %v7583_v39  ;;  %v4198_v40 = vmul.f32 %v4168_v4, %v4168_v4 }
 0x259   : > { %v4199_v36 = vmul.f32 %v4169_v19, %v4169_v19  ;;  %v5287_v3 = vpack.c.bf16 %v7583_v39, %v7580_v32  ;;  %v5292_v34 = vpack.c.bf16 %v4169_v19, %v4168_v4  ;;  %v5297_v35 = vpack.c.bf16 %v4171_v14, %v4170_v13 }
 0x25a   : > { %v4181_v29 = vadd.f32 %v4180_v8, %v4168_v4  ;;  %v4204_v38 = vadd.f32 %v4197_v9, %v4196_v12  ;;  %v5302_v37 = vpack.c.bf16 %v4173_v62, %v4172_v31  ;;  %v4200_v28 = vmul.f32 %v4170_v13, %v4170_v13 }
 0x25b   : > { %5288 = vst [vmem:[%s6469_s11] sm:$0xff] %v5287_v3   ;;  %5304 = vst [vmem:[%s6469_s11 + $0x8] sm:$0xff] %v5292_v34   ;;  %v4201_v43 = vmul.f32 %v4171_v14, %v4171_v14  ;;  %v4202_v53 = vmul.f32 %v4172_v31, %v4172_v31  ;;  %v4203_v50 = vmul.f32 %v4173_v62, %v4173_v62 }
 0x25c   : > { %v4182_v1 = vadd.f32 %v4181_v29, %v4169_v19  ;;  %v4205_v33 = vadd.f32 %v4204_v38, %v4198_v40  ;;  %5305 = vst [vmem:[%s6469_s11 + $0x10] sm:$0xff] %v5297_v35   ;;  %5306 = vst [vmem:[%s6469_s11 + $0x18] sm:$0xff] %v5302_v37  }
 0x25e   : > { %v4183_v48 = vadd.f32 %v4182_v1, %v4170_v13  ;;  %v4206_v5 = vadd.f32 %v4205_v33, %v4199_v36  ;;  %v4179_v27 = vld [vmem:[%s6459_s29] sm:$0x1] }
 0x25f   : > { %v4195_v17 = vld [vmem:[%s6464_s7] sm:$0x1] }
 0x260   : > { %v4184_v51 = vadd.f32 %v4183_v48, %v4171_v14  ;;  %v4207_v42 = vadd.f32 %v4206_v5, %v4200_v28 }
 0x262   : > { %v4185_v15 = vadd.f32 %v4184_v51, %v4172_v31  ;;  %v4208_v32 = vadd.f32 %v4207_v42, %v4201_v43 }
 0x264   : > { %v4186_v39 = vadd.f32 %v4185_v15, %v4173_v62  ;;  %v4209_v4 = vadd.f32 %v4208_v32, %v4202_v53 }
 0x266   : > { %v4187_v20 = vrot.slane %v4186_v39, 4  ;;  %v4210_v55 = vadd.f32 %v4209_v4, %v4203_v50 }
 0x268   : > { %v4188_v59 = vadd.f32 %v4187_v20, %v4186_v39  ;;  %v4211_v10 = vrot.slane %v4210_v55, 4 }
 0x26a   : > { %v4189_v61 = vrot.slane %v4188_v59, 2  ;;  %v4212_v24 = vadd.f32 %v4211_v10, %v4210_v55 }
 0x26c   : > { %v4190_v19 = vadd.f32 %v4189_v61, %v4188_v59  ;;  %v4213_v16 = vrot.slane %v4212_v24, 2 }
 0x26e   : > { %v4191_v25 = vrot.slane %v4190_v19, 1  ;;  %v4214_v52 = vadd.f32 %v4213_v16, %v4212_v24 }
 0x270   : > { %v4192_v54 = vadd.f32 %v4191_v25, %v4190_v19  ;;  %v4215_v56 = vrot.slane %v4214_v52, 1 }
 0x272   : > { %v4193_v18 = vadd.f32 %v4192_v54, %v4179_v27  ;;  %v4216_v22 = vadd.f32 %v4215_v56, %v4214_v52 }
 0x274   : > { %4194 = vst [vmem:[%s6459_s29] sm:$0x1] %v4193_v18  ;;  %v4217_v13 = vadd.f32 %v4216_v22, %v4195_v17 }
 0x276   : > { %4218 = vst [vmem:[%s6464_s7] sm:$0x1] %v4217_v13 }
 0x277 PF: > { %s15_s19 = sadd.s32 1, %s6390_s19   ;;  %s7636_s15 = smov %s6382_s17 }
 0x278   : > { %p12_p10 = scmp.ge.s32.totalorder %s15_s19, 18   ;;  %s7637_s16 = smov %s6386_s18 }
 0x279   : > { %s7638_s17 = smov %s7641_s20  ;;  %s7639_s18 = smov %s7645_s21 }
 0x27a   :  { %14 = sbr.rel (!%p12_p10) target bundleno = 3 (0x3), region = 285 }
 0x27f   :  { %4316 = vsyncmov [#allocation3] }
 0x282   :  { %s4317_s29 = vpop.sfrf %4316 }
 0x283   :  { %p5267_p11 = scmp.ne.s32.totalorder %s4317_s29, 0 }
 0x285   :  { %4321 = shalt.err (%p5267_p11)  }
 0x286   :  { %4323 = vsyncmov [#allocation3 + $0x1] }
 0x289   :  { %s4324_s7 = vpop.sfrf %4323 }
 0x28a   :  { %p5268_p12 = scmp.ne.s32.totalorder %s4324_s7, 0 }
 0x28c   :  { %4328 = shalt.err (%p5268_p12)  }
 0x28d   :  { %4330 = vsyncmov [#allocation3 + $0x2] }
 0x290   :  { %s4331_s11 = vpop.sfrf %4330 }
 0x291   :  { %p5269_p13 = scmp.ne.s32.totalorder %s4331_s11, 0 }
 0x293   :  { %4335 = shalt.err (%p5269_p13)  }
 0x294   :  { %4337 = vsyncmov [#allocation3 + $0x3] }
 0x297   :  { %s4338_s14 = vpop.sfrf %4337 }
 0x298   :  { %p5270_p0 = scmp.ne.s32.totalorder %s4338_s14, 0 }
 0x29a   :  { %4342 = shalt.err (%p5270_p0)  }

</bundles_post_ra>
